<compile_context>
chip_gen: v6e
topology: v6e:2x2x1
jax: 0.10.0
libtpu: 0.0.40
codegen_flags: <defaults>
</compile_context>

<pallas_src>
import functools

import jax
import jax.numpy as jnp
from jax import lax
from jax.experimental import pallas as pl
from jax.experimental.pallas import tpu as pltpu


def _vmem_limit(bytes_needed):
    # bytes_needed already includes double-buffering; add headroom for Mosaic
    # internal scratch and clamp to 56 MiB so the request stays safely below
    # v7x's 64 MiB physical VMEM per TensorCore (v5e/v6e have 128 MiB).
    return int(min(56 * 2**20, max(16 * 2**20, bytes_needed + 4 * 2**20)))


# ----------------------------------------------------------------------------
# Fused kernel: conv1 -> SPPF pools -> (concat) conv2, one image per grid step
# ----------------------------------------------------------------------------
def _spp_fused_kernel(x_ref, w1_ref, s1_ref, b1_ref, w2_ref, s2_ref, b2_ref,
                      o_ref, vpad_ref, *, H, W, Ch):
    Cin = x_ref.shape[-1]
    Cout = o_ref.shape[-1]
    cdt = vpad_ref.dtype                       # branch / pooling storage dtype
    neg_inf = jnp.array(-jnp.inf, dtype=cdt)
    R = 2                                      # radius of one 5x5 pool stage

    # ---- conv1: 1x1 conv (channel matmul) + folded BN + SiLU ---------------
    x2d = x_ref[0].reshape(H * W, Cin)         # free reshape (lane dim intact)
    h = jnp.dot(x2d, w1_ref[...], preferred_element_type=jnp.float32)
    h = h * s1_ref[...] + b1_ref[...]
    h2d = (h * jax.nn.sigmoid(h)).astype(cdt)  # SiLU, (H*W, Ch)

    # ---- conv2 contribution of the un-pooled branch (concat chunk 0) -------
    acc = jnp.dot(h2d, w2_ref[0:Ch, :], preferred_element_type=jnp.float32)

    # ---- SPPF cascade of three 5x5 stride-1 max pools (== 5 / 9 / 13) ------
    # -inf frame for the row (H) pass: only the 2R border rows need init; the
    # interior is overwritten by every stage.
    vpad_ref[0:R, :, :] = jnp.full((R, W, Ch), -jnp.inf, cdt)
    vpad_ref[R + H:R + H + R, :, :] = jnp.full((R, W, Ch), -jnp.inf, cdt)
    # Column-pass edge masks: (1, W, 1) iota, broadcast inside jnp.where.
    col = lax.broadcasted_iota(jnp.int32, (1, W, 1), 1)
    shifts = (-2, -1, 1, 2)
    masks = {s: jnp.logical_and(col + s >= 0, col + s < W) for s in shifts}

    def pool5(img):                            # img: (H, W, Ch)
        # Row pass: interior write on the untiled leading axis, then max over
        # the five leading-axis-shifted views of the -inf padded scratch.
        vpad_ref[R:R + H, :, :] = img
        rp = vpad_ref[0:H, :, :]
        for d in range(1, 2 * R + 1):
            rp = jnp.maximum(rp, vpad_ref[d:d + H, :, :])
        # Column pass: sublane rotate (XLU slot) + iota mask emulates the
        # -inf edge padding, keeping rp as a value (no scratch write-back).
        out = rp
        for s in shifts:
            shifted = pltpu.roll(rp, shift=(-s) % W, axis=1)
            out = jnp.maximum(out, jnp.where(masks[s], shifted, neg_inf))
        return out

    p = h2d.reshape(H, W, Ch)
    for chunk in range(1, 4):                  # p5, p9, p13
        p = pool5(p)
        acc = acc + jnp.dot(p.reshape(H * W, Ch),
                            w2_ref[chunk * Ch:(chunk + 1) * Ch, :],
                            preferred_element_type=jnp.float32)

    # ---- conv2 epilogue: folded BN + SiLU -----------------------------------
    y = acc * s2_ref[...] + b2_ref[...]
    y = y * jax.nn.sigmoid(y)
    o_ref[0] = y.reshape(H, W, Cout).astype(o_ref.dtype)


def spp_bottleneck_nhwc(x_nhwc, params):
    """Fused SPPBottleneck on NHWC input: (N,H,W,Cin) -> (N,H,W,Cout)."""
    N, H, W, Cin = x_nhwc.shape
    cdt = x_nhwc.dtype
    w1 = params["w1"].astype(cdt)
    w2 = params["w2"].astype(cdt)
    Ch = w1.shape[1]
    Cout = w2.shape[1]
    assert w2.shape[0] == 4 * Ch, "w2 must have 4*hidden input channels"
    s1 = params["s1"].astype(jnp.float32).reshape(1, Ch)
    b1 = params["b1"].astype(jnp.float32).reshape(1, Ch)
    s2 = params["s2"].astype(jnp.float32).reshape(1, Cout)
    b2 = params["b2"].astype(jnp.float32).reshape(1, Cout)

    isz = x_nhwc.dtype.itemsize
    bytes_needed = (
        2 * H * W * (Cin + Cout) * isz                 # x / y double-buffers
        + 2 * (Cin * Ch + 4 * Ch * Cout) * isz         # weights (2-buffered)
        + 4 * (Ch + Cout) * 4                          # scale / bias vectors
        + (H + 4) * W * Ch * isz                       # row-pass scratch
        + (6 * H * W * Ch + 2 * H * W * Cout) * 4)     # live f32 temporaries

    kern = functools.partial(_spp_fused_kernel, H=H, W=W, Ch=Ch)
    # TODO(synk): for very large H*W*C (non-YOLOX use) tile over H row-strips
    # with a 6-row halo (manual DMA of the x strip + -inf masking of
    # out-of-image rows) so per-step VMEM stays bounded on v7x and its two
    # TensorCores get more than N grid steps to share.
    # TODO(synk): pad hidden/Cout to multiples of 128 (zero-padded w1 columns /
    # w2 rows) at production channel counts for lane-dense stores and a
    # full-depth MXU contraction.
    return pl.pallas_call(
        kern,
        out_shape=jax.ShapeDtypeStruct((N, H, W, Cout), cdt),
        grid=(N,),
        in_specs=[
            pl.BlockSpec((1, H, W, Cin), lambda n: (n, 0, 0, 0)),
            pl.BlockSpec((Cin, Ch), lambda n: (0, 0)),
            pl.BlockSpec((1, Ch), lambda n: (0, 0)),
            pl.BlockSpec((1, Ch), lambda n: (0, 0)),
            pl.BlockSpec((4 * Ch, Cout), lambda n: (0, 0)),
            pl.BlockSpec((1, Cout), lambda n: (0, 0)),
            pl.BlockSpec((1, Cout), lambda n: (0, 0)),
        ],
        out_specs=pl.BlockSpec((1, H, W, Cout), lambda n: (n, 0, 0, 0)),
        scratch_shapes=[pltpu.VMEM((H + 4, W, Ch), cdt)],
        compiler_params=pltpu.CompilerParams(
            dimension_semantics=("parallel",),
            vmem_limit_bytes=_vmem_limit(bytes_needed),
        ),
    )(x_nhwc, w1, s1, b1, w2, s2, b2)


# ----------------------------------------------------------------------------
# SPPBottleneck forward (PyTorch-style NCHW wrapper)
# ----------------------------------------------------------------------------
def spp_bottleneck(x_nchw, params, kernel_sizes=(5, 9, 13)):
    assert tuple(kernel_sizes) == (5, 9, 13), "SPPF cascade assumes (5, 9, 13)"
    # TODO(synk): fold the NCHW<->NHWC transposes into the kernel (in-VMEM tile
    # transpose at load/store) or keep the surrounding model NHWC; each edge
    # transpose is one extra HBM read+write pass over a full activation tensor.
    x = jnp.transpose(x_nchw, (0, 2, 3, 1))                      # NCHW -> NHWC
    y = spp_bottleneck_nhwc(x, params)
    return jnp.transpose(y, (0, 3, 1, 2))                        # NHWC -> NCHW


# ----------------------------------------------------------------------------
# Deterministic parameter setup (fold BatchNorm into scale/bias, inference)
# ----------------------------------------------------------------------------
def _fold_bn(gamma, beta, mean, var, eps=1e-5):
    scale = gamma / jnp.sqrt(var + eps)
    bias = beta - mean * scale
    return scale, bias


def make_params(in_channels, out_channels, kernel_sizes=(5, 9, 13), seed=0):
    hidden = in_channels // 2
    cat_ch = hidden * (len(kernel_sizes) + 1)
    keys = jax.random.split(jax.random.PRNGKey(seed), 10)
    # conv weights stored as (Cin, Cout): equivalent to torch weight[:, :, 0, 0].T
    w1 = 0.3 * jax.random.normal(keys[0], (in_channels, hidden), jnp.float32)
    w2 = 0.3 * jax.random.normal(keys[1], (cat_ch, out_channels), jnp.float32)
    g1 = 1.0 + 0.2 * jax.random.normal(keys[2], (hidden,), jnp.float32)
    b1 = 0.1 * jax.random.normal(keys[3], (hidden,), jnp.float32)
    m1 = 0.1 * jax.random.normal(keys[4], (hidden,), jnp.float32)
    v1 = 1.0 + 0.3 * jax.nn.sigmoid(jax.random.normal(keys[5], (hidden,), jnp.float32))
    g2 = 1.0 + 0.2 * jax.random.normal(keys[6], (out_channels,), jnp.float32)
    b2 = 0.1 * jax.random.normal(keys[7], (out_channels,), jnp.float32)
    m2 = 0.1 * jax.random.normal(keys[8], (out_channels,), jnp.float32)
    v2 = 1.0 + 0.3 * jax.nn.sigmoid(jax.random.normal(keys[9], (out_channels,), jnp.float32))
    s1, bb1 = _fold_bn(g1, b1, m1, v1)
    s2, bb2 = _fold_bn(g2, b2, m2, v2)
    return dict(w1=w1, s1=s1, b1=bb1, w2=w2, s2=s2, b2=bb2)


# ----------------------------------------------------------------------------
# Plain-JAX reference (direct 5/9/13 max pools, f32 end to end)
# ----------------------------------------------------------------------------
def reference(x_nchw, params, kernel_sizes=(5, 9, 13)):
    x = jnp.transpose(x_nchw, (0, 2, 3, 1))

    def cba(z, w, s, b):
        y = jnp.einsum("nhwc,cd->nhwd", z, w) * s + b
        return y * jax.nn.sigmoid(y)

    h = cba(x, params["w1"], params["s1"], params["b1"])
    pools = []
    for ks in kernel_sizes:
        p = ks // 2
        pools.append(lax.reduce_window(
            h, -jnp.inf, lax.max,
            (1, ks, ks, 1), (1, 1, 1, 1),
            ((0, 0), (p, p), (p, p), (0, 0))))
    cat = jnp.concatenate([h] + pools, axis=-1)
    y = cba(cat, params["w2"], params["s2"], params["b2"])
    return jnp.transpose(y, (0, 3, 1, 2))


if __name__ == "__main__":
    N, Cin, H, W = 2, 8, 16, 16
    Cout = 8
    params = make_params(Cin, Cout, seed=0)
    x = jax.random.normal(jax.random.PRNGKey(0), (N, Cin, H, W), jnp.float32)

    out = jax.block_until_ready(spp_bottleneck(x, params))
    ref = jax.block_until_ready(reference(x, params))
    assert out.shape == (N, Cout, H, W), out.shape
    max_err = float(jnp.max(jnp.abs(out - ref)))
    if max_err > 2e-2:
        raise AssertionError(f"mismatch vs reference, max abs err = {max_err}")
    print("KERNEL_OK")
</pallas_src>

<mosaic_0001>
module attributes {stable_mosaic.version = 11 : i64} {
  func.func @_spp_fused_kernel(%arg0: i32, %arg1: memref<1x16x16x8xf32, #tpu.memory_space<vmem>>, %arg2: memref<8x4xf32, #tpu.memory_space<vmem>>, %arg3: memref<1x4xf32, #tpu.memory_space<vmem>>, %arg4: memref<1x4xf32, #tpu.memory_space<vmem>>, %arg5: memref<16x8xf32, #tpu.memory_space<vmem>>, %arg6: memref<1x8xf32, #tpu.memory_space<vmem>>, %arg7: memref<1x8xf32, #tpu.memory_space<vmem>>, %arg8: memref<1x16x16x8xf32, #tpu.memory_space<vmem>>, %arg9: memref<20x16x4xf32, #tpu.memory_space<vmem>>) attributes {dimension_semantics = [#tpu.dimension_semantics<parallel>], iteration_bounds = array<i64: 2>, scalar_prefetch = 0 : i64, scratch_operands = 1 : i64, tpu.core_type = #tpu.core_type<tc>, window_params = [{transform_indices = @transform_0, window_bounds = array<i64: 1, 16, 16, 8>}, {pipeline_mode = #tpu.pipeline_mode<synchronous>, transform_indices = @transform_1, window_bounds = array<i64: 8, 4>}, {pipeline_mode = #tpu.pipeline_mode<synchronous>, transform_indices = @transform_2, window_bounds = array<i64: 1, 4>}, {pipeline_mode = #tpu.pipeline_mode<synchronous>, transform_indices = @transform_3, window_bounds = array<i64: 1, 4>}, {pipeline_mode = #tpu.pipeline_mode<synchronous>, transform_indices = @transform_4, window_bounds = array<i64: 16, 8>}, {pipeline_mode = #tpu.pipeline_mode<synchronous>, transform_indices = @transform_5, window_bounds = array<i64: 1, 8>}, {pipeline_mode = #tpu.pipeline_mode<synchronous>, transform_indices = @transform_6, window_bounds = array<i64: 1, 8>}, {transform_indices = @transform_7, window_bounds = array<i64: 1, 16, 16, 8>}]} {
    %c0 = arith.constant 0 : index
    %c0_0 = arith.constant 0 : index
    %c0_1 = arith.constant 0 : index
    %c0_2 = arith.constant 0 : index
    %0 = vector.load %arg1[%c0, %c0_0, %c0_1, %c0_2] : memref<1x16x16x8xf32, #tpu.memory_space<vmem>>, vector<1x16x16x8xf32>
    %1 = vector.shape_cast %0 : vector<1x16x16x8xf32> to vector<16x16x8xf32>
    %2 = vector.shape_cast %1 : vector<16x16x8xf32> to vector<256x8xf32>
    %c0_3 = arith.constant 0 : index
    %c0_4 = arith.constant 0 : index
    %3 = vector.load %arg2[%c0_3, %c0_4] : memref<8x4xf32, #tpu.memory_space<vmem>>, vector<8x4xf32>
    %cst = arith.constant dense<0.000000e+00> : vector<256x4xf32>
    %4 = tpu.matmul %2, %3, %cst {dimension_numbers = #tpu.dot_dimension_numbers<[1], [0], [0], [1], [0, 0, 1, 1], [], []>} : vector<256x8xf32>, vector<8x4xf32>, vector<256x4xf32> -> vector<256x4xf32>
    %c0_5 = arith.constant 0 : index
    %c0_6 = arith.constant 0 : index
    %5 = vector.load %arg3[%c0_5, %c0_6] : memref<1x4xf32, #tpu.memory_space<vmem>>, vector<1x4xf32>
    %6 = vector.broadcast %5 : vector<1x4xf32> to vector<256x4xf32>
    %7 = arith.mulf %4, %6 : vector<256x4xf32>
    %c0_7 = arith.constant 0 : index
    %c0_8 = arith.constant 0 : index
    %8 = vector.load %arg4[%c0_7, %c0_8] : memref<1x4xf32, #tpu.memory_space<vmem>>, vector<1x4xf32>
    %9 = vector.broadcast %8 : vector<1x4xf32> to vector<256x4xf32>
    %10 = arith.addf %7, %9 : vector<256x4xf32>
    %11 = arith.negf %10 : vector<256x4xf32>
    %12 = math.exp %11 : vector<256x4xf32>
    %cst_9 = arith.constant 1.000000e+00 : f32
    %13 = vector.broadcast %cst_9 : f32 to vector<256x4xf32>
    %14 = arith.addf %13, %12 : vector<256x4xf32>
    %15 = arith.divf %13, %14 : vector<256x4xf32>
    %16 = arith.mulf %10, %15 : vector<256x4xf32>
    %c0_10 = arith.constant 0 : index
    %c0_11 = arith.constant 0 : index
    %17 = vector.load %arg5[%c0_10, %c0_11] : memref<16x8xf32, #tpu.memory_space<vmem>>, vector<4x8xf32>
    %cst_12 = arith.constant dense<0.000000e+00> : vector<256x8xf32>
    %18 = tpu.matmul %16, %17, %cst_12 {dimension_numbers = #tpu.dot_dimension_numbers<[1], [0], [0], [1], [0, 0, 1, 1], [], []>} : vector<256x4xf32>, vector<4x8xf32>, vector<256x8xf32> -> vector<256x8xf32>
    %cst_13 = arith.constant 0xFF800000 : f32
    %19 = vector.broadcast %cst_13 : f32 to vector<2x16x4xf32>
    %c0_14 = arith.constant 0 : index
    %c0_15 = arith.constant 0 : index
    %c0_16 = arith.constant 0 : index
    %20 = vector.load %arg9[%c0_14, %c0_15, %c0_16] : memref<20x16x4xf32, #tpu.memory_space<vmem>>, vector<2x16x4xf32>
    tpu.vector_store %arg9[%c0_14, %c0_15, %c0_16], %19 {strides = array<i32>} : memref<20x16x4xf32, #tpu.memory_space<vmem>>, vector<2x16x4xf32>,
    %cst_17 = arith.constant 0xFF800000 : f32
    %21 = vector.broadcast %cst_17 : f32 to vector<2x16x4xf32>
    %c18 = arith.constant 18 : index
    %c0_18 = arith.constant 0 : index
    %c0_19 = arith.constant 0 : index
    %22 = vector.load %arg9[%c18, %c0_18, %c0_19] : memref<20x16x4xf32, #tpu.memory_space<vmem>>, vector<2x16x4xf32>
    tpu.vector_store %arg9[%c18, %c0_18, %c0_19], %21 {strides = array<i32>} : memref<20x16x4xf32, #tpu.memory_space<vmem>>, vector<2x16x4xf32>,
    %23 = tpu.iota {dimensions = array<i32: 1>} : vector<1x16x1xi32>
    %c-2_i32 = arith.constant -2 : i32
    %24 = vector.broadcast %c-2_i32 : i32 to vector<1x16x1xi32>
    %25 = arith.addi %23, %24 : vector<1x16x1xi32>
    %c0_i32 = arith.constant 0 : i32
    %26 = vector.broadcast %c0_i32 : i32 to vector<1x16x1xi32>
    %27 = arith.cmpi sge, %25, %26 : vector<1x16x1xi32>
    %c-2_i32_20 = arith.constant -2 : i32
    %28 = vector.broadcast %c-2_i32_20 : i32 to vector<1x16x1xi32>
    %29 = arith.addi %23, %28 : vector<1x16x1xi32>
    %c16_i32 = arith.constant 16 : i32
    %30 = vector.broadcast %c16_i32 : i32 to vector<1x16x1xi32>
    %31 = arith.cmpi slt, %29, %30 : vector<1x16x1xi32>
    %32 = arith.andi %27, %31 : vector<1x16x1xi1>
    %c-1_i32 = arith.constant -1 : i32
    %33 = vector.broadcast %c-1_i32 : i32 to vector<1x16x1xi32>
    %34 = arith.addi %23, %33 : vector<1x16x1xi32>
    %c0_i32_21 = arith.constant 0 : i32
    %35 = vector.broadcast %c0_i32_21 : i32 to vector<1x16x1xi32>
    %36 = arith.cmpi sge, %34, %35 : vector<1x16x1xi32>
    %c-1_i32_22 = arith.constant -1 : i32
    %37 = vector.broadcast %c-1_i32_22 : i32 to vector<1x16x1xi32>
    %38 = arith.addi %23, %37 : vector<1x16x1xi32>
    %c16_i32_23 = arith.constant 16 : i32
    %39 = vector.broadcast %c16_i32_23 : i32 to vector<1x16x1xi32>
    %40 = arith.cmpi slt, %38, %39 : vector<1x16x1xi32>
    %41 = arith.andi %36, %40 : vector<1x16x1xi1>
    %c1_i32 = arith.constant 1 : i32
    %42 = vector.broadcast %c1_i32 : i32 to vector<1x16x1xi32>
    %43 = arith.addi %23, %42 : vector<1x16x1xi32>
    %c0_i32_24 = arith.constant 0 : i32
    %44 = vector.broadcast %c0_i32_24 : i32 to vector<1x16x1xi32>
    %45 = arith.cmpi sge, %43, %44 : vector<1x16x1xi32>
    %c1_i32_25 = arith.constant 1 : i32
    %46 = vector.broadcast %c1_i32_25 : i32 to vector<1x16x1xi32>
    %47 = arith.addi %23, %46 : vector<1x16x1xi32>
    %c16_i32_26 = arith.constant 16 : i32
    %48 = vector.broadcast %c16_i32_26 : i32 to vector<1x16x1xi32>
    %49 = arith.cmpi slt, %47, %48 : vector<1x16x1xi32>
    %50 = arith.andi %45, %49 : vector<1x16x1xi1>
    %c2_i32 = arith.constant 2 : i32
    %51 = vector.broadcast %c2_i32 : i32 to vector<1x16x1xi32>
    %52 = arith.addi %23, %51 : vector<1x16x1xi32>
    %c0_i32_27 = arith.constant 0 : i32
    %53 = vector.broadcast %c0_i32_27 : i32 to vector<1x16x1xi32>
    %54 = arith.cmpi sge, %52, %53 : vector<1x16x1xi32>
    %c2_i32_28 = arith.constant 2 : i32
    %55 = vector.broadcast %c2_i32_28 : i32 to vector<1x16x1xi32>
    %56 = arith.addi %23, %55 : vector<1x16x1xi32>
    %c16_i32_29 = arith.constant 16 : i32
    %57 = vector.broadcast %c16_i32_29 : i32 to vector<1x16x1xi32>
    %58 = arith.cmpi slt, %56, %57 : vector<1x16x1xi32>
    %59 = arith.andi %54, %58 : vector<1x16x1xi1>
    %60 = vector.shape_cast %16 : vector<256x4xf32> to vector<16x16x4xf32>
    %c2 = arith.constant 2 : index
    %c0_30 = arith.constant 0 : index
    %c0_31 = arith.constant 0 : index
    %61 = vector.load %arg9[%c2, %c0_30, %c0_31] : memref<20x16x4xf32, #tpu.memory_space<vmem>>, vector<16x16x4xf32>
    tpu.vector_store %arg9[%c2, %c0_30, %c0_31], %60 {strides = array<i32>} : memref<20x16x4xf32, #tpu.memory_space<vmem>>, vector<16x16x4xf32>,
    %c0_32 = arith.constant 0 : index
    %c0_33 = arith.constant 0 : index
    %c0_34 = arith.constant 0 : index
    %62 = vector.load %arg9[%c0_32, %c0_33, %c0_34] : memref<20x16x4xf32, #tpu.memory_space<vmem>>, vector<16x16x4xf32>
    %c1 = arith.constant 1 : index
    %c0_35 = arith.constant 0 : index
    %c0_36 = arith.constant 0 : index
    %63 = vector.load %arg9[%c1, %c0_35, %c0_36] : memref<20x16x4xf32, #tpu.memory_space<vmem>>, vector<16x16x4xf32>
    %64 = arith.maximumf %62, %63 : vector<16x16x4xf32>
    %c2_37 = arith.constant 2 : index
    %c0_38 = arith.constant 0 : index
    %c0_39 = arith.constant 0 : index
    %65 = vector.load %arg9[%c2_37, %c0_38, %c0_39] : memref<20x16x4xf32, #tpu.memory_space<vmem>>, vector<16x16x4xf32>
    %66 = arith.maximumf %64, %65 : vector<16x16x4xf32>
    %c3 = arith.constant 3 : index
    %c0_40 = arith.constant 0 : index
    %c0_41 = arith.constant 0 : index
    %67 = vector.load %arg9[%c3, %c0_40, %c0_41] : memref<20x16x4xf32, #tpu.memory_space<vmem>>, vector<16x16x4xf32>
    %68 = arith.maximumf %66, %67 : vector<16x16x4xf32>
    %c4 = arith.constant 4 : index
    %c0_42 = arith.constant 0 : index
    %c0_43 = arith.constant 0 : index
    %69 = vector.load %arg9[%c4, %c0_42, %c0_43] : memref<20x16x4xf32, #tpu.memory_space<vmem>>, vector<16x16x4xf32>
    %70 = arith.maximumf %68, %69 : vector<16x16x4xf32>
    %c2_i32_44 = arith.constant 2 : i32
    %71 = tpu.dynamic_rotate %70 by %c2_i32_44 dim 1 : vector<16x16x4xf32>, i32 -> vector<16x16x4xf32>
    %cst_45 = arith.constant 0xFF800000 : f32
    %72 = vector.shape_cast %32 : vector<1x16x1xi1> to vector<1x16x1xi1>
    %73 = vector.broadcast %72 : vector<1x16x1xi1> to vector<16x16x4xi1>
    %74 = vector.broadcast %cst_45 : f32 to vector<16x16x4xf32>
    %75 = arith.select %73, %71, %74 : vector<16x16x4xi1>, vector<16x16x4xf32>
    %76 = arith.maximumf %70, %75 : vector<16x16x4xf32>
    %c1_i32_46 = arith.constant 1 : i32
    %77 = tpu.dynamic_rotate %70 by %c1_i32_46 dim 1 : vector<16x16x4xf32>, i32 -> vector<16x16x4xf32>
    %cst_47 = arith.constant 0xFF800000 : f32
    %78 = vector.shape_cast %41 : vector<1x16x1xi1> to vector<1x16x1xi1>
    %79 = vector.broadcast %78 : vector<1x16x1xi1> to vector<16x16x4xi1>
    %80 = vector.broadcast %cst_47 : f32 to vector<16x16x4xf32>
    %81 = arith.select %79, %77, %80 : vector<16x16x4xi1>, vector<16x16x4xf32>
    %82 = arith.maximumf %76, %81 : vector<16x16x4xf32>
    %c15_i32 = arith.constant 15 : i32
    %83 = tpu.dynamic_rotate %70 by %c15_i32 dim 1 : vector<16x16x4xf32>, i32 -> vector<16x16x4xf32>
    %cst_48 = arith.constant 0xFF800000 : f32
    %84 = vector.shape_cast %50 : vector<1x16x1xi1> to vector<1x16x1xi1>
    %85 = vector.broadcast %84 : vector<1x16x1xi1> to vector<16x16x4xi1>
    %86 = vector.broadcast %cst_48 : f32 to vector<16x16x4xf32>
    %87 = arith.select %85, %83, %86 : vector<16x16x4xi1>, vector<16x16x4xf32>
    %88 = arith.maximumf %82, %87 : vector<16x16x4xf32>
    %c14_i32 = arith.constant 14 : i32
    %89 = tpu.dynamic_rotate %70 by %c14_i32 dim 1 : vector<16x16x4xf32>, i32 -> vector<16x16x4xf32>
    %cst_49 = arith.constant 0xFF800000 : f32
    %90 = vector.shape_cast %59 : vector<1x16x1xi1> to vector<1x16x1xi1>
    %91 = vector.broadcast %90 : vector<1x16x1xi1> to vector<16x16x4xi1>
    %92 = vector.broadcast %cst_49 : f32 to vector<16x16x4xf32>
    %93 = arith.select %91, %89, %92 : vector<16x16x4xi1>, vector<16x16x4xf32>
    %94 = arith.maximumf %88, %93 : vector<16x16x4xf32>
    %95 = vector.shape_cast %94 : vector<16x16x4xf32> to vector<256x4xf32>
    %c4_50 = arith.constant 4 : index
    %c0_51 = arith.constant 0 : index
    %96 = vector.load %arg5[%c4_50, %c0_51] : memref<16x8xf32, #tpu.memory_space<vmem>>, vector<4x8xf32>
    %cst_52 = arith.constant dense<0.000000e+00> : vector<256x8xf32>
    %97 = tpu.matmul %95, %96, %cst_52 {dimension_numbers = #tpu.dot_dimension_numbers<[1], [0], [0], [1], [0, 0, 1, 1], [], []>} : vector<256x4xf32>, vector<4x8xf32>, vector<256x8xf32> -> vector<256x8xf32>
    %98 = arith.addf %18, %97 : vector<256x8xf32>
    %c2_53 = arith.constant 2 : index
    %c0_54 = arith.constant 0 : index
    %c0_55 = arith.constant 0 : index
    %99 = vector.load %arg9[%c2_53, %c0_54, %c0_55] : memref<20x16x4xf32, #tpu.memory_space<vmem>>, vector<16x16x4xf32>
    tpu.vector_store %arg9[%c2_53, %c0_54, %c0_55], %94 {strides = array<i32>} : memref<20x16x4xf32, #tpu.memory_space<vmem>>, vector<16x16x4xf32>,
    %c0_56 = arith.constant 0 : index
    %c0_57 = arith.constant 0 : index
    %c0_58 = arith.constant 0 : index
    %100 = vector.load %arg9[%c0_56, %c0_57, %c0_58] : memref<20x16x4xf32, #tpu.memory_space<vmem>>, vector<16x16x4xf32>
    %c1_59 = arith.constant 1 : index
    %c0_60 = arith.constant 0 : index
    %c0_61 = arith.constant 0 : index
    %101 = vector.load %arg9[%c1_59, %c0_60, %c0_61] : memref<20x16x4xf32, #tpu.memory_space<vmem>>, vector<16x16x4xf32>
    %102 = arith.maximumf %100, %101 : vector<16x16x4xf32>
    %c2_62 = arith.constant 2 : index
    %c0_63 = arith.constant 0 : index
    %c0_64 = arith.constant 0 : index
    %103 = vector.load %arg9[%c2_62, %c0_63, %c0_64] : memref<20x16x4xf32, #tpu.memory_space<vmem>>, vector<16x16x4xf32>
    %104 = arith.maximumf %102, %103 : vector<16x16x4xf32>
    %c3_65 = arith.constant 3 : index
    %c0_66 = arith.constant 0 : index
    %c0_67 = arith.constant 0 : index
    %105 = vector.load %arg9[%c3_65, %c0_66, %c0_67] : memref<20x16x4xf32, #tpu.memory_space<vmem>>, vector<16x16x4xf32>
    %106 = arith.maximumf %104, %105 : vector<16x16x4xf32>
    %c4_68 = arith.constant 4 : index
    %c0_69 = arith.constant 0 : index
    %c0_70 = arith.constant 0 : index
    %107 = vector.load %arg9[%c4_68, %c0_69, %c0_70] : memref<20x16x4xf32, #tpu.memory_space<vmem>>, vector<16x16x4xf32>
    %108 = arith.maximumf %106, %107 : vector<16x16x4xf32>
    %c2_i32_71 = arith.constant 2 : i32
    %109 = tpu.dynamic_rotate %108 by %c2_i32_71 dim 1 : vector<16x16x4xf32>, i32 -> vector<16x16x4xf32>
    %cst_72 = arith.constant 0xFF800000 : f32
    %110 = vector.shape_cast %32 : vector<1x16x1xi1> to vector<1x16x1xi1>
    %111 = vector.broadcast %110 : vector<1x16x1xi1> to vector<16x16x4xi1>
    %112 = vector.broadcast %cst_72 : f32 to vector<16x16x4xf32>
    %113 = arith.select %111, %109, %112 : vector<16x16x4xi1>, vector<16x16x4xf32>
    %114 = arith.maximumf %108, %113 : vector<16x16x4xf32>
    %c1_i32_73 = arith.constant 1 : i32
    %115 = tpu.dynamic_rotate %108 by %c1_i32_73 dim 1 : vector<16x16x4xf32>, i32 -> vector<16x16x4xf32>
    %cst_74 = arith.constant 0xFF800000 : f32
    %116 = vector.shape_cast %41 : vector<1x16x1xi1> to vector<1x16x1xi1>
    %117 = vector.broadcast %116 : vector<1x16x1xi1> to vector<16x16x4xi1>
    %118 = vector.broadcast %cst_74 : f32 to vector<16x16x4xf32>
    %119 = arith.select %117, %115, %118 : vector<16x16x4xi1>, vector<16x16x4xf32>
    %120 = arith.maximumf %114, %119 : vector<16x16x4xf32>
    %c15_i32_75 = arith.constant 15 : i32
    %121 = tpu.dynamic_rotate %108 by %c15_i32_75 dim 1 : vector<16x16x4xf32>, i32 -> vector<16x16x4xf32>
    %cst_76 = arith.constant 0xFF800000 : f32
    %122 = vector.shape_cast %50 : vector<1x16x1xi1> to vector<1x16x1xi1>
    %123 = vector.broadcast %122 : vector<1x16x1xi1> to vector<16x16x4xi1>
    %124 = vector.broadcast %cst_76 : f32 to vector<16x16x4xf32>
    %125 = arith.select %123, %121, %124 : vector<16x16x4xi1>, vector<16x16x4xf32>
    %126 = arith.maximumf %120, %125 : vector<16x16x4xf32>
    %c14_i32_77 = arith.constant 14 : i32
    %127 = tpu.dynamic_rotate %108 by %c14_i32_77 dim 1 : vector<16x16x4xf32>, i32 -> vector<16x16x4xf32>
    %cst_78 = arith.constant 0xFF800000 : f32
    %128 = vector.shape_cast %59 : vector<1x16x1xi1> to vector<1x16x1xi1>
    %129 = vector.broadcast %128 : vector<1x16x1xi1> to vector<16x16x4xi1>
    %130 = vector.broadcast %cst_78 : f32 to vector<16x16x4xf32>
    %131 = arith.select %129, %127, %130 : vector<16x16x4xi1>, vector<16x16x4xf32>
    %132 = arith.maximumf %126, %131 : vector<16x16x4xf32>
    %133 = vector.shape_cast %132 : vector<16x16x4xf32> to vector<256x4xf32>
    %c8 = arith.constant 8 : index
    %c0_79 = arith.constant 0 : index
    %134 = vector.load %arg5[%c8, %c0_79] : memref<16x8xf32, #tpu.memory_space<vmem>>, vector<4x8xf32>
    %cst_80 = arith.constant dense<0.000000e+00> : vector<256x8xf32>
    %135 = tpu.matmul %133, %134, %cst_80 {dimension_numbers = #tpu.dot_dimension_numbers<[1], [0], [0], [1], [0, 0, 1, 1], [], []>} : vector<256x4xf32>, vector<4x8xf32>, vector<256x8xf32> -> vector<256x8xf32>
    %136 = arith.addf %98, %135 : vector<256x8xf32>
    %c2_81 = arith.constant 2 : index
    %c0_82 = arith.constant 0 : index
    %c0_83 = arith.constant 0 : index
    %137 = vector.load %arg9[%c2_81, %c0_82, %c0_83] : memref<20x16x4xf32, #tpu.memory_space<vmem>>, vector<16x16x4xf32>
    tpu.vector_store %arg9[%c2_81, %c0_82, %c0_83], %132 {strides = array<i32>} : memref<20x16x4xf32, #tpu.memory_space<vmem>>, vector<16x16x4xf32>,
    %c0_84 = arith.constant 0 : index
    %c0_85 = arith.constant 0 : index
    %c0_86 = arith.constant 0 : index
    %138 = vector.load %arg9[%c0_84, %c0_85, %c0_86] : memref<20x16x4xf32, #tpu.memory_space<vmem>>, vector<16x16x4xf32>
    %c1_87 = arith.constant 1 : index
    %c0_88 = arith.constant 0 : index
    %c0_89 = arith.constant 0 : index
    %139 = vector.load %arg9[%c1_87, %c0_88, %c0_89] : memref<20x16x4xf32, #tpu.memory_space<vmem>>, vector<16x16x4xf32>
    %140 = arith.maximumf %138, %139 : vector<16x16x4xf32>
    %c2_90 = arith.constant 2 : index
    %c0_91 = arith.constant 0 : index
    %c0_92 = arith.constant 0 : index
    %141 = vector.load %arg9[%c2_90, %c0_91, %c0_92] : memref<20x16x4xf32, #tpu.memory_space<vmem>>, vector<16x16x4xf32>
    %142 = arith.maximumf %140, %141 : vector<16x16x4xf32>
    %c3_93 = arith.constant 3 : index
    %c0_94 = arith.constant 0 : index
    %c0_95 = arith.constant 0 : index
    %143 = vector.load %arg9[%c3_93, %c0_94, %c0_95] : memref<20x16x4xf32, #tpu.memory_space<vmem>>, vector<16x16x4xf32>
    %144 = arith.maximumf %142, %143 : vector<16x16x4xf32>
    %c4_96 = arith.constant 4 : index
    %c0_97 = arith.constant 0 : index
    %c0_98 = arith.constant 0 : index
    %145 = vector.load %arg9[%c4_96, %c0_97, %c0_98] : memref<20x16x4xf32, #tpu.memory_space<vmem>>, vector<16x16x4xf32>
    %146 = arith.maximumf %144, %145 : vector<16x16x4xf32>
    %c2_i32_99 = arith.constant 2 : i32
    %147 = tpu.dynamic_rotate %146 by %c2_i32_99 dim 1 : vector<16x16x4xf32>, i32 -> vector<16x16x4xf32>
    %cst_100 = arith.constant 0xFF800000 : f32
    %148 = vector.shape_cast %32 : vector<1x16x1xi1> to vector<1x16x1xi1>
    %149 = vector.broadcast %148 : vector<1x16x1xi1> to vector<16x16x4xi1>
    %150 = vector.broadcast %cst_100 : f32 to vector<16x16x4xf32>
    %151 = arith.select %149, %147, %150 : vector<16x16x4xi1>, vector<16x16x4xf32>
    %152 = arith.maximumf %146, %151 : vector<16x16x4xf32>
    %c1_i32_101 = arith.constant 1 : i32
    %153 = tpu.dynamic_rotate %146 by %c1_i32_101 dim 1 : vector<16x16x4xf32>, i32 -> vector<16x16x4xf32>
    %cst_102 = arith.constant 0xFF800000 : f32
    %154 = vector.shape_cast %41 : vector<1x16x1xi1> to vector<1x16x1xi1>
    %155 = vector.broadcast %154 : vector<1x16x1xi1> to vector<16x16x4xi1>
    %156 = vector.broadcast %cst_102 : f32 to vector<16x16x4xf32>
    %157 = arith.select %155, %153, %156 : vector<16x16x4xi1>, vector<16x16x4xf32>
    %158 = arith.maximumf %152, %157 : vector<16x16x4xf32>
    %c15_i32_103 = arith.constant 15 : i32
    %159 = tpu.dynamic_rotate %146 by %c15_i32_103 dim 1 : vector<16x16x4xf32>, i32 -> vector<16x16x4xf32>
    %cst_104 = arith.constant 0xFF800000 : f32
    %160 = vector.shape_cast %50 : vector<1x16x1xi1> to vector<1x16x1xi1>
    %161 = vector.broadcast %160 : vector<1x16x1xi1> to vector<16x16x4xi1>
    %162 = vector.broadcast %cst_104 : f32 to vector<16x16x4xf32>
    %163 = arith.select %161, %159, %162 : vector<16x16x4xi1>, vector<16x16x4xf32>
    %164 = arith.maximumf %158, %163 : vector<16x16x4xf32>
    %c14_i32_105 = arith.constant 14 : i32
    %165 = tpu.dynamic_rotate %146 by %c14_i32_105 dim 1 : vector<16x16x4xf32>, i32 -> vector<16x16x4xf32>
    %cst_106 = arith.constant 0xFF800000 : f32
    %166 = vector.shape_cast %59 : vector<1x16x1xi1> to vector<1x16x1xi1>
    %167 = vector.broadcast %166 : vector<1x16x1xi1> to vector<16x16x4xi1>
    %168 = vector.broadcast %cst_106 : f32 to vector<16x16x4xf32>
    %169 = arith.select %167, %165, %168 : vector<16x16x4xi1>, vector<16x16x4xf32>
    %170 = arith.maximumf %164, %169 : vector<16x16x4xf32>
    %171 = vector.shape_cast %170 : vector<16x16x4xf32> to vector<256x4xf32>
    %c12 = arith.constant 12 : index
    %c0_107 = arith.constant 0 : index
    %172 = vector.load %arg5[%c12, %c0_107] : memref<16x8xf32, #tpu.memory_space<vmem>>, vector<4x8xf32>
    %cst_108 = arith.constant dense<0.000000e+00> : vector<256x8xf32>
    %173 = tpu.matmul %171, %172, %cst_108 {dimension_numbers = #tpu.dot_dimension_numbers<[1], [0], [0], [1], [0, 0, 1, 1], [], []>} : vector<256x4xf32>, vector<4x8xf32>, vector<256x8xf32> -> vector<256x8xf32>
    %174 = arith.addf %136, %173 : vector<256x8xf32>
    %c0_109 = arith.constant 0 : index
    %c0_110 = arith.constant 0 : index
    %175 = vector.load %arg6[%c0_109, %c0_110] : memref<1x8xf32, #tpu.memory_space<vmem>>, vector<1x8xf32>
    %176 = vector.broadcast %175 : vector<1x8xf32> to vector<256x8xf32>
    %177 = arith.mulf %174, %176 : vector<256x8xf32>
    %c0_111 = arith.constant 0 : index
    %c0_112 = arith.constant 0 : index
    %178 = vector.load %arg7[%c0_111, %c0_112] : memref<1x8xf32, #tpu.memory_space<vmem>>, vector<1x8xf32>
    %179 = vector.broadcast %178 : vector<1x8xf32> to vector<256x8xf32>
    %180 = arith.addf %177, %179 : vector<256x8xf32>
    %181 = arith.negf %180 : vector<256x8xf32>
    %182 = math.exp %181 : vector<256x8xf32>
    %cst_113 = arith.constant 1.000000e+00 : f32
    %183 = vector.broadcast %cst_113 : f32 to vector<256x8xf32>
    %184 = arith.addf %183, %182 : vector<256x8xf32>
    %185 = arith.divf %183, %184 : vector<256x8xf32>
    %186 = arith.mulf %180, %185 : vector<256x8xf32>
    %187 = vector.shape_cast %186 : vector<256x8xf32> to vector<16x16x8xf32>
    %c0_114 = arith.constant 0 : index
    %c0_115 = arith.constant 0 : index
    %c0_116 = arith.constant 0 : index
    %c0_117 = arith.constant 0 : index
    %188 = vector.load %arg8[%c0_114, %c0_115, %c0_116, %c0_117] : memref<1x16x16x8xf32, #tpu.memory_space<vmem>>, vector<1x16x16x8xf32>
    %189 = vector.shape_cast %188 : vector<1x16x16x8xf32> to vector<16x16x8xf32>
    %190 = vector.shape_cast %187 : vector<16x16x8xf32> to vector<1x16x16x8xf32>
    tpu.vector_store %arg8[%c0_114, %c0_115, %c0_116, %c0_117], %190 {strides = array<i32>} : memref<1x16x16x8xf32, #tpu.memory_space<vmem>>, vector<1x16x16x8xf32>,
    return
  }
  func.func @transform_0(%arg0: i32) -> (i32, i32, i32, i32) {
    %c0_i32 = arith.constant 0 : i32
    %c0_i32_0 = arith.constant 0 : i32
    %c0_i32_1 = arith.constant 0 : i32
    %c0_i32_2 = arith.constant 0 : i32
    return %arg0, %c0_i32, %c0_i32_0, %c0_i32_1 : i32, i32, i32, i32
  }
  func.func @transform_1(%arg0: i32) -> (i32, i32) {
    %c0_i32 = arith.constant 0 : i32
    %c0_i32_0 = arith.constant 0 : i32
    %c0_i32_1 = arith.constant 0 : i32
    return %c0_i32, %c0_i32_0 : i32, i32
  }
  func.func @transform_2(%arg0: i32) -> (i32, i32) {
    %c0_i32 = arith.constant 0 : i32
    %c0_i32_0 = arith.constant 0 : i32
    %c0_i32_1 = arith.constant 0 : i32
    return %c0_i32, %c0_i32_0 : i32, i32
  }
  func.func @transform_3(%arg0: i32) -> (i32, i32) {
    %c0_i32 = arith.constant 0 : i32
    %c0_i32_0 = arith.constant 0 : i32
    %c0_i32_1 = arith.constant 0 : i32
    return %c0_i32, %c0_i32_0 : i32, i32
  }
  func.func @transform_4(%arg0: i32) -> (i32, i32) {
    %c0_i32 = arith.constant 0 : i32
    %c0_i32_0 = arith.constant 0 : i32
    %c0_i32_1 = arith.constant 0 : i32
    return %c0_i32, %c0_i32_0 : i32, i32
  }
  func.func @transform_5(%arg0: i32) -> (i32, i32) {
    %c0_i32 = arith.constant 0 : i32
    %c0_i32_0 = arith.constant 0 : i32
    %c0_i32_1 = arith.constant 0 : i32
    return %c0_i32, %c0_i32_0 : i32, i32
  }
  func.func @transform_6(%arg0: i32) -> (i32, i32) {
    %c0_i32 = arith.constant 0 : i32
    %c0_i32_0 = arith.constant 0 : i32
    %c0_i32_1 = arith.constant 0 : i32
    return %c0_i32, %c0_i32_0 : i32, i32
  }
  func.func @transform_7(%arg0: i32) -> (i32, i32, i32, i32) {
    %c0_i32 = arith.constant 0 : i32
    %c0_i32_0 = arith.constant 0 : i32
    %c0_i32_1 = arith.constant 0 : i32
    %c0_i32_2 = arith.constant 0 : i32
    return %arg0, %c0_i32, %c0_i32_0, %c0_i32_1 : i32, i32, i32, i32
  }
}

</mosaic_0001>

<bundles_post_ra>
// kernel: tpu_custom_call.1
= control target key start
LH: loop header
LB: loop body
LE: loop exit
PB: predicated region body
PF: predicated region fallthrough
CT: control target
= control target key end

     0   :  { %s6246_s24 = smov 0   ;;  %s9929_s0 = inlined_call_operand.vmem [shape: f32[2,16,16,8], index: 0, kind: input, shape index: {}]   ;;  %s9930_s1 = inlined_call_operand.vmem [shape: f32[8,4], index: 1, kind: input, shape index: {}]   ;;  %s9931_s2 = inlined_call_operand.vmem [shape: f32[1,4], index: 2, kind: input, shape index: {}]   ;;  %s9932_s3 = inlined_call_operand.vmem [shape: f32[1,4], index: 3, kind: input, shape index: {}]   ;;  %s9933_s4 = inlined_call_operand.vmem [shape: f32[16,8], index: 4, kind: input, shape index: {}]   ;;  %s9934_s5 = inlined_call_operand.vmem [shape: f32[1,8], index: 5, kind: input, shape index: {}]   ;;  %s9935_s6 = inlined_call_operand.vmem [shape: f32[1,8], index: 6, kind: input, shape index: {}]   ;;  %s9936_s7 = inlined_call_operand.vmem [shape: f32[2,16,16,8], index: 7, kind: output, shape index: {}]  }
   0x1 LB: > { %s5255_s25 = sadd.s32 4294967295, %s6203_s24   ;;  %p5259_p0 = scmp.ge.s32.totalorder %s6203_s24, 1  ;;  %s6203_s24 = sphi %s6246_s24, %s17_s24  }
   0x2   : > { %p237_p1 = scmp.lt.s32.totalorder %s6203_s24, 3 }
   0x4   : > { %p238_p2 = pnand %p5259_p0, %p237_p1 }
   0x6   : > { %241 = sbr.rel (%p238_p2) target bundleno = 973 (0x3cd), region = 48 }
   0xb   : > { %v311_v0 = vld [vmem:[%s9930_s1] sm:$0xff]  ;;  %p269_p3 = scmp.lt.s32.totalorder %s5255_s25, 1  ;;  %vm312_vm0 = vcmask 64512   ;;  %vm937_vm1 = vcmask 31744   ;;  %v6205_v33 = vmov -inf   ;;  %vm1935_vm2 = vcmask 1043456  }
   0xc   : > { %5665 = vmatprep.subr.mxu0 %v311_v0  ;;  %5915 = vmatprep.subr.mxu1 %v311_v0  ;;  %938 = vst.msk [vmem:[#allocation2] sm:$0xff] %vm937_vm1, %v6205_v33  ;;  %939 = vst.msk [vmem:[#allocation2 + $0x8] sm:$0xff] %vm937_vm1, %v6205_v33  ;;  %v936_v34 = vld [vmem:[%s9933_s4] sm:$0xf]  ;;  %v1838_v35 = vld [vmem:[%s9933_s4 + $0x4] sm:$0xf] }
   0xd   : > { %5666 = vmatpush3.msra.mxu0 %v311_v0  ;;  %5916 = vmatpush3.msra.mxu1 %v311_v0  ;;  %s10168_s25 = smov (!%p269_p3, %s5255_s25), 1  ;;  %940 = vst.msk [vmem:[#allocation2 + $0x10] sm:$0xff] %vm937_vm1, %v6205_v33  ;;  %941 = vst.msk [vmem:[#allocation2 + $0x18] sm:$0xff] %vm937_vm1, %v6205_v33  ;;  %v6352_v36 = vld [vmem:[%s9933_s4 + $0x8] sm:$0xf] }
   0xe   : > { %s5498_s28 = sshll.u32 %s10168_s25, 8  ;;  %943 = vst.msk [vmem:[#allocation2 + $0x120] sm:$0xff] %vm937_vm1, %v6205_v33  ;;  %944 = vst.msk [vmem:[#allocation2 + $0x128] sm:$0xff] %vm937_vm1, %v6205_v33  ;;  %5765 = vmatprep.subr.msk.mxu0 %vm1935_vm2, %v936_v34  ;;  %5715 = vmatprep.subr.msk.mxu1 %vm1935_vm2, %v1838_v35  ;;  %v6357_v37 = vld [vmem:[%s9933_s4 + $0xc] sm:$0xf] }
   0xf   : > { %s6265_s8 = scalar_lea.vmem %s9929_s0, %s5498_s28  ;;  %945 = vst.msk [vmem:[#allocation2 + $0x130] sm:$0xff] %vm937_vm1, %v6205_v33  ;;  %946 = vst.msk [vmem:[#allocation2 + $0x138] sm:$0xff] %vm937_vm1, %v6205_v33  ;;  %v6366_v38 = vld [vmem:[%s9931_s2] ss:$0 sm:$0xff]  ;;  %s9677_s30 = scalar_lea.vmem %s9936_s7, %s5498_s28 }
  0x10   : > { %v279_v1 = vld [vmem:[%s6265_s8] sm:$0xff]  ;;  %v280_v3 = vld [vmem:[%s6265_s8 + $0x8] sm:$0xff]  ;;  %v281_v5 = vld [vmem:[%s6265_s8 + $0x10] sm:$0xff] }
  0x11   : > { %v295_v2 = vld [vmem:[%s6265_s8 + $0x80] sm:$0xff]  ;;  %5667 = vmatprep.mubr.msk.f32.mxu0 %vm312_vm0, %v279_v1  ;;  %v296_v4 = vld [vmem:[%s6265_s8 + $0x88] sm:$0xff]  ;;  %v297_v6 = vld [vmem:[%s6265_s8 + $0x90] sm:$0xff] }
  0x12   : > { %5691 = vmatprep.mubr.msk.f32.mxu1 %vm312_vm0, %v295_v2  ;;  %5668 = vmatmul.mubr.msk.f32.vlgmr.msra.gmra.mxu0 %vm312_vm0, %v280_v3  ;;  %v282_v7 = vld [vmem:[%s6265_s8 + $0x18] sm:$0xff]  ;;  %v283_v9 = vld [vmem:[%s6265_s8 + $0x20] sm:$0xff]  ;;  %v284_v11 = vld [vmem:[%s6265_s8 + $0x28] sm:$0xff] }
  0x13   : > { %5692 = vmatmul.mubr.msk.f32.vlgmr.msra.gmra.mxu1 %vm312_vm0, %v296_v4  ;;  %5670 = vmatprep.mubr.msk.f32.mxu0 %vm312_vm0, %v281_v5  ;;  %v298_v8 = vld [vmem:[%s6265_s8 + $0x98] sm:$0xff]  ;;  %v299_v10 = vld [vmem:[%s6265_s8 + $0xa0] sm:$0xff]  ;;  %v300_v12 = vld [vmem:[%s6265_s8 + $0xa8] sm:$0xff] }
  0x14   : > { %5694 = vmatprep.mubr.msk.f32.mxu1 %vm312_vm0, %v297_v6  ;;  %v285_v13 = vld [vmem:[%s6265_s8 + $0x30] sm:$0xff]  ;;  %v286_v15 = vld [vmem:[%s6265_s8 + $0x38] sm:$0xff]  ;;  %v287_v17 = vld [vmem:[%s6265_s8 + $0x40] sm:$0xff]  ;;  %5766 = vmatpush3.msk.msra.mxu0 %vm1935_vm2, %v936_v34 }
  0x15   : > { %v301_v14 = vld [vmem:[%s6265_s8 + $0xb0] sm:$0xff]  ;;  %v302_v16 = vld [vmem:[%s6265_s8 + $0xb8] sm:$0xff]  ;;  %v303_v18 = vld [vmem:[%s6265_s8 + $0xc0] sm:$0xff]  ;;  %5716 = vmatpush3.msk.msra.mxu1 %vm1935_vm2, %v1838_v35  ;;  %5865 = vmatprep.subr.msk.mxu0 %vm1935_vm2, %v6357_v37 }
  0x16   : > { %5671 = vmatmul.mubr.msk.f32.gmra.mxu0 %vm312_vm0, %v282_v7  ;;  %v288_v19 = vld [vmem:[%s6265_s8 + $0x48] sm:$0xff]  ;;  %v289_v21 = vld [vmem:[%s6265_s8 + $0x50] sm:$0xff]  ;;  %v290_v23 = vld [vmem:[%s6265_s8 + $0x58] sm:$0xff]  ;;  %5815 = vmatprep.subr.msk.mxu1 %vm1935_vm2, %v6352_v36 }
  0x17   : > { %5695 = vmatmul.mubr.msk.f32.gmra.mxu1 %vm312_vm0, %v298_v8  ;;  %5673 = vmatprep.mubr.msk.f32.mxu0 %vm312_vm0, %v283_v9  ;;  %v304_v20 = vld [vmem:[%s6265_s8 + $0xc8] sm:$0xff]  ;;  %v305_v22 = vld [vmem:[%s6265_s8 + $0xd0] sm:$0xff]  ;;  %v306_v24 = vld [vmem:[%s6265_s8 + $0xd8] sm:$0xff] }
  0x18   : > { %5697 = vmatprep.mubr.msk.f32.mxu1 %vm312_vm0, %v299_v10  ;;  %v291_v25 = vld [vmem:[%s6265_s8 + $0x60] sm:$0xff]  ;;  %v292_v27 = vld [vmem:[%s6265_s8 + $0x68] sm:$0xff]  ;;  %v293_v29 = vld [vmem:[%s6265_s8 + $0x70] sm:$0xff] }
  0x19   : > { %v307_v26 = vld [vmem:[%s6265_s8 + $0xe0] sm:$0xff]  ;;  %v308_v28 = vld [vmem:[%s6265_s8 + $0xe8] sm:$0xff]  ;;  %v309_v30 = vld [vmem:[%s6265_s8 + $0xf0] sm:$0xff] }
  0x1a   : > { %5674 = vmatmul.mubr.msk.f32.gmra.mxu0 %vm312_vm0, %v284_v11  ;;  %v294_v31 = vld [vmem:[%s6265_s8 + $0x78] sm:$0xff]  ;;  %v6371_v40 = vld [vmem:[%s9932_s3] ss:$0 sm:$0xff] }
  0x1b   : > { %5698 = vmatmul.mubr.msk.f32.gmra.mxu1 %vm312_vm0, %v300_v12  ;;  %5676 = vmatprep.mubr.msk.f32.mxu0 %vm312_vm0, %v285_v13  ;;  %v310_v32 = vld [vmem:[%s6265_s8 + $0xf8] sm:$0xff] }
  0x1c   : > { %5700 = vmatprep.mubr.msk.f32.mxu1 %vm312_vm0, %v301_v14 }
  0x1e   : > { %5677 = vmatmul.mubr.msk.f32.gmra.mxu0 %vm312_vm0, %v286_v15 }
  0x1f   : > { %5701 = vmatmul.mubr.msk.f32.gmra.mxu1 %vm312_vm0, %v302_v16  ;;  %5679 = vmatprep.mubr.msk.f32.mxu0 %vm312_vm0, %v287_v17 }
  0x20   : > { %5703 = vmatprep.mubr.msk.f32.mxu1 %vm312_vm0, %v303_v18 }
  0x22   : > { %5680 = vmatmul.mubr.msk.f32.gmra.mxu0 %vm312_vm0, %v288_v19 }
  0x23   : > { %5704 = vmatmul.mubr.msk.f32.gmra.mxu1 %vm312_vm0, %v304_v20  ;;  %5682 = vmatprep.mubr.msk.f32.mxu0 %vm312_vm0, %v289_v21 }
  0x24   : > { %5706 = vmatprep.mubr.msk.f32.mxu1 %vm312_vm0, %v305_v22 }
  0x26   : > { %5683 = vmatmul.mubr.msk.f32.gmra.mxu0 %vm312_vm0, %v290_v23 }
  0x27   : > { %5707 = vmatmul.mubr.msk.f32.gmra.mxu1 %vm312_vm0, %v306_v24  ;;  %5685 = vmatprep.mubr.msk.f32.mxu0 %vm312_vm0, %v291_v25 }
  0x28   : > { %5709 = vmatprep.mubr.msk.f32.mxu1 %vm312_vm0, %v307_v26 }
  0x2a   : > { %5686 = vmatmul.mubr.msk.f32.gmra.mxu0 %vm312_vm0, %v292_v27 }
  0x2b   : > { %5710 = vmatmul.mubr.msk.f32.gmra.mxu1 %vm312_vm0, %v308_v28  ;;  %5688 = vmatprep.mubr.msk.f32.mxu0 %vm312_vm0, %v293_v29 }
  0x2c   : > { %5712 = vmatprep.mubr.msk.f32.mxu1 %vm312_vm0, %v309_v30 }
  0x2e   : > { %5689 = vmatmul.mubr.msk.f32.gmra.mxu0 %vm312_vm0, %v294_v31 }
  0x2f   : > { %5713 = vmatmul.mubr.msk.f32.gmra.mxu1 %vm312_vm0, %v310_v32 }
  0xd2   : > { %v5669_v39 = vpop.f32.mrf.mxu0 }
  0xd3   : > { %v5693_v41 = vpop.f32.mrf.mxu1  ;;  %v642_v42 = vmul.f32 %v5669_v39, %v6366_v38 }
  0xd4   : > { %v658_v43 = vmul.f32 %v5693_v41, %v6366_v38  ;;  %v475_v44 = vpop.f32.mrf.mxu0 }
  0xd5   : > { %v555_v45 = vpop.f32.mrf.mxu1  ;;  %v6376_v46 = vadd.f32 %v6371_v40, %v642_v42  ;;  %v641_v48 = vmul.f32 %v6366_v38, %v475_v44 }
  0xd6   : > { %v6379_v47 = vadd.f32 %v6371_v40, %v658_v43  ;;  %v657_v49 = vmul.f32 %v6366_v38, %v555_v45  ;;  %v5672_v50 = vpop.f32.mrf.mxu0  ;;  %v947_v45 = vlaneseq }
  0xd7   : > { %v5696_v51 = vpop.f32.mrf.mxu1  ;;  %v5299_v52 = vmul.f32 -1.442695, %v6376_v46  ;;  %v6386_v54 = vadd.f32 %v6371_v40, %v641_v48  ;;  %v644_v56 = vmul.f32 %v5672_v50, %v6366_v38 }
  0xd8   : > { %v5315_v53 = vmul.f32 -1.442695, %v6379_v47  ;;  %v6389_v55 = vadd.f32 %v6371_v40, %v657_v49  ;;  %v660_v57 = vmul.f32 %v5696_v51, %v6366_v38  ;;  %v485_v58 = vpop.f32.mrf.mxu0 }
  0xd9   : > { %v565_v59 = vpop.f32.mrf.mxu1  ;;  %5926 = vpow2.f32 %v5299_v52  ;;  %v5298_v60 = vmul.f32 -1.442695, %v6386_v54  ;;  %v643_v62 = vmul.f32 %v6366_v38, %v485_v58  ;;  %v6397_v63 = vadd.f32 %v6371_v40, %v644_v56 }
  0xda   : > { %v5314_v61 = vmul.f32 -1.442695, %v6389_v55  ;;  %5928 = vpow2.f32 %v5315_v53  ;;  %v6400_v0 = vadd.f32 %v6371_v40, %v660_v57  ;;  %v659_v1 = vmul.f32 %v6366_v38, %v565_v59  ;;  %v5675_v2 = vpop.f32.mrf.mxu0  ;;  %v1016_v57 = vld [vmem:[#allocation2 + $0x8] sm:$0xff] }
  0xdb   : > { %v5699_v3 = vpop.f32.mrf.mxu1  ;;  %5930 = vpow2.f32 %v5298_v60  ;;  %v6404_v4 = vadd.f32 %v6371_v40, %v643_v62  ;;  %v646_v5 = vmul.f32 %v5675_v2, %v6366_v38  ;;  %v5301_v7 = vmul.f32 -1.442695, %v6397_v63  ;;  %v6454_v62 = vld [vmem:[#allocation2 + $0x10] sm:$0xff] }
  0xdc   : > { %v662_v6 = vmul.f32 %v5699_v3, %v6366_v38  ;;  %5932 = vpow2.f32 %v5314_v61  ;;  %v5317_v8 = vmul.f32 -1.442695, %v6400_v0  ;;  %v6411_v9 = vadd.f32 %v6371_v40, %v659_v1  ;;  %v495_v10 = vpop.f32.mrf.mxu0  ;;  %v1015_v61 = vld [vmem:[#allocation2] sm:$0xff]  ;;  %v6456_v1 = vld [vmem:[#allocation2 + $0x18] sm:$0xff] }
  0xdd   : > { %v575_v11 = vpop.f32.mrf.mxu1  ;;  %v5300_v12 = vmul.f32 -1.442695, %v6404_v4  ;;  %v6415_v13 = vadd.f32 %v6371_v40, %v646_v5  ;;  %v645_v15 = vmul.f32 %v6366_v38, %v495_v10  ;;  %5934 = vpow2.f32 %v5301_v7 }
  0xde   : > { %v6418_v14 = vadd.f32 %v6371_v40, %v662_v6  ;;  %v5316_v16 = vmul.f32 -1.442695, %v6411_v9  ;;  %v661_v17 = vmul.f32 %v6366_v38, %v575_v11  ;;  %v5678_v18 = vpop.f32.mrf.mxu0  ;;  %5936 = vpow2.f32 %v5317_v8 }
  0xdf   : > { %v5702_v19 = vpop.f32.mrf.mxu1  ;;  %v5303_v20 = vmul.f32 -1.442695, %v6415_v13  ;;  %v6426_v22 = vadd.f32 %v6371_v40, %v645_v15  ;;  %5938 = vpow2.f32 %v5300_v12  ;;  %v648_v24 = vmul.f32 %v5678_v18, %v6366_v38 }
  0xe0   : > { %v5319_v21 = vmul.f32 -1.442695, %v6418_v14  ;;  %v6429_v23 = vadd.f32 %v6371_v40, %v661_v17  ;;  %v664_v25 = vmul.f32 %v5702_v19, %v6366_v38  ;;  %v505_v26 = vpop.f32.mrf.mxu0  ;;  %5940 = vpow2.f32 %v5316_v16 }
  0xe1   : > { %v585_v27 = vpop.f32.mrf.mxu1  ;;  %v5302_v28 = vmul.f32 -1.442695, %v6426_v22  ;;  %v647_v29 = vmul.f32 %v6366_v38, %v505_v26  ;;  %5942 = vpow2.f32 %v5303_v20  ;;  %v6438_v32 = vadd.f32 %v6371_v40, %v648_v24 }
  0xe2   : > { %v663_v30 = vmul.f32 %v6366_v38, %v585_v27  ;;  %v5318_v31 = vmul.f32 -1.442695, %v6429_v23  ;;  %v6441_v33 = vadd.f32 %v6371_v40, %v664_v25  ;;  %v5681_v34 = vpop.f32.mrf.mxu0  ;;  %5944 = vpow2.f32 %v5319_v21 }
  0xe3   : > { %v5705_v35 = vpop.f32.mrf.mxu1  ;;  %v6444_v39 = vadd.f32 %v6371_v40, %v647_v29  ;;  %5946 = vpow2.f32 %v5302_v28  ;;  %v5305_v41 = vmul.f32 -1.442695, %v6438_v32  ;;  %v6452_v60 = vshrl.u32 %v947_v45, 7 }
  0xe4   : > { %v5321_v42 = vmul.f32 -1.442695, %v6441_v33  ;;  %v515_v43 = vpop.f32.mrf.mxu0  ;;  %5948 = vpow2.f32 %v5318_v31  ;;  %v6450_v49 = vadd.f32 %v6371_v40, %v663_v30  ;;  %v650_v6 = vmul.f32 %v5681_v34, %v6366_v38 }
  0xe5   : > { %v595_v44 = vpop.f32.mrf.mxu1  ;;  %v5304_v48 = vmul.f32 -1.442695, %v6444_v39  ;;  %5950 = vpow2.f32 %v5305_v41  ;;  %v666_v12 = vmul.f32 %v5705_v35, %v6366_v38  ;;  %v6462_v15 = vmax.f32 %v1015_v61, %v6454_v62 }
  0xe6   : > { %v5927_v50 = vpop.eup %5926  ;;  %v5684_v51 = vpop.f32.mrf.mxu0  ;;  %5952 = vpow2.f32 %v5321_v42  ;;  %v5320_v5 = vmul.f32 -1.442695, %v6450_v49  ;;  %v6465_v16 = vmax.f32 %v1016_v57, %v6456_v1  ;;  %v649_v19 = vmul.f32 %v6366_v38, %v515_v43 }
  0xe7   : > { %v5708_v52 = vpop.f32.mrf.mxu1  ;;  %v5929_v53 = vpop.eup %5928  ;;  %v809_v56 = vadd.f32 1.0, %v5927_v50  ;;  %5954 = vpow2.f32 %v5304_v48  ;;  %v6469_v20 = vadd.s32 8, %v6452_v60  ;;  %v6472_v25 = vadd.f32 %v6371_v40, %v650_v6 }
  0xe8   : > { %v5931_v58 = vpop.eup %5930  ;;  %v825_v59 = vadd.f32 1.0, %v5929_v53  ;;  %v525_v7 = vpop.f32.mrf.mxu0  ;;  %v665_v26 = vmul.f32 %v6366_v38, %v595_v44  ;;  %v652_v30 = vmul.f32 %v5684_v51, %v6366_v38  ;;  %v6477_v34 = vadd.s32 4294967294, %v6452_v60 }
  0xe9   : > { %v5933_v2 = vpop.eup %5932  ;;  %5956 = vrcp.f32 %v809_v56  ;;  %v808_v3 = vadd.f32 1.0, %v5931_v58  ;;  %v605_v10 = vpop.f32.mrf.mxu1  ;;  %v6480_v42 = vadd.f32 %v6371_v40, %v666_v12  ;;  %v668_v43 = vmul.f32 %v5708_v52, %v6366_v38 }
  0xea   : > { %5958 = vrcp.f32 %v825_v59  ;;  %v824_v8 = vadd.f32 1.0, %v5933_v2  ;;  %v5935_v11 = vpop.eup %5934  ;;  %v5687_v27 = vpop.f32.mrf.mxu0  ;;  %v6484_v48 = vadd.f32 %v6371_v40, %v649_v19  ;;  %v651_v50 = vmul.f32 %v6366_v38, %v525_v7 }
  0xeb   : > { %5960 = vrcp.f32 %v808_v3  ;;  %v5937_v17 = vpop.eup %5936  ;;  %v811_v18 = vadd.f32 1.0, %v5935_v11  ;;  %v5711_v31 = vpop.f32.mrf.mxu1  ;;  %v5307_v56 = vmul.f32 -1.442695, %v6472_v25  ;;  %v6489_v57 = vadd.f32 %v6371_v40, %v665_v26 }
  0xec   : > { %5962 = vrcp.f32 %v824_v8  ;;  %v5939_v21 = vpop.eup %5938  ;;  %v827_v24 = vadd.f32 1.0, %v5937_v17  ;;  %v535_v58 = vpop.f32.mrf.mxu0  ;;  %v6492_v61 = vadd.f32 %v6371_v40, %v652_v30  ;;  %v667_v2 = vmul.f32 %v6366_v38, %v605_v10 }
  0xed   : > { %5964 = vpow2.f32 %v5320_v5  ;;  %v5941_v28 = vpop.eup %5940  ;;  %v810_v29 = vadd.f32 1.0, %v5939_v21  ;;  %v615_v3 = vpop.f32.mrf.mxu1  ;;  %v5323_v7 = vmul.f32 -1.442695, %v6480_v42  ;;  %v6497_v8 = vadd.f32 %v6371_v40, %v668_v43 }
  0xee   : > { %5966 = vrcp.f32 %v811_v18  ;;  %v5943_v35 = vpop.eup %5942  ;;  %v826_v41 = vadd.f32 1.0, %v5941_v28  ;;  %v5306_v17 = vmul.f32 -1.442695, %v6484_v48  ;;  %v6501_v18 = vadd.f32 %v6371_v40, %v651_v50  ;;  %v5690_v26 = vpop.f32.mrf.mxu0 }
  0xef   : > { %5968 = vrcp.f32 %v827_v24  ;;  %v5945_v45 = vpop.eup %5944  ;;  %v813_v44 = vadd.f32 1.0, %v5943_v35  ;;  %v5322_v21 = vmul.f32 -1.442695, %v6489_v57  ;;  %v654_v24 = vmul.f32 %v5687_v27, %v6366_v38 }
  0xf0   : > { %5970 = vrcp.f32 %v810_v29  ;;  %v5947_v51 = vpop.eup %5946  ;;  %v829_v53 = vadd.f32 1.0, %v5945_v45  ;;  %v5309_v30 = vmul.f32 -1.442695, %v6492_v61  ;;  %v6507_v35 = vadd.f32 %v6371_v40, %v667_v2 }
  0xf1   : > { %5972 = vrcp.f32 %v826_v41  ;;  %v5949_v59 = vpop.eup %5948  ;;  %v812_v52 = vadd.f32 1.0, %v5947_v51  ;;  %v5714_v41 = vpop.f32.mrf.mxu1  ;;  %v670_v50 = vmul.f32 %v5711_v31, %v6366_v38  ;;  %v669_v31 = vmul.f32 %v6366_v38, %v615_v3 }
  0xf2   : > { %5974 = vrcp.f32 %v813_v44  ;;  %v5951_v5 = vpop.eup %5950  ;;  %v828_v6 = vadd.f32 1.0, %v5949_v59  ;;  %v5325_v44 = vmul.f32 -1.442695, %v6497_v8  ;;  %v653_v59 = vmul.f32 %v6366_v38, %v535_v58 }
  0xf3   : > { %5976 = vrcp.f32 %v829_v53  ;;  %v5953_v11 = vpop.eup %5952  ;;  %v815_v12 = vadd.f32 1.0, %v5951_v5  ;;  %v5308_v53 = vmul.f32 -1.442695, %v6501_v18  ;;  %v545_v5 = vpop.f32.mrf.mxu0  ;;  %v5324_v58 = vmul.f32 -1.442695, %v6507_v35 }
  0xf4   : > { %5978 = vrcp.f32 %v812_v52  ;;  %v5955_v19 = vpop.eup %5954  ;;  %v831_v10 = vadd.f32 1.0, %v5953_v11  ;;  %v656_v11 = vmul.f32 %v5690_v26, %v6366_v38  ;;  %v6532_v3 = vadd.f32 %v6371_v40, %v670_v50 }
  0xf5   : > { %5980 = vrcp.f32 %v828_v6  ;;  %v814_v29 = vadd.f32 1.0, %v5955_v19  ;;  %v672_v19 = vmul.f32 %v5714_v41, %v6366_v38  ;;  %vm1338_vm3 = vcmp.lt.s32.totalorder %v6452_v60, 2 }
  0xf6   : > { %v5957_v28 = vpop.eup %5956  ;;  %5982 = vrcp.f32 %v815_v12  ;;  %vm1471_vm4 = vcmp.lt.s32.totalorder %v6452_v60, 1  ;;  %vm952_vm5 = vcmp.ge.s32.totalorder %v6477_v34, 0  ;;  %vm1604_vm7 = vcmp.lt.s32.totalorder %v6452_v60, 7 }
  0xf7   : > { %v5959_v43 = vpop.eup %5958  ;;  %v905_v45 = vmul.f32 %v5957_v28, %v6376_v46  ;;  %5984 = vrcp.f32 %v831_v10  ;;  %v6520_v46 = vadd.f32 %v6371_v40, %v654_v24  ;;  %v6540_v10 = vadd.f32 %v6371_v40, %v653_v59 }
  0xf8   : > { %v5961_v51 = vpop.eup %5960  ;;  %v6513_v27 = vmul.f32 %v5959_v43, %v6379_v47  ;;  %5986 = vrcp.f32 %v814_v29  ;;  %v655_v24 = vmul.f32 %v6366_v38, %v545_v5  ;;  %v6548_v28 = vadd.f32 %v6371_v40, %v669_v31 }
  0xf9   : > { %v5963_v52 = vpop.eup %5962  ;;  %984 = vst.msk [vmem:[#allocation2 + $0x28] sm:$0xff] %vm937_vm1, %v905_v45  ;;  %v904_v2 = vmul.f32 %v5961_v51, %v6386_v54  ;;  %5988 = vpow2.f32 %v5307_v56  ;;  %v625_v54 = vpop.f32.mrf.mxu1  ;;  %v5311_v41 = vmul.f32 -1.442695, %v6520_v46  ;;  %v5310_v50 = vmul.f32 -1.442695, %v6540_v10 }
  0xfa   : > { %v5965_v6 = vpop.eup %5964  ;;  %1000 = vst.msk [vmem:[#allocation2 + $0xa8] sm:$0xff] %vm937_vm1, %v6513_v27  ;;  %v6526_v47 = vmul.f32 %v5963_v52, %v6389_v55  ;;  %5990 = vpow2.f32 %v5323_v7  ;;  %v671_v29 = vmul.f32 %v6366_v38, %v625_v54  ;;  %v6572_v51 = vadd.f32 %v6371_v40, %v655_v24 }
  0xfb   : > { %v5967_v56 = vpop.eup %5966  ;;  %983 = vst.msk [vmem:[#allocation2 + $0x20] sm:$0xff] %vm937_vm1, %v904_v2  ;;  %v830_v12 = vadd.f32 1.0, %v5965_v6  ;;  %5992 = vpow2.f32 %v5306_v17  ;;  %5767 = vmatprep.mubr.msk.f32.mxu0 %vm937_vm1, %v904_v2  ;;  %v5326_v59 = vmul.f32 -1.442695, %v6548_v28  ;;  %v6589_v31 = vadd.s32 4294967295, %v6452_v60 }
  0xfc   : > { %v5969_v55 = vpop.eup %5968  ;;  %999 = vst.msk [vmem:[#allocation2 + $0xa0] sm:$0xff] %vm937_vm1, %v6526_v47  ;;  %v907_v7 = vmul.f32 %v5967_v56, %v6397_v63  ;;  %5994 = vpow2.f32 %v5322_v21  ;;  %5768 = vmatmul.mubr.msk.f32.vlgmr.msra.gmra.mxu0 %vm937_vm1, %v905_v45  ;;  %v6566_v45 = vadd.f32 %v6371_v40, %v672_v19  ;;  %v5312_v54 = vmul.f32 -1.442695, %v6572_v51 }
  0xfd   : > { %v5971_v17 = vpop.eup %5970  ;;  %v6545_v26 = vmul.f32 %v5969_v55, %v6400_v0  ;;  %5996 = vrcp.f32 %v830_v12  ;;  %5866 = vmatpush3.msk.msra.mxu0 %vm1935_vm2, %v6357_v37  ;;  %v6557_v0 = vadd.f32 %v6371_v40, %v656_v11  ;;  %v5327_v37 = vmul.f32 -1.442695, %v6532_v3 }
  0xfe   : > { %v5973_v63 = vpop.eup %5972  ;;  %986 = vst.msk [vmem:[#allocation2 + $0x38] sm:$0xff] %vm937_vm1, %v907_v7  ;;  %v906_v21 = vmul.f32 %v5971_v17, %v6404_v4  ;;  %5998 = vpow2.f32 %v5309_v30  ;;  %v5329_v5 = vmul.f32 -1.442695, %v6566_v45  ;;  %v6609_v56 = vadd.s32 2, %v6469_v20 }
  0xff   : > { %v5975_v43 = vpop.eup %5974  ;;  %1002 = vst.msk [vmem:[#allocation2 + $0xb8] sm:$0xff] %vm937_vm1, %v6545_v26  ;;  %v6562_v38 = vmul.f32 %v5973_v63, %v6411_v9  ;;  %6000 = vpow2.f32 %v5325_v44  ;;  %v5313_v2 = vmul.f32 -1.442695, %v6557_v0  ;;  %vm960_vm6 = vcmp.ge.s32.totalorder %v6589_v31, 0 }
 0x100   : > { %v5977_v4 = vpop.eup %5976  ;;  %985 = vst.msk [vmem:[#allocation2 + $0x30] sm:$0xff] %vm937_vm1, %v906_v21  ;;  %v909_v30 = vmul.f32 %v5975_v43, %v6415_v13  ;;  %6002 = vpow2.f32 %v5308_v53  ;;  %5770 = vmatprep.mubr.msk.f32.mxu0 %vm937_vm1, %v906_v21  ;;  %v6582_v13 = vadd.f32 %v6371_v40, %v671_v29  ;;  %v6597_v6 = vld [vmem:[#allocation2 + $0x28] sm:$0xff]  ;;  %vm1737_vm8 = vcmp.lt.s32.totalorder %v6452_v60, 6 }
 0x101   : > { %v5979_v9 = vpop.eup %5978  ;;  %1001 = vst.msk [vmem:[#allocation2 + $0xb0] sm:$0xff] %vm937_vm1, %v6562_v38  ;;  %v6578_v44 = vmul.f32 %v5977_v4, %v6418_v14  ;;  %6004 = vpow2.f32 %v5324_v58  ;;  %5771 = vmatmul.mubr.msk.f32.gmra.mxu0 %vm937_vm1, %v907_v7  ;;  %v1083_v24 = vmax.f32 %v6456_v1, %v6597_v6  ;;  %vm979_vm10 = vcmp.lt.s32.totalorder %v6609_v56, 16 }
 0x102   : > { %v5981_v53 = vpop.eup %5980  ;;  %988 = vst.msk [vmem:[#allocation2 + $0x48] sm:$0xff] %vm937_vm1, %v909_v30  ;;  %v908_v52 = vmul.f32 %v5979_v9, %v6426_v22  ;;  %6006 = vpow2.f32 %v5311_v41  ;;  %v6600_v22 = vadd.s32 1, %v6469_v20 }
 0x103   : > { %9973 = vst [vmem:[#allocation3_spill] sm:$0xff] %v6578_v44  ;;  %v5983_v14 = vpop.eup %5982  ;;  %1004 = vst.msk [vmem:[#allocation2 + $0xc8] sm:$0xff] %vm937_vm1, %v6578_v44  ;;  %v6594_v40 = vmul.f32 %v5981_v53, %v6429_v23  ;;  %6008 = vpow2.f32 %v5327_v37  ;;  %v6606_v23 = vld [vmem:[#allocation2 + $0x20] sm:$0xff] }
 0x104   : > { %v5985_v58 = vpop.eup %5984  ;;  %987 = vst.msk [vmem:[#allocation2 + $0x40] sm:$0xff] %vm937_vm1, %v908_v52  ;;  %v911_v11 = vmul.f32 %v5983_v14, %v6438_v32  ;;  %6010 = vpow2.f32 %v5310_v50  ;;  %5773 = vmatprep.mubr.msk.f32.mxu0 %vm937_vm1, %v908_v52  ;;  %v5328_v32 = vmul.f32 -1.442695, %v6582_v13  ;;  %v1082_v21 = vmax.f32 %v6454_v62, %v6606_v23 }
 0x105   : > { %9974 = vst [vmem:[#allocation4_spill] sm:$0xff] %v6594_v40  ;;  %v5987_v12 = vpop.eup %5986  ;;  %v6611_v19 = vld [vmem:[#allocation2 + $0x38] sm:$0xff]  ;;  %1003 = vst.msk [vmem:[#allocation2 + $0xc0] sm:$0xff] %vm937_vm1, %v6594_v40  ;;  %v6616_v55 = vmul.f32 %v5985_v58, %v6441_v33  ;;  %6012 = vpow2.f32 %v5326_v59  ;;  %5774 = vmatmul.mubr.msk.f32.gmra.mxu0 %vm937_vm1, %v909_v30  ;;  %v1145_v33 = vmax.f32 %v6465_v16, %v6597_v6  ;;  %vm971_vm9 = vcmp.lt.s32.totalorder %v6600_v22, 16 }
 0x106   : > { %v5989_v20 = vpop.eup %5988  ;;  %990 = vst.msk [vmem:[#allocation2 + $0x58] sm:$0xff] %vm937_vm1, %v911_v11  ;;  %v910_v7 = vmul.f32 %v5987_v12, %v6444_v39  ;;  %6014 = vpow2.f32 %v5313_v2  ;;  %v1144_v39 = vmax.f32 %v6462_v15, %v6606_v23  ;;  %v6643_v4 = vmax.f32 %v1083_v24, %v6611_v19 }
 0x107   : > { %9975 = vst [vmem:[#allocation5_spill] sm:$0xff] %v6616_v55  ;;  %v5991_v17 = vpop.eup %5990  ;;  %v6629_v29 = vld [vmem:[#allocation2 + $0x30] sm:$0xff]  ;;  %1006 = vst.msk [vmem:[#allocation2 + $0xd8] sm:$0xff] %vm937_vm1, %v6616_v55  ;;  %v817_v63 = vadd.f32 1.0, %v5989_v20  ;;  %6016 = vpow2.f32 %v5329_v5  ;;  %v1210_v37 = vmax.f32 %v1145_v33, %v6611_v19  ;;  %v1085_v53 = vmax.f32 %v6597_v6, %v6611_v19 }
 0x108   : > { %v5993_v41 = vpop.eup %5992  ;;  %989 = vst.msk [vmem:[#allocation2 + $0x50] sm:$0xff] %vm937_vm1, %v910_v7  ;;  %v833_v43 = vadd.f32 1.0, %v5991_v17  ;;  %6018 = vpow2.f32 %v5312_v54  ;;  %5776 = vmatprep.mubr.msk.f32.mxu0 %vm937_vm1, %v910_v7  ;;  %v1209_v9 = vmax.f32 %v1144_v39, %v6629_v29  ;;  %v6656_v5 = vmax.f32 %v1082_v21, %v6629_v29 }
 0x109   : > { %v5995_v30 = vpop.eup %5994  ;;  %6020 = vrcp.f32 %v817_v63  ;;  %v816_v50 = vadd.f32 1.0, %v5993_v41  ;;  %5777 = vmatmul.mubr.msk.f32.gmra.mxu0 %vm937_vm1, %v911_v11  ;;  %v6647_v59 = vld [vmem:[#allocation2 + $0x48] sm:$0xff] }
 0x10a   : > { %v5997_v52 = vpop.eup %5996  ;;  %6022 = vrcp.f32 %v833_v43  ;;  %v832_v2 = vadd.f32 1.0, %v5995_v30  ;;  %v6652_v14 = vmax.f32 %v1210_v37, %v6647_v59  ;;  %v6669_v24 = vmax.f32 %v1085_v53, %v6647_v59 }
 0x10b   : > { %v5999_v58 = vpop.eup %5998  ;;  %v6659_v11 = vmul.f32 %v5997_v52, %v6450_v49  ;;  %6024 = vrcp.f32 %v816_v50  ;;  %v6661_v54 = vld [vmem:[#allocation2 + $0x40] sm:$0xff] }
 0x10c   : > { %v6001_v20 = vpop.eup %6000  ;;  %6026 = vrcp.f32 %v832_v2  ;;  %v819_v7 = vadd.f32 1.0, %v5999_v58  ;;  %v1274_v33 = vmax.f32 %v1209_v9, %v6661_v54  ;;  %v1322_v63 = vrot.slane %v6652_v14, 6 }
 0x10d   : > { %9976 = vst [vmem:[#allocation6_spill] sm:$0xff] %v6659_v11  ;;  %v6003_v17 = vpop.eup %6002  ;;  %1005 = vst.msk [vmem:[#allocation2 + $0xd0] sm:$0xff] %vm937_vm1, %v6659_v11  ;;  %v835_v49 = vadd.f32 1.0, %v6001_v20  ;;  %6028 = vpow2.f32 %v5328_v32  ;;  %v1455_v39 = vrot.slane %v6652_v14, 7  ;;  %v1588_v53 = vrot.slane %v6652_v14, 1 }
 0x10e   : > { %v6005_v21 = vpop.eup %6004  ;;  %6030 = vrcp.f32 %v819_v7  ;;  %v818_v41 = vadd.f32 1.0, %v6003_v17  ;;  %v1306_v43 = vrot.slane %v1274_v33, 6  ;;  %v1439_v37 = vrot.slane %v1274_v33, 7 }
 0x10f   : > { %v6007_v30 = vpop.eup %6006  ;;  %6032 = vrcp.f32 %v835_v49  ;;  %v834_v50 = vadd.f32 1.0, %v6005_v21  ;;  %v1572_v9 = vrot.slane %v1274_v33, 1  ;;  %v1705_v49 = vrot.slane %v1274_v33, 2 }
 0x110   : > { %v6009_v32 = vpop.eup %6008  ;;  %6034 = vrcp.f32 %v818_v41  ;;  %v821_v52 = vadd.f32 1.0, %v6007_v30  ;;  %v1355_v2 = vsel %vm1338_vm3, %v1322_v63, %v1306_v43  ;;  %v1488_v58 = vsel %vm1471_vm4, %v1455_v39, %v1439_v37 }
 0x111   : > { %v6011_v20 = vpop.eup %6010  ;;  %6036 = vrcp.f32 %v834_v50  ;;  %v837_v7 = vadd.f32 1.0, %v6009_v32  ;;  %v1375_v17 = vsel %vm952_vm5, %v1355_v2, -inf  ;;  %v1508_v41 = vsel %vm960_vm6, %v1488_v58, -inf }
 0x112   : > { %v6013_v21 = vpop.eup %6012  ;;  %6038 = vrcp.f32 %v821_v52  ;;  %v820_v12 = vadd.f32 1.0, %v6011_v20  ;;  %v1407_v6 = vmax.f32 %v1274_v33, %v1375_v17  ;;  %v1605_v11 = vsel %vm1604_vm7, %v1572_v9, %v1588_v53 }
 0x113   : > { %v6015_v30 = vpop.eup %6014  ;;  %6040 = vrcp.f32 %v837_v7  ;;  %v836_v55 = vadd.f32 1.0, %v6013_v21  ;;  %v1721_v50 = vrot.slane %v6652_v14, 2  ;;  %v1339_v52 = vsel %vm1338_vm3, %v1306_v43, %v1322_v63 }
 0x114   : > { %v6017_v32 = vpop.eup %6016  ;;  %6042 = vrcp.f32 %v820_v12  ;;  %v823_v44 = vadd.f32 1.0, %v6015_v30  ;;  %v1540_v2 = vmax.f32 %v1407_v6, %v1508_v41  ;;  %v1621_v58 = vsel %vm1604_vm7, %v1588_v53, %v1572_v9  ;;  %v6696_v30 = vld [vmem:[#allocation2 + $0x58] sm:$0xff]  ;;  %v6708_v41 = vld [vmem:[#allocation2 + $0x50] sm:$0xff] }
 0x115   : > { %v6019_v20 = vpop.eup %6018  ;;  %6044 = vrcp.f32 %v836_v55  ;;  %v839_v33 = vadd.f32 1.0, %v6017_v32  ;;  %v1738_v7 = vsel %vm1737_vm8, %v1705_v49, %v1721_v50  ;;  %v1408_v12 = vmax.f32 %v6652_v14, %v1339_v52  ;;  %v6703_v9 = vld [vmem:[#allocation2 + $0xb8] sm:$0xff] }
 0x116   : > { %v6021_v17 = vpop.eup %6020  ;;  %6046 = vrcp.f32 %v823_v44  ;;  %v822_v21 = vadd.f32 1.0, %v6019_v20  ;;  %v1673_v40 = vmax.f32 %v1540_v2, %v1605_v11  ;;  %v1754_v55 = vsel %vm1737_vm8, %v1721_v50, %v1705_v49 }
 0x117   : > { %v6023_v6 = vpop.eup %6022  ;;  %v913_v63 = vmul.f32 %v6021_v17, %v6472_v25  ;;  %6048 = vrcp.f32 %v839_v33  ;;  %v1472_v43 = vsel %vm1471_vm4, %v1439_v37, %v1455_v39  ;;  %v1642_v49 = vsel %vm971_vm9, %v1621_v58, -inf }
 0x118   : > { %v6025_v53 = vpop.eup %6024  ;;  %v6706_v44 = vmul.f32 %v6023_v6, %v6480_v42  ;;  %6050 = vrcp.f32 %v822_v21  ;;  %v1806_v14 = vmax.f32 %v1673_v40, %v1738_v7  ;;  %v1541_v11 = vmax.f32 %v1408_v12, %v1472_v43  ;;  %v6722_v40 = vld [vmem:[#allocation2 + $0xa8] sm:$0xff] }
 0x119   : > { %v6027_v32 = vpop.eup %6026  ;;  %992 = vst.msk [vmem:[#allocation2 + $0x68] sm:$0xff] %vm937_vm1, %v913_v63  ;;  %v912_v25 = vmul.f32 %v6025_v53, %v6484_v48  ;;  %v1211_v39 = vmax.f32 %v6656_v5, %v6661_v54  ;;  %v9977_v42 = vmax.f32 %v6643_v4, %v6647_v59  ;;  %v1775_v2 = vsel %vm979_vm10, %v1754_v55, -inf }
 0x11a   : > { %v6029_v50 = vpop.eup %6028  ;;  %1008 = vst.msk [vmem:[#allocation2 + $0xe8] sm:$0xff] %vm937_vm1, %v6706_v44  ;;  %v6727_v48 = vmul.f32 %v6027_v32, %v6489_v57  ;;  %5717 = vmatprep.mubr.msk.f32.mxu1 %vm937_vm1, %v1806_v14  ;;  %2488 = vst.msk [vmem:[#allocation2 + $0x20] sm:$0xff] %vm937_vm1, %v1806_v14  ;;  %v1674_v5 = vmax.f32 %v1541_v11, %v1642_v49  ;;  %v1101_v4 = vmax.f32 %v6722_v40, %v6703_v9 }
 0x11b   : > { %v6720_v37 = vmax.f32 %v9977_v42, %v6696_v30  ;;  %v6031_v52 = vpop.eup %6030  ;;  %991 = vst.msk [vmem:[#allocation2 + $0x60] sm:$0xff] %vm937_vm1, %v912_v25  ;;  %v838_v20 = vadd.f32 1.0, %v6029_v50  ;;  %5779 = vmatprep.mubr.msk.f32.mxu0 %vm937_vm1, %v912_v25  ;;  %v6738_v57 = vmax.f32 %v1211_v39, %v6708_v41  ;;  %v9978_v33 = vmax.f32 %v6606_v23, %v6629_v29 }
 0x11c   : > { %v1214_v7 = vmax.f32 %v6669_v24, %v6696_v30  ;;  %v6033_v17 = vpop.eup %6032  ;;  %1007 = vst.msk [vmem:[#allocation2 + $0xe0] sm:$0xff] %vm937_vm1, %v6727_v48  ;;  %v915_v21 = vmul.f32 %v6031_v52, %v6492_v61  ;;  %5780 = vmatmul.mubr.msk.f32.gmra.mxu0 %vm937_vm1, %v913_v63  ;;  %v1807_v12 = vmax.f32 %v1674_v5, %v1775_v2 }
 0x11d   : > { %v6744_v58 = vmax.f32 %v9978_v33, %v6661_v54  ;;  %v1323_v6 = vrot.slane %v6720_v37, 6  ;;  %v1456_v55 = vrot.slane %v6720_v37, 7  ;;  %v6035_v43 = vpop.eup %6034  ;;  %v6755_v23 = vmul.f32 %v6033_v17, %v6497_v8 }
 0x11e   : > { %6052 = vrcp.f32 %v838_v20  ;;  %v1307_v53 = vrot.slane %v6738_v57, 6  ;;  %v1440_v14 = vrot.slane %v6738_v57, 7  ;;  %v6037_v11 = vpop.eup %6036  ;;  %994 = vst.msk [vmem:[#allocation2 + $0x78] sm:$0xff] %vm937_vm1, %v915_v21  ;;  %v914_v61 = vmul.f32 %v6035_v43, %v6501_v18  ;;  %5718 = vmatmul.mubr.msk.f32.vlgmr.msra.gmra.mxu1 %vm937_vm1, %v1807_v12  ;;  %2489 = vst.msk [vmem:[#allocation2 + $0x28] sm:$0xff] %vm937_vm1, %v1807_v12 }
 0x11f   : > { %v1573_v63 = vrot.slane %v6738_v57, 1  ;;  %v1589_v32 = vrot.slane %v6720_v37, 1  ;;  %v1706_v25 = vrot.slane %v6738_v57, 2  ;;  %v6039_v8 = vpop.eup %6038  ;;  %1010 = vst.msk [vmem:[#allocation2 + $0xf8] sm:$0xff] %vm937_vm1, %v6755_v23  ;;  %v6769_v49 = vmul.f32 %v6037_v11, %v6507_v35  ;;  %5816 = vmatpush3.msk.msra.mxu1 %vm1935_vm2, %v6352_v36 }
 0x120   : > { %v1356_v18 = vsel %vm1338_vm3, %v1323_v6, %v1307_v53  ;;  %v1489_v39 = vsel %vm1471_vm4, %v1456_v55, %v1440_v14  ;;  %v1340_v42 = vsel %vm1338_vm3, %v1307_v53, %v1323_v6  ;;  %v6041_v50 = vpop.eup %6040  ;;  %993 = vst.msk [vmem:[#allocation2 + $0x70] sm:$0xff] %vm937_vm1, %v914_v61  ;;  %v917_v5 = vmul.f32 %v6039_v8, %v6520_v46 }
 0x121   : > { %5782 = vmatprep.mubr.msk.f32.mxu0 %vm937_vm1, %v914_v61  ;;  %v1377_v35 = vsel %vm952_vm5, %v1356_v18, -inf  ;;  %v1722_v36 = vrot.slane %v6720_v37, 2  ;;  %v1213_v2 = vmax.f32 %v6744_v58, %v6708_v41  ;;  %v6043_v52 = vpop.eup %6042  ;;  %1009 = vst.msk [vmem:[#allocation2 + $0xf0] sm:$0xff] %vm937_vm1, %v6769_v49  ;;  %v6790_v20 = vmul.f32 %v6041_v50, %v6532_v3  ;;  %v6814_v61 = vld [vmem:[#allocation2 + $0x68] sm:$0xff] }
 0x122   : > { %5783 = vmatmul.mubr.msk.f32.gmra.mxu0 %vm937_vm1, %v915_v21  ;;  %v1409_v46 = vmax.f32 %v6738_v57, %v1377_v35  ;;  %v1510_v33 = vsel %vm960_vm6, %v1489_v39, -inf  ;;  %v1410_v17 = vmax.f32 %v6720_v37, %v1340_v42  ;;  %v6045_v12 = vpop.eup %6044  ;;  %996 = vst.msk [vmem:[#allocation2 + $0x88] sm:$0xff] %vm937_vm1, %v917_v5  ;;  %v916_v58 = vmul.f32 %v6043_v52, %v6540_v10  ;;  %v6805_v57 = vld [vmem:[#allocation2 + $0x60] sm:$0xff]  ;;  %v6824_v39 = vld [vmem:[#allocation2 + $0xb0] sm:$0xff] }
 0x123   : > { %v1606_v6 = vsel %vm1604_vm7, %v1573_v63, %v1589_v32  ;;  %v1739_v3 = vsel %vm1737_vm8, %v1706_v25, %v1722_v36  ;;  %v1473_v21 = vsel %vm1471_vm4, %v1440_v14, %v1456_v55  ;;  %v6047_v43 = vpop.eup %6046  ;;  %1012 = vst.msk [vmem:[#allocation2 + $0x108] sm:$0xff] %vm937_vm1, %v6790_v20  ;;  %v6810_v37 = vmul.f32 %v6045_v12, %v6548_v28 }
 0x124   : > { %v1542_v53 = vmax.f32 %v1409_v46, %v1510_v33  ;;  %v1543_v10 = vmax.f32 %v1410_v17, %v1473_v21  ;;  %v1622_v11 = vsel %vm1604_vm7, %v1589_v32, %v1573_v63  ;;  %v6049_v8 = vpop.eup %6048  ;;  %995 = vst.msk [vmem:[#allocation2 + $0x80] sm:$0xff] %vm937_vm1, %v916_v58  ;;  %v919_v55 = vmul.f32 %v6047_v43, %v6557_v0  ;;  %v6832_v0 = vld [vmem:[#allocation2 + $0x20] sm:$0xff] }
 0x125   : > { %5785 = vmatprep.mubr.msk.f32.mxu0 %vm937_vm1, %v916_v58  ;;  %v1644_v14 = vsel %vm971_vm9, %v1622_v11, -inf  ;;  %v1755_v28 = vsel %vm1737_vm8, %v1722_v36, %v1706_v25  ;;  %v1278_v18 = vmax.f32 %v1213_v2, %v6805_v57  ;;  %v6051_v63 = vpop.eup %6050  ;;  %1011 = vst.msk [vmem:[#allocation2 + $0x100] sm:$0xff] %vm937_vm1, %v6810_v37  ;;  %v6829_v32 = vmul.f32 %v6049_v8, %v6566_v45  ;;  %v6842_v52 = vld [vmem:[#allocation2 + $0x28] sm:$0xff] }
 0x126   : > { %5786 = vmatmul.mubr.msk.f32.gmra.mxu0 %vm937_vm1, %v917_v5  ;;  %v1675_v42 = vmax.f32 %v1542_v53, %v1606_v6  ;;  %v1676_v50 = vmax.f32 %v1543_v10, %v1644_v14  ;;  %v1777_v25 = vsel %vm979_vm10, %v1755_v28, -inf  ;;  %998 = vst.msk [vmem:[#allocation2 + $0x98] sm:$0xff] %vm937_vm1, %v919_v55  ;;  %v918_v35 = vmul.f32 %v6051_v63, %v6572_v51  ;;  %v6844_v5 = vld [vmem:[#allocation2 + $0xa0] sm:$0xff] }
 0x127   : > { %v1279_v36 = vmax.f32 %v1214_v7, %v6814_v61  ;;  %v1308_v45 = vrot.slane %v1278_v18, 6  ;;  %v1441_v2 = vrot.slane %v1278_v18, 7  ;;  %1014 = vst.msk [vmem:[#allocation2 + $0x118] sm:$0xff] %vm937_vm1, %v6829_v32  ;;  %v1574_v17 = vrot.slane %v1278_v18, 1 }
 0x128   : > { %v1808_v46 = vmax.f32 %v1675_v42, %v1739_v3  ;;  %v1809_v33 = vmax.f32 %v1676_v50, %v1777_v25  ;;  %v1100_v51 = vmax.f32 %v6844_v5, %v6824_v39  ;;  %997 = vst.msk [vmem:[#allocation2 + $0x90] sm:$0xff] %vm937_vm1, %v918_v35  ;;  %5788 = vmatprep.mubr.msk.f32.mxu0 %vm937_vm1, %v918_v35  ;;  %v1707_v21 = vrot.slane %v1278_v18, 2 }
 0x129   : > { %v2586_v24 = vmax.f32 %v6454_v62, %v6832_v0  ;;  %v1324_v7 = vrot.slane %v1279_v36, 6  ;;  %v1457_v12 = vrot.slane %v1279_v36, 7  ;;  %v1087_v58 = vmax.f32 %v6611_v19, %v6647_v59 }
 0x12a   : > { %5789 = vmatmul.mubr.msk.f32.gmra.mxu0 %vm937_vm1, %v919_v55  ;;  %v2648_v6 = vmax.f32 %v6462_v15, %v6832_v0  ;;  %5720 = vmatprep.mubr.msk.f32.mxu1 %vm937_vm1, %v1808_v46  ;;  %2490 = vst.msk [vmem:[#allocation2 + $0x30] sm:$0xff] %vm937_vm1, %v1808_v46  ;;  %2491 = vst.msk [vmem:[#allocation2 + $0x38] sm:$0xff] %vm937_vm1, %v1809_v33  ;;  %v1590_v3 = vrot.slane %v1279_v36, 1  ;;  %v2587_v62 = vmax.f32 %v6456_v1, %v6842_v52 }
 0x12b   : > { %v6053_v43 = vpop.eup %6052  ;;  %5791 = vmatprep.mubr.msk.f32.mxu0 %vm937_vm1, %v6526_v47  ;;  %5721 = vmatmul.mubr.msk.f32.gmra.mxu1 %vm937_vm1, %v1809_v33  ;;  %v1357_v15 = vsel %vm1338_vm3, %v1324_v7, %v1308_v45  ;;  %v1490_v19 = vsel %vm1471_vm4, %v1457_v12, %v1441_v2  ;;  %v1723_v53 = vrot.slane %v1279_v36, 2  ;;  %v2649_v10 = vmax.f32 %v6465_v16, %v6842_v52  ;;  %v6907_v33 = vld [vmem:[#allocation2 + $0x78] sm:$0xff] }
 0x12c   : > { %v6874_v11 = vmul.f32 %v6053_v43, %v6582_v13  ;;  %v1379_v1 = vsel %vm952_vm5, %v1357_v15, -inf  ;;  %v1607_v47 = vsel %vm1604_vm7, %v1574_v17, %v1590_v3  ;;  %v1086_v8 = vmax.f32 %v6629_v29, %v6661_v54 }
 0x12d   : > { %v1411_v55 = vmax.f32 %v1278_v18, %v1379_v1  ;;  %v1512_v14 = vsel %vm960_vm6, %v1490_v19, -inf  ;;  %v1341_v28 = vsel %vm1338_vm3, %v1308_v45, %v1324_v7  ;;  %v1623_v13 = vsel %vm1604_vm7, %v1590_v3, %v1574_v17  ;;  %v6916_v3 = vld [vmem:[#allocation2 + $0x70] sm:$0xff]  ;;  %v9979_v1 = vld [vmem:[#allocation4_spill] sm:$0xff] }
 0x12e   : > { %1013 = vst.msk [vmem:[#allocation2 + $0x110] sm:$0xff] %vm937_vm1, %v6874_v11  ;;  %5792 = vmatmul.mubr.msk.f32.gmra.mxu0 %vm937_vm1, %v6513_v27  ;;  %v1740_v63 = vsel %vm1737_vm8, %v1707_v21, %v1723_v53  ;;  %v1412_v29 = vmax.f32 %v1279_v36, %v1341_v28  ;;  %v1756_v18 = vsel %vm1737_vm8, %v1723_v53, %v1707_v21  ;;  %v1646_v35 = vsel %vm971_vm9, %v1623_v13, -inf  ;;  %v9980_v13 = vld [vmem:[#allocation3_spill] sm:$0xff] }
 0x12f   : > { %v1150_v42 = vmax.f32 %v1086_v8, %v6708_v41  ;;  %5794 = vmatprep.mubr.msk.f32.mxu0 %vm937_vm1, %v6562_v38  ;;  %v1544_v50 = vmax.f32 %v1411_v55, %v1512_v14  ;;  %v1474_v25 = vsel %vm1471_vm4, %v1441_v2, %v1457_v12  ;;  %v1151_v27 = vmax.f32 %v1087_v58, %v6696_v30 }
 0x130   : > { %v1545_v45 = vmax.f32 %v1412_v29, %v1474_v25  ;;  %v1779_v36 = vsel %vm979_vm10, %v1756_v18, -inf  ;;  %v1088_v38 = vmax.f32 %v6661_v54, %v6708_v41  ;;  %v1089_v58 = vmax.f32 %v6647_v59, %v6696_v30 }
 0x131   : > { %v1215_v46 = vmax.f32 %v1150_v42, %v6805_v57  ;;  %v6911_v17 = vld [vmem:[#allocation2 + $0x30] sm:$0xff]  ;;  %v6913_v7 = vld [vmem:[#allocation2 + $0x38] sm:$0xff]  ;;  %v1677_v2 = vmax.f32 %v1544_v50, %v1607_v47  ;;  %v1216_v12 = vmax.f32 %v1151_v27, %v6814_v61  ;;  %v1090_v21 = vmax.f32 %v6708_v41, %v6805_v57 }
 0x132   : > { %v2588_v43 = vmax.f32 %v6832_v0, %v6911_v17  ;;  %v6925_v54 = vmax.f32 %v2586_v24, %v6911_v17  ;;  %5795 = vmatmul.mubr.msk.f32.gmra.mxu0 %vm937_vm1, %v6545_v26  ;;  %v1152_v15 = vmax.f32 %v1088_v38, %v6805_v57  ;;  %v1091_v19 = vmax.f32 %v6696_v30, %v6814_v61 }
 0x133   : > { %v6933_v53 = vmax.f32 %v2648_v6, %v6911_v17  ;;  %v1810_v59 = vmax.f32 %v1677_v2, %v1740_v63  ;;  %v2589_v41 = vmax.f32 %v6842_v52, %v6913_v7  ;;  %5797 = vmatprep.mubr.msk.f32.mxu0 %vm937_vm1, %v9979_v1  ;;  %v1678_v24 = vmax.f32 %v1545_v45, %v1646_v35  ;;  %v9981_v35 = vld [vmem:[#allocation6_spill] sm:$0xff]  ;;  %v6964_v2 = vld [vmem:[#allocation2 + $0x80] sm:$0xff] }
 0x134   : > { %v6940_v47 = vmax.f32 %v2587_v62, %v6913_v7  ;;  %v1280_v26 = vmax.f32 %v1215_v46, %v6916_v3  ;;  %v1281_v8 = vmax.f32 %v1216_v12, %v6907_v33  ;;  %v1153_v30 = vmax.f32 %v1089_v58, %v6814_v61 }
 0x135   : > { %5723 = vmatprep.mubr.msk.f32.mxu1 %vm937_vm1, %v1810_v59  ;;  %v1811_v6 = vmax.f32 %v1678_v24, %v1779_v36  ;;  %v1217_v55 = vmax.f32 %v1152_v15, %v6916_v3  ;;  %2492 = vst.msk [vmem:[#allocation2 + $0x40] sm:$0xff] %vm937_vm1, %v1810_v59  ;;  %v1154_v14 = vmax.f32 %v1090_v21, %v6916_v3 }
 0x136   : > { %v1155_v28 = vmax.f32 %v1091_v19, %v6907_v33  ;;  %5798 = vmatmul.mubr.msk.f32.gmra.mxu0 %vm937_vm1, %v9980_v13  ;;  %v1309_v62 = vrot.slane %v1280_v26, 6  ;;  %v1325_v63 = vrot.slane %v1281_v8, 6  ;;  %v1442_v29 = vrot.slane %v1280_v26, 7  ;;  %v6974_v19 = vld [vmem:[#allocation2 + $0x88] sm:$0xff]  ;;  %v9982_v13 = vld [vmem:[#allocation5_spill] sm:$0xff] }
 0x137   : > { %v1458_v18 = vrot.slane %v1281_v8, 7  ;;  %5724 = vmatmul.mubr.msk.f32.gmra.mxu1 %vm937_vm1, %v1811_v6  ;;  %v1575_v42 = vrot.slane %v1280_v26, 1  ;;  %v1591_v50 = vrot.slane %v1281_v8, 1  ;;  %v1708_v25 = vrot.slane %v1280_v26, 2  ;;  %5800 = vmatprep.mubr.msk.f32.mxu0 %vm937_vm1, %v9981_v35  ;;  %2493 = vst.msk [vmem:[#allocation2 + $0x48] sm:$0xff] %vm937_vm1, %v1811_v6 }
 0x138   : > { %v1092_v27 = vmax.f32 %v6805_v57, %v6916_v3  ;;  %v1358_v45 = vsel %vm1338_vm3, %v1325_v63, %v1309_v62  ;;  %v1724_v46 = vrot.slane %v1281_v8, 2  ;;  %v1342_v38 = vsel %vm1338_vm3, %v1309_v62, %v1325_v63  ;;  %v6982_v62 = vld [vmem:[#allocation2 + $0x90] sm:$0xff] }
 0x139   : > { %v1491_v36 = vsel %vm1471_vm4, %v1458_v18, %v1442_v29  ;;  %v1381_v12 = vsel %vm952_vm5, %v1358_v45, -inf  ;;  %v1608_v21 = vsel %vm1604_vm7, %v1575_v42, %v1591_v50  ;;  %v1475_v15 = vsel %vm1471_vm4, %v1442_v29, %v1458_v18 }
 0x13a   : > { %v1514_v58 = vsel %vm960_vm6, %v1491_v36, -inf  ;;  %v1413_v59 = vmax.f32 %v1280_v26, %v1381_v12  ;;  %v1741_v1 = vsel %vm1737_vm8, %v1708_v25, %v1724_v46  ;;  %v1414_v24 = vmax.f32 %v1281_v8, %v1342_v38  ;;  %5801 = vmatmul.mubr.msk.f32.gmra.mxu0 %vm937_vm1, %v9982_v13 }
 0x13b   : > { %v1624_v6 = vsel %vm1604_vm7, %v1591_v50, %v1575_v42  ;;  %v1757_v29 = vsel %vm1737_vm8, %v1724_v46, %v1708_v25  ;;  %v1218_v26 = vmax.f32 %v1153_v30, %v6907_v33  ;;  %v1282_v18 = vmax.f32 %v1217_v55, %v6964_v2  ;;  %5803 = vmatprep.mubr.msk.f32.mxu0 %vm937_vm1, %v6727_v48 }
 0x13c   : > { %v1648_v63 = vsel %vm971_vm9, %v1624_v6, -inf  ;;  %v1546_v8 = vmax.f32 %v1413_v59, %v1514_v58  ;;  %v1547_v42 = vmax.f32 %v1414_v24, %v1475_v15  ;;  %v1219_v50 = vmax.f32 %v1154_v14, %v6964_v2  ;;  %v6995_v6 = vld [vmem:[#allocation2 + $0x98] sm:$0xff] }
 0x13d   : > { %v1220_v35 = vmax.f32 %v1155_v28, %v6974_v19  ;;  %v1283_v45 = vmax.f32 %v1218_v26, %v6974_v19  ;;  %v1310_v36 = vrot.slane %v1282_v18, 6  ;;  %v1443_v38 = vrot.slane %v1282_v18, 7 }
 0x13e   : > { %v1576_v12 = vrot.slane %v1282_v18, 1  ;;  %v1679_v25 = vmax.f32 %v1546_v8, %v1608_v21  ;;  %v1680_v30 = vmax.f32 %v1547_v42, %v1648_v63  ;;  %v1709_v46 = vrot.slane %v1282_v18, 2  ;;  %5804 = vmatmul.mubr.msk.f32.gmra.mxu0 %vm937_vm1, %v6706_v44 }
 0x13f   : > { %v7000_v48 = vmax.f32 %v1219_v50, %v6982_v62  ;;  %v1781_v55 = vsel %vm979_vm10, %v1757_v29, -inf  ;;  %v1326_v14 = vrot.slane %v1283_v45, 6  ;;  %v1459_v28 = vrot.slane %v1283_v45, 7  ;;  %5806 = vmatprep.mubr.msk.f32.mxu0 %vm937_vm1, %v6769_v49 }
 0x140   : > { %v1592_v58 = vrot.slane %v1283_v45, 1  ;;  %v1812_v15 = vmax.f32 %v1679_v25, %v1741_v1  ;;  %v1813_v59 = vmax.f32 %v1680_v30, %v1781_v55  ;;  %v1725_v21 = vrot.slane %v1283_v45, 2 }
 0x141   : > { %v1285_v24 = vmax.f32 %v1220_v35, %v6995_v6  ;;  %v1359_v44 = vsel %vm1338_vm3, %v1326_v14, %v1310_v36  ;;  %v1492_v13 = vsel %vm1471_vm4, %v1459_v28, %v1443_v38  ;;  %v1311_v29 = vrot.slane %v7000_v48, 6 }
 0x142   : > { %v1609_v63 = vsel %vm1604_vm7, %v1576_v12, %v1592_v58  ;;  %5726 = vmatprep.mubr.msk.f32.mxu1 %vm937_vm1, %v1812_v15  ;;  %v1383_v49 = vsel %vm952_vm5, %v1359_v44, -inf  ;;  %v1516_v1 = vsel %vm960_vm6, %v1492_v13, -inf  ;;  %v1742_v26 = vsel %vm1737_vm8, %v1709_v46, %v1725_v21  ;;  %2494 = vst.msk [vmem:[#allocation2 + $0x50] sm:$0xff] %vm937_vm1, %v1812_v15  ;;  %2495 = vst.msk [vmem:[#allocation2 + $0x58] sm:$0xff] %vm937_vm1, %v1813_v59 }
 0x143   : > { %v1343_v8 = vsel %vm1338_vm3, %v1310_v36, %v1326_v14  ;;  %5807 = vmatmul.mubr.msk.f32.gmra.mxu0 %vm937_vm1, %v6755_v23  ;;  %5727 = vmatmul.mubr.msk.f32.gmra.mxu1 %vm937_vm1, %v1813_v59  ;;  %v1415_v42 = vmax.f32 %v1282_v18, %v1383_v49  ;;  %v1476_v35 = vsel %vm1471_vm4, %v1443_v38, %v1459_v28  ;;  %v1327_v55 = vrot.slane %v1285_v24, 6 }
 0x144   : > { %v1416_v50 = vmax.f32 %v1283_v45, %v1343_v8  ;;  %v1625_v25 = vsel %vm1604_vm7, %v1592_v58, %v1576_v12  ;;  %v1758_v30 = vsel %vm1737_vm8, %v1725_v21, %v1709_v46  ;;  %v1444_v14 = vrot.slane %v7000_v48, 7  ;;  %5809 = vmatprep.mubr.msk.f32.mxu0 %vm937_vm1, %v6810_v37 }
 0x145   : > { %v1650_v36 = vsel %vm971_vm9, %v1625_v25, -inf  ;;  %v1548_v23 = vmax.f32 %v1415_v42, %v1516_v1  ;;  %v1460_v45 = vrot.slane %v1285_v24, 7  ;;  %v1577_v38 = vrot.slane %v7000_v48, 1 }
 0x146   : > { %v1549_v18 = vmax.f32 %v1416_v50, %v1476_v35  ;;  %v1360_v12 = vsel %vm1338_vm3, %v1327_v55, %v1311_v29  ;;  %v1593_v28 = vrot.slane %v1285_v24, 1  ;;  %v1710_v58 = vrot.slane %v7000_v48, 2 }
 0x147   : > { %v1726_v15 = vrot.slane %v1285_v24, 2  ;;  %5810 = vmatmul.mubr.msk.f32.gmra.mxu0 %vm937_vm1, %v6790_v20  ;;  %v1681_v46 = vmax.f32 %v1548_v23, %v1609_v63  ;;  %v1385_v37 = vsel %vm952_vm5, %v1360_v12, -inf  ;;  %v1493_v21 = vsel %vm1471_vm4, %v1460_v45, %v1444_v14 }
 0x148   : > { %v1682_v59 = vmax.f32 %v1549_v18, %v1650_v36  ;;  %5812 = vmatprep.mubr.msk.f32.mxu0 %vm937_vm1, %v6874_v11  ;;  %v1783_v44 = vsel %vm979_vm10, %v1758_v30, -inf  ;;  %v1417_v13 = vmax.f32 %v7000_v48, %v1385_v37  ;;  %v1518_v49 = vsel %vm960_vm6, %v1493_v21, -inf }
 0x149   : > { %v1610_v20 = vsel %vm1604_vm7, %v1577_v38, %v1593_v28  ;;  %v1814_v63 = vmax.f32 %v1681_v46, %v1742_v26  ;;  %v1743_v8 = vsel %vm1737_vm8, %v1710_v58, %v1726_v15  ;;  %v1344_v42 = vsel %vm1338_vm3, %v1311_v29, %v1327_v55 }
 0x14a   : > { %v1815_v1 = vmax.f32 %v1682_v59, %v1783_v44  ;;  %v1550_v11 = vmax.f32 %v1417_v13, %v1518_v49  ;;  %v1418_v50 = vmax.f32 %v1285_v24, %v1344_v42  ;;  %v1477_v35 = vsel %vm1471_vm4, %v1444_v14, %v1460_v45 }
 0x14b   : > { %v1626_v48 = vsel %vm1604_vm7, %v1593_v28, %v1577_v38  ;;  %5813 = vmatmul.mubr.msk.f32.gmra.mxu0 %vm937_vm1, %v6829_v32  ;;  %5729 = vmatprep.mubr.msk.f32.mxu1 %vm937_vm1, %v1814_v63  ;;  %v1759_v25 = vsel %vm1737_vm8, %v1726_v15, %v1710_v58  ;;  %v1093_v24 = vmax.f32 %v6814_v61, %v6907_v33 }
 0x14c   : > { %v1652_v26 = vsel %vm971_vm9, %v1626_v48, -inf  ;;  %v1156_v29 = vmax.f32 %v1092_v27, %v6964_v2  ;;  %2496 = vst.msk [vmem:[#allocation2 + $0x60] sm:$0xff] %vm937_vm1, %v1814_v63  ;;  %2497 = vst.msk [vmem:[#allocation2 + $0x68] sm:$0xff] %vm937_vm1, %v1815_v1  ;;  %5730 = vmatmul.mubr.msk.f32.gmra.mxu1 %vm937_vm1, %v1815_v1  ;;  %v1683_v32 = vmax.f32 %v1550_v11, %v1610_v20  ;;  %v7127_v20 = vld [vmem:[#allocation2 + $0x50] sm:$0xff] }
 0x14d   : > { %v1551_v36 = vmax.f32 %v1418_v50, %v1477_v35  ;;  %v1094_v30 = vmax.f32 %v6916_v3, %v6964_v2  ;;  %v1095_v55 = vmax.f32 %v6907_v33, %v6974_v19  ;;  %v1157_v61 = vmax.f32 %v1093_v24, %v6974_v19 }
 0x14e   : > { %v1221_v14 = vmax.f32 %v1156_v29, %v6982_v62  ;;  %v1096_v57 = vmax.f32 %v6964_v2, %v6982_v62  ;;  %v1097_v27 = vmax.f32 %v6974_v19, %v6995_v6  ;;  %v1816_v23 = vmax.f32 %v1683_v32, %v1743_v8 }
 0x14f   : > { %v1684_v18 = vmax.f32 %v1551_v36, %v1652_v26  ;;  %v1158_v45 = vmax.f32 %v1094_v30, %v6982_v62  ;;  %v1159_v38 = vmax.f32 %v1095_v55, %v6995_v6  ;;  %v1785_v3 = vsel %vm979_vm10, %v1759_v25, -inf }
 0x150   : > { %v1222_v33 = vmax.f32 %v1157_v61, %v6995_v6  ;;  %v1286_v12 = vmax.f32 %v1221_v14, %v6844_v5  ;;  %v7099_v28 = vmax.f32 %v1096_v57, %v6844_v5  ;;  %v7105_v2 = vmax.f32 %v2649_v10, %v6913_v7  ;;  %5732 = vmatprep.mubr.msk.f32.mxu1 %vm937_vm1, %v1816_v23 }
 0x151   : > { %v1817_v19 = vmax.f32 %v1684_v18, %v1785_v3  ;;  %v1223_v58 = vmax.f32 %v1158_v45, %v6844_v5  ;;  %v1224_v15 = vmax.f32 %v1159_v38, %v6722_v40  ;;  %2498 = vst.msk [vmem:[#allocation2 + $0x70] sm:$0xff] %vm937_vm1, %v1816_v23  ;;  %v7113_v21 = vmax.f32 %v1097_v27, %v6722_v40 }
 0x152   : > { %v1287_v46 = vmax.f32 %v1222_v33, %v6722_v40  ;;  %v1312_v59 = vrot.slane %v1286_v12, 6  ;;  %v1445_v37 = vrot.slane %v1286_v12, 7  ;;  %v1578_v16 = vrot.slane %v1286_v12, 1 }
 0x153   : > { %5733 = vmatmul.mubr.msk.f32.gmra.mxu1 %vm937_vm1, %v1817_v19  ;;  %v7116_v10 = vld [vmem:[#allocation2 + $0x60] sm:$0xff]  ;;  %v7119_v44 = vmax.f32 %v1223_v58, %v6824_v39  ;;  %v7122_v13 = vmax.f32 %v1224_v15, %v6703_v9  ;;  %2499 = vst.msk [vmem:[#allocation2 + $0x78] sm:$0xff] %vm937_vm1, %v1817_v19  ;;  %v1098_v49 = vmax.f32 %v6982_v62, %v6844_v5  ;;  %v1711_v8 = vrot.slane %v1286_v12, 2 }
 0x154   : > { %v1328_v63 = vrot.slane %v1287_v46, 6  ;;  %v1461_v1 = vrot.slane %v1287_v46, 7  ;;  %v1225_v42 = vmax.f32 %v7099_v28, %v6824_v39  ;;  %v1594_v11 = vrot.slane %v1287_v46, 1 }
 0x155   : > { %v1727_v50 = vrot.slane %v1287_v46, 2  ;;  %v2594_v35 = vmax.f32 %v7127_v20, %v7116_v10  ;;  %v1313_v48 = vrot.slane %v7119_v44, 6  ;;  %v1329_v24 = vrot.slane %v7122_v13, 6 }
 0x156   : > { %v1361_v26 = vsel %vm1338_vm3, %v1328_v63, %v1312_v59  ;;  %v1494_v25 = vsel %vm1471_vm4, %v1461_v1, %v1445_v37  ;;  %v1446_v29 = vrot.slane %v7119_v44, 7  ;;  %v1611_v30 = vsel %vm1604_vm7, %v1578_v16, %v1594_v11 }
 0x157   : > { %v1387_v32 = vsel %vm952_vm5, %v1361_v26, -inf  ;;  %v1520_v36 = vsel %vm960_vm6, %v1494_v25, -inf  ;;  %v1345_v55 = vsel %vm1338_vm3, %v1312_v59, %v1328_v63  ;;  %v1478_v57 = vsel %vm1471_vm4, %v1445_v37, %v1461_v1  ;;  %v7175_v26 = vld [vmem:[#allocation2 + $0x68] sm:$0xff] }
 0x158   : > { %v1419_v61 = vmax.f32 %v1286_v12, %v1387_v32  ;;  %v1420_v14 = vmax.f32 %v1287_v46, %v1345_v55  ;;  %v1627_v27 = vsel %vm1604_vm7, %v1594_v11, %v1578_v16  ;;  %v1760_v18 = vsel %vm1737_vm8, %v1727_v50, %v1711_v8  ;;  %v7167_v59 = vld [vmem:[#allocation2 + $0x70] sm:$0xff] }
 0x159   : > { %v1654_v23 = vsel %vm971_vm9, %v1627_v27, -inf  ;;  %v1362_v45 = vsel %vm1338_vm3, %v1329_v24, %v1313_v48  ;;  %v1462_v38 = vrot.slane %v7122_v13, 7  ;;  %v1579_v28 = vrot.slane %v7119_v44, 1 }
 0x15a   : > { %v1552_v3 = vmax.f32 %v1419_v61, %v1520_v36  ;;  %v1553_v33 = vmax.f32 %v1420_v14, %v1478_v57  ;;  %v1389_v12 = vsel %vm952_vm5, %v1362_v45, -inf  ;;  %v1595_v15 = vrot.slane %v7122_v13, 1  ;;  %v7169_v37 = vld [vmem:[#allocation2 + $0x78] sm:$0xff] }
 0x15b   : > { %v1421_v19 = vmax.f32 %v7119_v44, %v1389_v12  ;;  %v1495_v58 = vsel %vm1471_vm4, %v1462_v38, %v1446_v29  ;;  %v1712_v46 = vrot.slane %v7119_v44, 2  ;;  %v1744_v63 = vsel %vm1737_vm8, %v1711_v8, %v1727_v50 }
 0x15c   : > { %v1685_v16 = vmax.f32 %v1552_v3, %v1611_v30  ;;  %v1686_v1 = vmax.f32 %v1553_v33, %v1654_v23  ;;  %v1522_v11 = vsel %vm960_vm6, %v1495_v58, -inf  ;;  %v1787_v25 = vsel %vm979_vm10, %v1760_v18, -inf  ;;  %v7199_v33 = vld [vmem:[#allocation2 + $0xc0] sm:$0xff] }
 0x15d   : > { %v1554_v32 = vmax.f32 %v1421_v19, %v1522_v11  ;;  %v1612_v44 = vsel %vm1604_vm7, %v1579_v28, %v1595_v15  ;;  %v1728_v36 = vrot.slane %v7122_v13, 2  ;;  %v2596_v8 = vmax.f32 %v7116_v10, %v7167_v59 }
 0x15e   : > { %v1818_v55 = vmax.f32 %v1685_v16, %v1744_v63  ;;  %v1819_v30 = vmax.f32 %v1686_v1, %v1787_v25  ;;  %v2597_v50 = vmax.f32 %v7175_v26, %v7169_v37  ;;  %v1346_v57 = vsel %vm1338_vm3, %v1313_v48, %v1329_v24  ;;  %v7206_v24 = vld [vmem:[#allocation2 + $0xc8] sm:$0xff] }
 0x15f   : > { %v1687_v61 = vmax.f32 %v1554_v32, %v1612_v44  ;;  %v1745_v14 = vsel %vm1737_vm8, %v1712_v46, %v1728_v36  ;;  %v1628_v27 = vsel %vm1604_vm7, %v1595_v15, %v1579_v28  ;;  %v2658_v23 = vmax.f32 %v2594_v35, %v7167_v59 }
 0x160   : > { %5735 = vmatprep.mubr.msk.f32.mxu1 %vm937_vm1, %v1818_v55  ;;  %v1422_v18 = vmax.f32 %v7122_v13, %v1346_v57  ;;  %v1761_v45 = vsel %vm1737_vm8, %v1728_v36, %v1712_v46  ;;  %v1226_v3 = vmax.f32 %v7113_v21, %v6703_v9  ;;  %2500 = vst.msk [vmem:[#allocation2 + $0x80] sm:$0xff] %vm937_vm1, %v1818_v55  ;;  %2501 = vst.msk [vmem:[#allocation2 + $0x88] sm:$0xff] %vm937_vm1, %v1819_v30 }
 0x161   : > { %5736 = vmatmul.mubr.msk.f32.gmra.mxu1 %vm937_vm1, %v1819_v30  ;;  %v1820_v48 = vmax.f32 %v1687_v61, %v1745_v14  ;;  %v1479_v35 = vsel %vm1471_vm4, %v1446_v29, %v1462_v38  ;;  %v1290_v13 = vmax.f32 %v1225_v42, %v7199_v33  ;;  %v1099_v12 = vmax.f32 %v6995_v6, %v6722_v40 }
 0x162   : > { %v1555_v21 = vmax.f32 %v1422_v18, %v1479_v35  ;;  %v1656_v28 = vsel %vm971_vm9, %v1628_v27, -inf  ;;  %v1291_v19 = vmax.f32 %v1226_v3, %v7206_v24  ;;  %v1162_v58 = vmax.f32 %v1098_v49, %v6824_v39 }
 0x163   : > { %5738 = vmatprep.mubr.msk.f32.mxu1 %vm937_vm1, %v1820_v48  ;;  %2502 = vst.msk [vmem:[#allocation2 + $0x90] sm:$0xff] %vm937_vm1, %v1820_v48  ;;  %v1789_v42 = vsel %vm979_vm10, %v1761_v45, -inf  ;;  %v1314_v29 = vrot.slane %v1290_v13, 6  ;;  %v1447_v6 = vrot.slane %v1290_v13, 7  ;;  %v1580_v38 = vrot.slane %v1290_v13, 1 }
 0x164   : > { %v1688_v15 = vmax.f32 %v1555_v21, %v1656_v28  ;;  %v1330_v46 = vrot.slane %v1291_v19, 6  ;;  %v1463_v37 = vrot.slane %v1291_v19, 7  ;;  %v1713_v16 = vrot.slane %v1290_v13, 2 }
 0x165   : > { %v1596_v63 = vrot.slane %v1291_v19, 1  ;;  %v1729_v1 = vrot.slane %v1291_v19, 2  ;;  %v1163_v11 = vmax.f32 %v1099_v12, %v6703_v9  ;;  %v7227_v62 = vmax.f32 %v1100_v51, %v7199_v33 }
 0x166   : > { %v1821_v49 = vmax.f32 %v1688_v15, %v1789_v42  ;;  %v1363_v25 = vsel %vm1338_vm3, %v1330_v46, %v1314_v29  ;;  %v1496_v32 = vsel %vm1471_vm4, %v1463_v37, %v1447_v6  ;;  %v1227_v44 = vmax.f32 %v1162_v58, %v7199_v33 }
 0x167   : > { %v1391_v36 = vsel %vm952_vm5, %v1363_v25, -inf  ;;  %v1613_v55 = vsel %vm1604_vm7, %v1580_v38, %v1596_v63  ;;  %v7238_v30 = vld [vmem:[#allocation2 + $0x80] sm:$0xff]  ;;  %v2629_v5 = vld [vmem:[#allocation2 + $0x88] sm:$0xff]  ;;  %v1347_v51 = vsel %vm1338_vm3, %v1314_v29, %v1330_v46  ;;  %v7246_v61 = vmax.f32 %v1101_v4, %v7206_v24  ;;  %v7283_v29 = vld [vmem:[#allocation2 + $0xd8] sm:$0xff] }
 0x168   : > { %5739 = vmatmul.mubr.msk.f32.gmra.mxu1 %vm937_vm1, %v1821_v49  ;;  %v1423_v14 = vmax.f32 %v1290_v13, %v1391_v36  ;;  %v1524_v57 = vsel %vm960_vm6, %v1496_v32, -inf  ;;  %v1746_v27 = vsel %vm1737_vm8, %v1713_v16, %v1729_v1  ;;  %v2598_v18 = vmax.f32 %v7167_v59, %v7238_v30  ;;  %2503 = vst.msk [vmem:[#allocation2 + $0x98] sm:$0xff] %vm937_vm1, %v1821_v49 }
 0x169   : > { %v7257_v45 = vmax.f32 %v2596_v8, %v7238_v30  ;;  %v2722_v40 = vmax.f32 %v2658_v23, %v7238_v30  ;;  %v1424_v4 = vmax.f32 %v1291_v19, %v1347_v51  ;;  %v1629_v3 = vsel %vm1604_vm7, %v1596_v63, %v1580_v38  ;;  %v7278_v19 = vld [vmem:[#allocation2 + $0xd0] sm:$0xff] }
 0x16a   : > { %v7262_v48 = vld [vmem:[#allocation2 + $0x90] sm:$0xff]  ;;  %v1556_v35 = vmax.f32 %v1423_v14, %v1524_v57  ;;  %v7264_v13 = vmax.f32 %v2597_v50, %v2629_v5  ;;  %v1762_v12 = vsel %vm1737_vm8, %v1729_v1, %v1713_v16  ;;  %v1228_v59 = vmax.f32 %v1163_v11, %v7206_v24 }
 0x16b   : > { %v2600_v8 = vmax.f32 %v7238_v30, %v7262_v48  ;;  %v7272_v21 = vmax.f32 %v2722_v40, %v7262_v48  ;;  %v1480_v23 = vsel %vm1471_vm4, %v1447_v6, %v1463_v37  ;;  %v1658_v28 = vsel %vm971_vm9, %v1629_v3, -inf }
 0x16c   : > { %v1689_v50 = vmax.f32 %v1556_v35, %v1613_v55  ;;  %v7281_v58 = vmax.f32 %v2598_v18, %v7262_v48  ;;  %v1557_v42 = vmax.f32 %v1424_v4, %v1480_v23  ;;  %v1292_v38 = vmax.f32 %v1227_v44, %v7278_v19 }
 0x16d   : > { %v2724_v15 = vmax.f32 %v7257_v45, %v7262_v48  ;;  %v1791_v6 = vsel %vm979_vm10, %v1762_v12, -inf  ;;  %v1293_v37 = vmax.f32 %v1228_v59, %v7283_v29 }
 0x16e   : > { %v1822_v16 = vmax.f32 %v1689_v50, %v1746_v27  ;;  %v1690_v63 = vmax.f32 %v1557_v42, %v1658_v28  ;;  %v1315_v1 = vrot.slane %v1292_v38, 6  ;;  %v1448_v11 = vrot.slane %v1292_v38, 7  ;;  %v7318_v42 = vld [vmem:[#allocation2 + $0xe0] sm:$0xff] }
 0x16f   : > { %v1331_v25 = vrot.slane %v1293_v37, 6  ;;  %v1464_v32 = vrot.slane %v1293_v37, 7  ;;  %v1581_v36 = vrot.slane %v1292_v38, 1  ;;  %v7293_v44 = vld [vmem:[#allocation2 + $0x98] sm:$0xff]  ;;  %v1597_v51 = vrot.slane %v1293_v37, 1 }
 0x170   : > { %5741 = vmatprep.mubr.msk.f32.mxu1 %vm937_vm1, %v1822_v16  ;;  %v1823_v5 = vmax.f32 %v1690_v63, %v1791_v6  ;;  %v1714_v14 = vrot.slane %v1292_v38, 2  ;;  %2504 = vst.msk [vmem:[#allocation2 + $0xa0] sm:$0xff] %vm937_vm1, %v1822_v16  ;;  %v1730_v18 = vrot.slane %v1293_v37, 2  ;;  %v2725_v35 = vmax.f32 %v7264_v13, %v7293_v44  ;;  %v7326_v16 = vld [vmem:[#allocation2 + $0xe8] sm:$0xff] }
 0x171   : > { %v1364_v57 = vsel %vm1338_vm3, %v1331_v25, %v1315_v1  ;;  %v1497_v27 = vsel %vm1471_vm4, %v1464_v32, %v1448_v11  ;;  %v1348_v40 = vsel %vm1338_vm3, %v1315_v1, %v1331_v25  ;;  %v1614_v3 = vsel %vm1604_vm7, %v1581_v36, %v1597_v51 }
 0x172   : > { %5742 = vmatmul.mubr.msk.f32.gmra.mxu1 %vm937_vm1, %v1823_v5  ;;  %v1393_v4 = vsel %vm952_vm5, %v1364_v57, -inf  ;;  %v1426_v12 = vmax.f32 %v1293_v37, %v1348_v40  ;;  %2505 = vst.msk [vmem:[#allocation2 + $0xa8] sm:$0xff] %vm937_vm1, %v1823_v5  ;;  %v1481_v23 = vsel %vm1471_vm4, %v1448_v11, %v1464_v32  ;;  %v1630_v28 = vsel %vm1604_vm7, %v1597_v51, %v1581_v36 }
 0x173   : > { %v1425_v59 = vmax.f32 %v1292_v38, %v1393_v4  ;;  %v1763_v50 = vsel %vm1737_vm8, %v1730_v18, %v1714_v14  ;;  %v1526_v6 = vsel %vm960_vm6, %v1497_v27, -inf  ;;  %v1747_v13 = vsel %vm1737_vm8, %v1714_v14, %v1730_v18 }
 0x174   : > { %v1559_v37 = vmax.f32 %v1426_v12, %v1481_v23  ;;  %v1229_v38 = vmax.f32 %v7227_v62, %v7278_v19  ;;  %v1660_v1 = vsel %vm971_vm9, %v1630_v28, -inf  ;;  %v1793_v11 = vsel %vm979_vm10, %v1763_v50, -inf }
 0x175   : > { %v1558_v63 = vmax.f32 %v1425_v59, %v1526_v6  ;;  %v1230_v25 = vmax.f32 %v7246_v61, %v7283_v29  ;;  %v1102_v44 = vmax.f32 %v6824_v39, %v7199_v33  ;;  %v1103_v62 = vmax.f32 %v6703_v9, %v7206_v24 }
 0x176   : > { %v1692_v32 = vmax.f32 %v1559_v37, %v1660_v1  ;;  %v1294_v36 = vmax.f32 %v1229_v38, %v7318_v42  ;;  %v1104_v14 = vmax.f32 %v7199_v33, %v7278_v19  ;;  %v1105_v57 = vmax.f32 %v7206_v24, %v7283_v29 }
 0x177   : > { %v1691_v5 = vmax.f32 %v1558_v63, %v1614_v3  ;;  %v1295_v51 = vmax.f32 %v1230_v25, %v7326_v16  ;;  %v2570_v4 = vld [vmem:[#allocation2 + $0xa0] sm:$0xff]  ;;  %v1166_v23 = vmax.f32 %v1102_v44, %v7278_v19  ;;  %v1167_v6 = vmax.f32 %v1103_v62, %v7283_v29 }
 0x178   : > { %v1825_v27 = vmax.f32 %v1692_v32, %v1793_v11  ;;  %v1316_v61 = vrot.slane %v1294_v36, 6  ;;  %v1449_v18 = vrot.slane %v1294_v36, 7  ;;  %v1582_v40 = vrot.slane %v1294_v36, 1 }
 0x179   : > { %v1824_v12 = vmax.f32 %v1691_v5, %v1747_v13  ;;  %v1332_v59 = vrot.slane %v1295_v51, 6  ;;  %v1465_v39 = vrot.slane %v1295_v51, 7  ;;  %v1598_v9 = vrot.slane %v1295_v51, 1  ;;  %v2695_v50 = vld [vmem:[#allocation2 + $0xa8] sm:$0xff] }
 0x17a   : > { %v1715_v3 = vrot.slane %v1294_v36, 2  ;;  %v1731_v28 = vrot.slane %v1295_v51, 2  ;;  %2507 = vst.msk [vmem:[#allocation2 + $0xb8] sm:$0xff] %vm937_vm1, %v1825_v27  ;;  %v2602_v38 = vmax.f32 %v7262_v48, %v2570_v4  ;;  %v7356_v63 = vmax.f32 %v2600_v8, %v2570_v4 }
 0x17b   : > { %5744 = vmatprep.mubr.msk.f32.mxu1 %vm937_vm1, %v1824_v12  ;;  %v1365_v37 = vsel %vm1338_vm3, %v1332_v59, %v1316_v61  ;;  %v1498_v13 = vsel %vm1471_vm4, %v1465_v39, %v1449_v18  ;;  %2506 = vst.msk [vmem:[#allocation2 + $0xb0] sm:$0xff] %vm937_vm1, %v1824_v12  ;;  %v1615_v11 = vsel %vm1604_vm7, %v1582_v40, %v1598_v9 }
 0x17c   : > { %5745 = vmatmul.mubr.msk.f32.gmra.mxu1 %vm937_vm1, %v1825_v27  ;;  %v1395_v1 = vsel %vm952_vm5, %v1365_v37, -inf  ;;  %v2726_v25 = vmax.f32 %v7281_v58, %v2570_v4  ;;  %v7368_v32 = vmax.f32 %v2724_v15, %v2570_v4  ;;  %v1528_v8 = vsel %vm960_vm6, %v1498_v13, -inf  ;;  %v7398_v13 = vld [vmem:[#allocation2 + $0xf0] sm:$0xff]  ;;  %v7461_v37 = vld [vmem:[#allocation2 + $0x100] sm:$0xff] }
 0x17d   : > { %v1427_v30 = vmax.f32 %v1294_v36, %v1395_v1  ;;  %v7372_v44 = vmax.f32 %v2725_v35, %v2695_v50  ;;  %v1349_v62 = vsel %vm1338_vm3, %v1316_v61, %v1332_v59  ;;  %v1748_v5 = vsel %vm1737_vm8, %v1715_v3, %v1731_v28 }
 0x17e   : > { %v9941_v27 = vrot.slane %v7368_v32, 6  ;;  %v1482_v45 = vsel %vm1471_vm4, %v1449_v18, %v1465_v39  ;;  %v1428_v61 = vmax.f32 %v1295_v51, %v1349_v62  ;;  %v1631_v12 = vsel %vm1604_vm7, %v1598_v9, %v1582_v40  ;;  %v7400_v51 = vld [vmem:[#allocation2 + $0xf8] sm:$0xff] }
 0x17f   : > { %v1560_v48 = vmax.f32 %v1427_v30, %v1528_v8  ;;  %v9942_v15 = vrot.slane %v7372_v44, 6  ;;  %v1764_v59 = vsel %vm1737_vm8, %v1731_v28, %v1715_v3  ;;  %v1231_v3 = vmax.f32 %v1166_v23, %v7318_v42 }
 0x180   : > { %v1561_v9 = vmax.f32 %v1428_v61, %v1482_v45  ;;  %v1232_v28 = vmax.f32 %v1167_v6, %v7326_v16  ;;  %v1662_v30 = vsel %vm971_vm9, %v1631_v12, -inf  ;;  %v1795_v8 = vsel %vm979_vm10, %v1764_v59, -inf }
 0x181   : > { %v1693_v50 = vmax.f32 %v1560_v48, %v1615_v11  ;;  %v2862_v18 = vsel %vm1338_vm3, %v9942_v15, %v9941_v27  ;;  %v1169_v12 = vmax.f32 %v1105_v57, %v7326_v16  ;;  %v1107_v57 = vmax.f32 %v7283_v29, %v7326_v16  ;;  %v7463_v11 = vld [vmem:[#allocation2 + $0x108] sm:$0xff] }
 0x182   : > { %v7404_v40 = vsel %vm952_vm5, %v2862_v18, -inf  ;;  %v2634_v62 = vld [vmem:[#allocation2 + $0xb0] sm:$0xff]  ;;  %v1694_v48 = vmax.f32 %v1561_v9, %v1662_v30  ;;  %v1296_v18 = vmax.f32 %v1231_v3, %v7398_v13  ;;  %v1297_v45 = vmax.f32 %v1232_v28, %v7400_v51 }
 0x183   : > { %9983 = vst [vmem:[#allocation4_spill] sm:$0xff] %v7404_v40  ;;  %v1826_v1 = vmax.f32 %v1693_v50, %v1748_v5  ;;  %v7416_v61 = vmax.f32 %v2602_v38, %v2634_v62  ;;  %v2728_v23 = vmax.f32 %v7356_v63, %v2634_v62  ;;  %v7420_v6 = vmax.f32 %v2726_v25, %v2634_v62 }
 0x184   : > { %v1168_v5 = vmax.f32 %v1104_v14, %v7318_v42  ;;  %v1827_v38 = vmax.f32 %v1694_v48, %v1795_v8  ;;  %v1317_v59 = vrot.slane %v1296_v18, 6  ;;  %v1333_v50 = vrot.slane %v1297_v45, 6 }
 0x185   : > { %5747 = vmatprep.mubr.msk.f32.mxu1 %vm937_vm1, %v1826_v1  ;;  %9984 = vst [vmem:[#allocation3_spill] sm:$0xff] %v7420_v6  ;;  %2508 = vst.msk [vmem:[#allocation2 + $0xc0] sm:$0xff] %vm937_vm1, %v1826_v1  ;;  %v1450_v9 = vrot.slane %v1296_v18, 7  ;;  %v1466_v3 = vrot.slane %v1297_v45, 7  ;;  %v1583_v63 = vrot.slane %v1296_v18, 1  ;;  %v1716_v25 = vrot.slane %v1296_v18, 2 }
 0x186   : > { %v1106_v28 = vmax.f32 %v7278_v19, %v7318_v42  ;;  %5748 = vmatmul.mubr.msk.f32.gmra.mxu1 %vm937_vm1, %v1827_v38  ;;  %v1366_v33 = vsel %vm1338_vm3, %v1333_v50, %v1317_v59  ;;  %v1599_v14 = vrot.slane %v1297_v45, 1  ;;  %v1732_v24 = vrot.slane %v1297_v45, 2  ;;  %2509 = vst.msk [vmem:[#allocation2 + $0xc8] sm:$0xff] %vm937_vm1, %v1827_v38 }
 0x187   : > { %v1397_v1 = vsel %vm952_vm5, %v1366_v33, -inf  ;;  %v1499_v30 = vsel %vm1471_vm4, %v1466_v3, %v1450_v9  ;;  %v1350_v33 = vsel %vm1338_vm3, %v1317_v59, %v1333_v50  ;;  %v1483_v35 = vsel %vm1471_vm4, %v1450_v9, %v1466_v3 }
 0x188   : > { %v1429_v62 = vmax.f32 %v1296_v18, %v1397_v1  ;;  %v1530_v48 = vsel %vm960_vm6, %v1499_v30, -inf  ;;  %v1616_v38 = vsel %vm1604_vm7, %v1583_v63, %v1599_v14  ;;  %v1749_v29 = vsel %vm1737_vm8, %v1716_v25, %v1732_v24 }
 0x189   : > { %v1632_v19 = vsel %vm1604_vm7, %v1599_v14, %v1583_v63  ;;  %v1765_v18 = vsel %vm1737_vm8, %v1732_v24, %v1716_v25  ;;  %v1430_v8 = vmax.f32 %v1297_v45, %v1350_v33  ;;  %v1233_v50 = vmax.f32 %v1168_v5, %v7398_v13 }
 0x18a   : > { %v1562_v1 = vmax.f32 %v1429_v62, %v1530_v48  ;;  %v1664_v59 = vsel %vm971_vm9, %v1632_v19, -inf  ;;  %v1234_v63 = vmax.f32 %v1169_v12, %v7400_v51  ;;  %v1797_v9 = vsel %vm979_vm10, %v1765_v18, -inf }
 0x18b   : > { %v1563_v14 = vmax.f32 %v1430_v8, %v1483_v35  ;;  %v1298_v24 = vmax.f32 %v1233_v50, %v7461_v37  ;;  %v1170_v19 = vmax.f32 %v1106_v28, %v7398_v13  ;;  %v1171_v5 = vmax.f32 %v1107_v57, %v7400_v51 }
 0x18c   : > { %v7465_v55 = vld [vmem:[#allocation2 + $0xc0] sm:$0xff]  ;;  %v1695_v45 = vmax.f32 %v1562_v1, %v1616_v38  ;;  %v1299_v62 = vmax.f32 %v1234_v63, %v7463_v11 }
 0x18d   : > { %v7472_v25 = vmax.f32 %v2728_v23, %v7465_v55  ;;  %v2730_v3 = vmax.f32 %v7416_v61, %v7465_v55  ;;  %v1696_v48 = vmax.f32 %v1563_v14, %v1664_v59  ;;  %v1318_v8 = vrot.slane %v1298_v24, 6  ;;  %v7506_v23 = vld [vmem:[#allocation2 + $0x100] sm:$0xff] }
 0x18e   : > { %v1828_v12 = vmax.f32 %v1695_v45, %v1749_v29  ;;  %v1334_v38 = vrot.slane %v1299_v62, 6  ;;  %v1451_v33 = vrot.slane %v1298_v24, 7  ;;  %v1467_v18 = vrot.slane %v1299_v62, 7 }
 0x18f   : > { %9985 = vst [vmem:[#allocation6_spill] sm:$0xff] %v7472_v25  ;;  %v1829_v1 = vmax.f32 %v1696_v48, %v1797_v9  ;;  %v1584_v50 = vrot.slane %v1298_v24, 1  ;;  %v1717_v30 = vrot.slane %v1298_v24, 2  ;;  %v1600_v29 = vrot.slane %v1299_v62, 1 }
 0x190   : > { %5750 = vmatprep.mubr.msk.f32.mxu1 %vm937_vm1, %v1828_v12  ;;  %2510 = vst.msk [vmem:[#allocation2 + $0xd0] sm:$0xff] %vm937_vm1, %v1828_v12  ;;  %v1367_v28 = vsel %vm1338_vm3, %v1334_v38, %v1318_v8  ;;  %v1500_v57 = vsel %vm1471_vm4, %v1467_v18, %v1451_v33  ;;  %v1351_v59 = vsel %vm1338_vm3, %v1318_v8, %v1334_v38  ;;  %v1733_v14 = vrot.slane %v1299_v62, 2  ;;  %v7504_v38 = vld [vmem:[#allocation2 + $0x110] sm:$0xff] }
 0x191   : > { %5751 = vmatmul.mubr.msk.f32.gmra.mxu1 %vm937_vm1, %v1829_v1  ;;  %v1399_v45 = vsel %vm952_vm5, %v1367_v28, -inf  ;;  %v1432_v48 = vmax.f32 %v1299_v62, %v1351_v59  ;;  %2511 = vst.msk [vmem:[#allocation2 + $0xd8] sm:$0xff] %vm937_vm1, %v1829_v1  ;;  %v1532_v63 = vsel %vm960_vm6, %v1500_v57, -inf  ;;  %v1484_v35 = vsel %vm1471_vm4, %v1451_v33, %v1467_v18  ;;  %v7513_v57 = vld [vmem:[#allocation2 + $0x118] sm:$0xff] }
 0x192   : > { %v1431_v12 = vmax.f32 %v1298_v24, %v1399_v45  ;;  %v1633_v8 = vsel %vm1604_vm7, %v1600_v29, %v1584_v50  ;;  %v1617_v28 = vsel %vm1604_vm7, %v1584_v50, %v1600_v29  ;;  %v1766_v24 = vsel %vm1737_vm8, %v1733_v14, %v1717_v30  ;;  %v1079_v29 = vld [vmem:[#allocation2 + $0x108] sm:$0xff] }
 0x193   : > { %v1565_v62 = vmax.f32 %v1432_v48, %v1484_v35  ;;  %v1235_v1 = vmax.f32 %v1170_v19, %v7461_v37  ;;  %v1750_v33 = vsel %vm1737_vm8, %v1717_v30, %v1733_v14  ;;  %v1666_v18 = vsel %vm971_vm9, %v1633_v8, -inf }
 0x194   : > { %v1564_v59 = vmax.f32 %v1431_v12, %v1532_v63  ;;  %v1236_v45 = vmax.f32 %v1171_v5, %v7463_v11  ;;  %v1799_v35 = vsel %vm979_vm10, %v1766_v24, -inf  ;;  %v1108_v19 = vmax.f32 %v7318_v42, %v7398_v13 }
 0x195   : > { %v1698_v9 = vmax.f32 %v1565_v62, %v1666_v18  ;;  %v1300_v50 = vmax.f32 %v1235_v1, %v7504_v38  ;;  %v1109_v30 = vmax.f32 %v7326_v16, %v7400_v51  ;;  %v1110_v14 = vmax.f32 %v7398_v13, %v7506_v23  ;;  %v2545_v13 = vld [vmem:[#allocation2 + $0xc8] sm:$0xff] }
 0x196   : > { %v1697_v48 = vmax.f32 %v1564_v59, %v1617_v28  ;;  %v1301_v63 = vmax.f32 %v1236_v45, %v7513_v57  ;;  %v1172_v28 = vmax.f32 %v1108_v19, %v7461_v37  ;;  %v1111_v16 = vmax.f32 %v7400_v51, %v1079_v29 }
 0x197   : > { %v1831_v5 = vmax.f32 %v1698_v9, %v1799_v35  ;;  %v1319_v12 = vrot.slane %v1300_v50, 6  ;;  %v1452_v8 = vrot.slane %v1300_v50, 7  ;;  %v1585_v62 = vrot.slane %v1300_v50, 1  ;;  %v7530_v24 = vld [vmem:[#allocation2 + $0xd0] sm:$0xff] }
 0x198   : > { %v1830_v1 = vmax.f32 %v1697_v48, %v1750_v33  ;;  %v1335_v18 = vrot.slane %v1301_v63, 6  ;;  %v1468_v49 = vrot.slane %v1301_v63, 7  ;;  %v7532_v42 = vld [vmem:[#allocation2 + $0xd8] sm:$0xff]  ;;  %v1601_v59 = vrot.slane %v1301_v63, 1 }
 0x199   : > { %v1718_v45 = vrot.slane %v1300_v50, 2  ;;  %v1734_v46 = vrot.slane %v1301_v63, 2  ;;  %2513 = vst.msk [vmem:[#allocation2 + $0xe8] sm:$0xff] %vm937_vm1, %v1831_v5  ;;  %v2608_v33 = vmax.f32 %v7465_v55, %v7530_v24  ;;  %v7548_v37 = vmax.f32 %v2730_v3, %v7530_v24 }
 0x19a   : > { %5753 = vmatprep.mubr.msk.f32.mxu1 %vm937_vm1, %v1830_v1  ;;  %v1368_v23 = vsel %vm1338_vm3, %v1335_v18, %v1319_v12  ;;  %v1501_v9 = vsel %vm1471_vm4, %v1468_v49, %v1452_v8  ;;  %2512 = vst.msk [vmem:[#allocation2 + $0xe0] sm:$0xff] %vm937_vm1, %v1830_v1  ;;  %v1618_v35 = vsel %vm1604_vm7, %v1585_v62, %v1601_v59 }
 0x19b   : > { %9986 = vst [vmem:[#allocation5_spill] sm:$0xff] %v7548_v37  ;;  %5754 = vmatmul.mubr.msk.f32.gmra.mxu1 %vm937_vm1, %v1831_v5  ;;  %v1401_v51 = vsel %vm952_vm5, %v1368_v23, -inf  ;;  %v2609_v19 = vmax.f32 %v2545_v13, %v7532_v42  ;;  %v1352_v29 = vsel %vm1338_vm3, %v1319_v12, %v1335_v18  ;;  %v1534_v55 = vsel %vm960_vm6, %v1501_v9, -inf  ;;  %v7573_v9 = vld [vmem:[#allocation2 + $0x120] sm:$0xff] }
 0x19c   : > { %v1433_v48 = vmax.f32 %v1300_v50, %v1401_v51  ;;  %v1751_v61 = vsel %vm1737_vm8, %v1718_v45, %v1734_v46  ;;  %v1434_v23 = vmax.f32 %v1301_v63, %v1352_v29  ;;  %v1634_v13 = vsel %vm1604_vm7, %v1601_v59, %v1585_v62  ;;  %v7577_v63 = vld [vmem:[#allocation2 + $0x128] sm:$0xff]  ;;  %v7580_v59 = vld [vmem:[#allocation2 + $0x40] sm:$0xff] }
 0x19d   : > { %v1485_v50 = vsel %vm1471_vm4, %v1452_v8, %v1468_v49  ;;  %v1767_v12 = vsel %vm1737_vm8, %v1734_v46, %v1718_v45  ;;  %v1173_v18 = vmax.f32 %v1109_v30, %v7463_v11  ;;  %v1237_v1 = vmax.f32 %v1172_v28, %v7504_v38 }
 0x19e   : > { %v1566_v36 = vmax.f32 %v1433_v48, %v1534_v55  ;;  %v1567_v5 = vmax.f32 %v1434_v23, %v1485_v50  ;;  %v1174_v62 = vmax.f32 %v1110_v14, %v7504_v38  ;;  %v1668_v49 = vsel %vm971_vm9, %v1634_v13, -inf  ;;  %v7596_v55 = vld [vmem:[#allocation2 + $0x130] sm:$0xff]  ;;  %v7602_v50 = vld [vmem:[#allocation2 + $0x138] sm:$0xff] }
 0x19f   : > { %v1238_v46 = vmax.f32 %v1173_v18, %v7513_v57  ;;  %v1175_v11 = vmax.f32 %v1111_v16, %v7513_v57  ;;  %v1801_v8 = vsel %vm979_vm10, %v1767_v12, -inf  ;;  %v1302_v28 = vmax.f32 %v1237_v1, %v7573_v9  ;;  %v7598_v57 = vld [vmem:[#allocation2 + $0x30] sm:$0xff] }
 0x1a0   : > { %v1699_v29 = vmax.f32 %v1566_v36, %v1618_v35  ;;  %v1700_v30 = vmax.f32 %v1567_v5, %v1668_v49  ;;  %v7589_v45 = vld [vmem:[#allocation2 + $0xe8] sm:$0xff]  ;;  %v1239_v38 = vmax.f32 %v1174_v62, %v7573_v9  ;;  %v7716_v0 = vmax.f32 %v6933_v53, %v7580_v59 }
 0x1a1   : > { %v1303_v36 = vmax.f32 %v1238_v46, %v7577_v63  ;;  %v7593_v35 = vld [vmem:[#allocation2 + $0xe0] sm:$0xff]  ;;  %v1240_v48 = vmax.f32 %v1175_v11, %v7577_v63  ;;  %v1320_v1 = vrot.slane %v1302_v28, 6  ;;  %v1453_v23 = vrot.slane %v1302_v28, 7 }
 0x1a2   : > { %v1832_v14 = vmax.f32 %v1699_v29, %v1751_v61  ;;  %v1833_v5 = vmax.f32 %v1700_v30, %v1801_v8  ;;  %v1586_v13 = vrot.slane %v1302_v28, 1  ;;  %v1719_v18 = vrot.slane %v1302_v28, 2 }
 0x1a3   : > { %v1336_v61 = vrot.slane %v1303_v36, 6  ;;  %v1469_v12 = vrot.slane %v1303_v36, 7  ;;  %v7606_v62 = vmax.f32 %v2609_v19, %v7589_v45  ;;  %v1602_v29 = vrot.slane %v1303_v36, 1 }
 0x1a4   : > { %5756 = vmatprep.mubr.msk.f32.mxu1 %vm937_vm1, %v1832_v14  ;;  %2514 = vst.msk [vmem:[#allocation2 + $0xf0] sm:$0xff] %vm937_vm1, %v1832_v14  ;;  %v1735_v49 = vrot.slane %v1303_v36, 2  ;;  %v7611_v46 = vmax.f32 %v2608_v33, %v7593_v35  ;;  %v7614_v11 = vmax.f32 %v1239_v38, %v7596_v55  ;;  %2515 = vst.msk [vmem:[#allocation2 + $0xf8] sm:$0xff] %vm937_vm1, %v1833_v5 }
 0x1a5   : > { %5757 = vmatmul.mubr.msk.f32.gmra.mxu1 %vm937_vm1, %v1833_v5  ;;  %v1369_v30 = vsel %vm1338_vm3, %v1336_v61, %v1320_v1  ;;  %v1502_v19 = vsel %vm1471_vm4, %v1469_v12, %v1453_v23  ;;  %v1353_v8 = vsel %vm1338_vm3, %v1320_v1, %v1336_v61  ;;  %v7624_v14 = vmax.f32 %v1240_v48, %v7602_v50 }
 0x1a6   : > { %v1403_v33 = vsel %vm952_vm5, %v1369_v30, -inf  ;;  %v1619_v38 = vsel %vm1604_vm7, %v1586_v13, %v1602_v29  ;;  %v1436_v51 = vmax.f32 %v1303_v36, %v1353_v8  ;;  %v2610_v5 = vmax.f32 %v7530_v24, %v7593_v35 }
 0x1a7   : > { %v1435_v3 = vmax.f32 %v1302_v28, %v1403_v33  ;;  %v1486_v39 = vsel %vm1471_vm4, %v1453_v23, %v1469_v12  ;;  %v1635_v1 = vsel %vm1604_vm7, %v1602_v29, %v1586_v13  ;;  %v1768_v48 = vsel %vm1737_vm8, %v1735_v49, %v1719_v18 }
 0x1a8   : > { %v1536_v61 = vsel %vm960_vm6, %v1502_v19, -inf  ;;  %v1569_v30 = vmax.f32 %v1436_v51, %v1486_v39  ;;  %v1670_v36 = vsel %vm971_vm9, %v1635_v1, -inf  ;;  %v9951_v8 = vrot.slane %v7614_v11, 6 }
 0x1a9   : > { %v1568_v24 = vmax.f32 %v1435_v3, %v1536_v61  ;;  %v9952_v28 = vrot.slane %v7624_v14, 6  ;;  %v9947_v23 = vrot.slane %v7614_v11, 7  ;;  %v9950_v12 = vrot.slane %v7624_v14, 7 }
 0x1aa   : > { %v1702_v13 = vmax.f32 %v1569_v30, %v1670_v36  ;;  %v1803_v29 = vsel %vm979_vm10, %v1768_v48, -inf  ;;  %v9946_v33 = vrot.slane %v7614_v11, 1  ;;  %v9944_v39 = vrot.slane %v7614_v11, 2 }
 0x1ab   : > { %v1701_v51 = vmax.f32 %v1568_v24, %v1619_v38  ;;  %v1370_v3 = vsel %vm1338_vm3, %v9952_v28, %v9951_v8  ;;  %v1503_v19 = vsel %vm1471_vm4, %v9950_v12, %v9947_v23  ;;  %v9945_v1 = vrot.slane %v7624_v14, 1  ;;  %v7663_v48 = vld [vmem:[#allocation2 + $0xf0] sm:$0xff]  ;;  %v7670_v24 = vld [vmem:[#allocation2 + $0x48] sm:$0xff] }
 0x1ac   : > { %9987 = vst [vmem:[#allocation7_spill] sm:$0xff] %v7663_v48  ;;  %v1752_v38 = vsel %vm1737_vm8, %v1719_v18, %v1735_v49  ;;  %v1835_v61 = vmax.f32 %v1702_v13, %v1803_v29  ;;  %v1405_v30 = vsel %vm952_vm5, %v1370_v3, -inf  ;;  %v9943_v36 = vrot.slane %v7624_v14, 2  ;;  %v7681_v49 = vld [vmem:[#allocation2 + $0xf8] sm:$0xff] }
 0x1ad   : > { %v1834_v58 = vmax.f32 %v1701_v51, %v1752_v38  ;;  %v1437_v4 = vmax.f32 %v7614_v11, %v1405_v30  ;;  %v1538_v27 = vsel %vm960_vm6, %v1503_v19, -inf  ;;  %v1620_v18 = vsel %vm1604_vm7, %v9946_v33, %v9945_v1  ;;  %9988 = vst [vmem:[#allocation8_spill] sm:$0xff] %v7681_v49  ;;  %v2685_v13 = vld [vmem:[#allocation2 + $0x58] sm:$0xff] }
 0x1ae   : > { %2517 = vst.msk [vmem:[#allocation2 + $0x108] sm:$0xff] %vm937_vm1, %v1835_v61  ;;  %v1753_v29 = vsel %vm1737_vm8, %v9944_v39, %v9943_v36  ;;  %v2612_v51 = vmax.f32 %v7593_v35, %v7663_v48  ;;  %v7693_v3 = vmax.f32 %v2610_v5, %v7663_v48  ;;  %v2736_v19 = vmax.f32 %v7611_v46, %v7663_v48 }
 0x1af   : > { %5759 = vmatprep.mubr.msk.f32.mxu1 %vm937_vm1, %v1834_v58  ;;  %2516 = vst.msk [vmem:[#allocation2 + $0x100] sm:$0xff] %vm937_vm1, %v1834_v58  ;;  %v1570_v38 = vmax.f32 %v1437_v4, %v1538_v27  ;;  %v2652_v30 = vmax.f32 %v2588_v43, %v7580_v59  ;;  %v2653_v35 = vmax.f32 %v2589_v41, %v7670_v24  ;;  %v7726_v41 = vld [vmem:[#allocation2] sm:$0xff]  ;;  %v7728_v58 = vld [vmem:[#allocation2 + $0x10] sm:$0xff]  ;;  %v3064_v12 = vrot.slane %v7716_v0, 1 }
 0x1b0   : > { %v2714_v5 = vmax.f32 %v6925_v54, %v7580_v59  ;;  %5760 = vmatmul.mubr.msk.f32.gmra.mxu1 %vm937_vm1, %v1835_v61  ;;  %v2737_v46 = vmax.f32 %v7606_v62, %v7681_v49  ;;  %v2715_v27 = vmax.f32 %v6940_v47, %v7670_v24  ;;  %v7720_v17 = vmax.f32 %v7105_v2, %v7670_v24  ;;  %v7730_v47 = vld [vmem:[#allocation2 + $0x38] sm:$0xff] }
 0x1b1   : > { %v1703_v52 = vmax.f32 %v1570_v38, %v1620_v18  ;;  %v2716_v7 = vmax.f32 %v2652_v30, %v7127_v20  ;;  %v2717_v43 = vmax.f32 %v2653_v35, %v2685_v13  ;;  %v2808_v2 = vrot.slane %v7716_v0, 6 }
 0x1b2   : > { %v7724_v54 = vmax.f32 %v2714_v5, %v7127_v20  ;;  %v7734_v4 = vmax.f32 %v2715_v27, %v2685_v13  ;;  %v2824_v62 = vrot.slane %v7720_v17, 6 }
 0x1b3   : > { %v1836_v61 = vmax.f32 %v1703_v52, %v1753_v29  ;;  %v7739_v18 = vmax.f32 %v2716_v7, %v7116_v10  ;;  %v7742_v20 = vmax.f32 %v2717_v43, %v7175_v26 }
 0x1b4   : > { %v2809_v38 = vrot.slane %v7724_v54, 6  ;;  %v2825_v30 = vrot.slane %v7734_v4, 6  ;;  %v2840_v35 = vsel %vm1338_vm3, %v2808_v2, %v2824_v62  ;;  %v2856_v13 = vsel %vm1338_vm3, %v2824_v62, %v2808_v2 }
 0x1b5   : > { %v7752_v29 = vld [vmem:[#allocation2 + $0x108] sm:$0xff]  ;;  %5762 = vmatprep.mubr.msk.f32.mxu1 %vm937_vm1, %v1836_v61  ;;  %2518 = vst.msk [vmem:[#allocation2 + $0x110] sm:$0xff] %vm937_vm1, %v1836_v61  ;;  %v2810_v10 = vrot.slane %v7739_v18, 6  ;;  %v2826_v26 = vrot.slane %v7742_v20, 6  ;;  %v2872_v27 = vsel %vm952_vm5, %v2856_v13, -inf  ;;  %v2905_v52 = vmax.f32 %v7720_v17, %v2840_v35 }
 0x1b6   : > { %v2768_v7 = vld [vmem:[#allocation2 + $0x100] sm:$0xff]  ;;  %v7762_v43 = vmax.f32 %v2737_v46, %v7752_v29  ;;  %v2904_v2 = vmax.f32 %v7716_v0, %v2872_v27  ;;  %v2936_v62 = vrot.slane %v7716_v0, 7  ;;  %v2937_v15 = vrot.slane %v7724_v54, 7 }
 0x1b7   : > { %v2614_v61 = vmax.f32 %v7663_v48, %v2768_v7  ;;  %v7768_v5 = vmax.f32 %v2736_v19, %v2768_v7  ;;  %v2841_v53 = vsel %vm1338_vm3, %v2809_v38, %v2825_v30  ;;  %v2857_v35 = vsel %vm1338_vm3, %v2825_v30, %v2809_v38 }
 0x1b8   : > { %9989 = vst [vmem:[#allocation9_spill] sm:$0xff] %v7762_v43  ;;  %v2676_v13 = vmax.f32 %v2612_v51, %v2768_v7  ;;  %v2738_v46 = vmax.f32 %v7693_v3, %v2768_v7  ;;  %v9948_v16 = vrot.slane %v7762_v43, 6  ;;  %v2842_v27 = vsel %vm1338_vm3, %v2810_v10, %v2826_v26 }
 0x1b9   : > { %9990 = vst [vmem:[#allocation10_spill] sm:$0xff] %v7768_v5  ;;  %v9949_v36 = vrot.slane %v7768_v5, 6  ;;  %v2858_v1 = vsel %vm1338_vm3, %v2826_v26, %v2810_v10  ;;  %v2874_v3 = vsel %vm952_vm5, %v2857_v35, -inf  ;;  %v2907_v10 = vmax.f32 %v7734_v4, %v2841_v53 }
 0x1ba   : > { %v2876_v38 = vsel %vm952_vm5, %v2858_v1, -inf  ;;  %v2909_v26 = vmax.f32 %v7742_v20, %v2842_v27  ;;  %v2938_v7 = vrot.slane %v7739_v18, 7  ;;  %v2952_v1 = vrot.slane %v7720_v17, 7 }
 0x1bb   : > { %v7795_v30 = vsel %vm1338_vm3, %v9949_v36, %v9948_v16  ;;  %v2953_v19 = vrot.slane %v7734_v4, 7  ;;  %v2954_v33 = vrot.slane %v7742_v20, 7  ;;  %v2906_v16 = vmax.f32 %v7724_v54, %v2874_v3 }
 0x1bc   : > { %9991 = vst [vmem:[#allocation11_spill] sm:$0xff] %v7795_v30  ;;  %v2646_v51 = vld [vmem:[#allocation2 + $0x110] sm:$0xff]  ;;  %v2908_v53 = vmax.f32 %v7739_v18, %v2876_v38  ;;  %v2968_v27 = vsel %vm1471_vm4, %v2936_v62, %v2952_v1  ;;  %v2984_v35 = vsel %vm1471_vm4, %v2952_v1, %v2936_v62 }
 0x1bd   : > { %v2678_v39 = vmax.f32 %v2614_v61, %v2646_v51  ;;  %v2740_v23 = vmax.f32 %v2676_v13, %v2646_v51  ;;  %v7807_v36 = vmax.f32 %v2738_v46, %v2646_v51  ;;  %v2969_v61 = vsel %vm1471_vm4, %v2937_v15, %v2953_v19 }
 0x1be   : > { %v2970_v13 = vsel %vm1471_vm4, %v2938_v7, %v2954_v33  ;;  %v2985_v46 = vsel %vm1471_vm4, %v2953_v19, %v2937_v15  ;;  %v2986_v3 = vsel %vm1471_vm4, %v2954_v33, %v2938_v7  ;;  %v3000_v62 = vsel %vm960_vm6, %v2984_v35, -inf }
 0x1bf   : > { %v2742_v8 = vmax.f32 %v2678_v39, %v7573_v9  ;;  %v7822_v51 = vmax.f32 %v2740_v23, %v7573_v9  ;;  %v3033_v38 = vmax.f32 %v2905_v52, %v2968_v27  ;;  %v3002_v1 = vsel %vm960_vm6, %v2985_v46, -inf  ;;  %v6185_v9 = vld [vmem:[#allocation2 + $0x68] sm:$0xff] }
 0x1c0   : > { %v3004_v28 = vsel %vm960_vm6, %v2986_v3, -inf  ;;  %v3032_v15 = vmax.f32 %v2904_v2, %v3000_v62  ;;  %v3034_v23 = vmax.f32 %v2906_v16, %v3002_v1  ;;  %v3035_v19 = vmax.f32 %v2907_v10, %v2969_v61 }
 0x1c1   : > { %v7829_v39 = vmax.f32 %v2742_v8, %v7596_v55  ;;  %v3036_v30 = vmax.f32 %v2908_v53, %v3004_v28  ;;  %v3065_v33 = vrot.slane %v7724_v54, 1  ;;  %v3066_v7 = vrot.slane %v7739_v18, 1 }
 0x1c2   : > { %v3080_v52 = vrot.slane %v7720_v17, 1  ;;  %v3081_v55 = vrot.slane %v7734_v4, 1  ;;  %v3037_v8 = vmax.f32 %v2909_v26, %v2970_v13  ;;  %v3082_v35 = vrot.slane %v7742_v20, 1 }
 0x1c3   : > { %v3192_v27 = vrot.slane %v7716_v0, 2  ;;  %v3193_v2 = vrot.slane %v7724_v54, 2  ;;  %v3194_v53 = vrot.slane %v7739_v18, 2  ;;  %v10011_v37 = vrot.slane %v7829_v39, 6 }
 0x1c4   : > { %v3096_v16 = vsel %vm1604_vm7, %v3064_v12, %v3080_v52  ;;  %v3112_v28 = vsel %vm1604_vm7, %v3080_v52, %v3064_v12  ;;  %v3113_v10 = vsel %vm1604_vm7, %v3081_v55, %v3065_v33  ;;  %v3097_v26 = vsel %vm1604_vm7, %v3065_v33, %v3081_v55 }
 0x1c5   : > { %v3098_v61 = vsel %vm1604_vm7, %v3066_v7, %v3082_v35  ;;  %v3114_v0 = vsel %vm1604_vm7, %v3082_v35, %v3066_v7  ;;  %v3129_v54 = vsel %vm971_vm9, %v3112_v28, -inf  ;;  %v3131_v12 = vsel %vm971_vm9, %v3113_v10, -inf }
 0x1c6   : > { %v3133_v13 = vsel %vm971_vm9, %v3114_v0, -inf  ;;  %v3160_v46 = vmax.f32 %v3032_v15, %v3096_v16  ;;  %v3161_v18 = vmax.f32 %v3033_v38, %v3129_v54  ;;  %v3162_v3 = vmax.f32 %v3034_v23, %v3097_v26 }
 0x1c7   : > { %v3163_v62 = vmax.f32 %v3035_v19, %v3131_v12  ;;  %v3164_v1 = vmax.f32 %v3036_v30, %v3098_v61  ;;  %v3208_v33 = vrot.slane %v7720_v17, 2  ;;  %v3165_v52 = vmax.f32 %v3037_v8, %v3133_v13 }
 0x1c8   : > { %v3209_v55 = vrot.slane %v7734_v4, 2  ;;  %v3210_v7 = vrot.slane %v7742_v20, 2  ;;  %v9992_v35 = vrot.slane %v7624_v14, 6  ;;  %v9993_v28 = vrot.slane %v7614_v11, 6 }
 0x1c9   : > { %v3224_v38 = vsel %vm1737_vm8, %v3192_v27, %v3208_v33  ;;  %v3240_v30 = vsel %vm1737_vm8, %v3208_v33, %v3192_v27  ;;  %v9994_v15 = vrot.slane %v7624_v14, 7  ;;  %v9995_v4 = vrot.slane %v7614_v11, 7  ;;  %v3710_v33 = vld [vmem:[#allocation2 + $0x8] sm:$0xff] }
 0x1ca   : > { %v1354_v10 = vsel %vm1338_vm3, %v9993_v28, %v9992_v35  ;;  %v3225_v23 = vsel %vm1737_vm8, %v3193_v2, %v3209_v55  ;;  %v3226_v19 = vsel %vm1737_vm8, %v3194_v53, %v3210_v7  ;;  %v3241_v8 = vsel %vm1737_vm8, %v3209_v55, %v3193_v2 }
 0x1cb   : > { %v1438_v17 = vmax.f32 %v7624_v14, %v1354_v10  ;;  %v1487_v20 = vsel %vm1471_vm4, %v9995_v4, %v9994_v15  ;;  %v3242_v27 = vsel %vm1737_vm8, %v3210_v7, %v3194_v53  ;;  %v3257_v16 = vsel %vm979_vm10, %v3240_v30, -inf  ;;  %v7904_v53 = vld [vmem:[#allocation2 + $0x18] sm:$0xff] }
 0x1cc   : > { %v3259_v26 = vsel %vm979_vm10, %v3241_v8, -inf  ;;  %v3261_v61 = vsel %vm979_vm10, %v3242_v27, -inf  ;;  %v3288_v0 = vmax.f32 %v3160_v46, %v3224_v38  ;;  %v7896_v54 = vmax.f32 %v3161_v18, %v3257_v16 }
 0x1cd   : > { %v7898_v12 = vmax.f32 %v3162_v3, %v3225_v23  ;;  %v7900_v13 = vmax.f32 %v3163_v62, %v3259_v26  ;;  %v7902_v2 = vmax.f32 %v3164_v1, %v3226_v19  ;;  %v7906_v55 = vmax.f32 %v3165_v52, %v3261_v61  ;;  %v2560_v23 = vld [vmem:[#allocation2 + $0x50] sm:$0xff]  ;;  %v7956_v26 = vld [vmem:[#allocation2 + $0x68] sm:$0xff] }
 0x1ce   : > { %3677 = vst.msk [vmem:[#allocation2 + $0x20] sm:$0xff] %vm937_vm1, %v3288_v0  ;;  %v1571_v7 = vmax.f32 %v1438_v17, %v1487_v20  ;;  %v9996_v35 = vrot.slane %v7614_v11, 1  ;;  %v9997_v46 = vrot.slane %v7624_v14, 1  ;;  %v9998_v3 = vrot.slane %v7614_v11, 2  ;;  %3678 = vst.msk [vmem:[#allocation2 + $0x28] sm:$0xff] %vm937_vm1, %v7896_v54  ;;  %v7951_v20 = vld [vmem:[#allocation2 + $0x58] sm:$0xff] }
 0x1cf   : > { %v9999_v62 = vrot.slane %v7624_v14, 2  ;;  %3679 = vst.msk [vmem:[#allocation2 + $0x30] sm:$0xff] %vm937_vm1, %v7898_v12  ;;  %3680 = vst.msk [vmem:[#allocation2 + $0x38] sm:$0xff] %vm937_vm1, %v7900_v13  ;;  %v2611_v14 = vmax.f32 %v7532_v42, %v7589_v45  ;;  %v2613_v28 = vmax.f32 %v7589_v45, %v7681_v49  ;;  %v3774_v10 = vmax.f32 %v3710_v33, %v7904_v53 }
 0x1d0   : > { %v1636_v18 = vsel %vm1604_vm7, %v9997_v46, %v9996_v35  ;;  %3681 = vst.msk [vmem:[#allocation2 + $0x40] sm:$0xff] %vm937_vm1, %v7902_v2  ;;  %3682 = vst.msk [vmem:[#allocation2 + $0x48] sm:$0xff] %vm937_vm1, %v7906_v55  ;;  %v2615_v17 = vmax.f32 %v7681_v49, %v7752_v29  ;;  %v7963_v46 = vld [vmem:[#allocation2 + $0x88] sm:$0xff]  ;;  %v10005_v33 = vrot.slane %v7368_v32, 6  ;;  %v10012_v25 = vmov %v10011_v37 }
 0x1d1   : > { %v1769_v1 = vsel %vm1737_vm8, %v9999_v62, %v9998_v3  ;;  %v1672_v11 = vsel %vm971_vm9, %v1636_v18, -inf  ;;  %v7944_v15 = vmax.f32 %v2611_v14, %v7681_v49  ;;  %v7947_v42 = vmax.f32 %v2613_v28, %v7752_v29  ;;  %10000 = vst [vmem:[#allocation12_spill] sm:$0xff] %v7963_v46  ;;  %v2624_v3 = vld [vmem:[#allocation2 + $0x60] sm:$0xff] }
 0x1d2   : > { %v1704_v38 = vmax.f32 %v1571_v7, %v1672_v11  ;;  %v1805_v30 = vsel %vm979_vm10, %v1769_v1, -inf  ;;  %v10001_v62 = vmax.f32 %v7598_v57, %v7580_v59  ;;  %v10002_v11 = vmax.f32 %v7730_v47, %v7670_v24  ;;  %v7984_v57 = vld [vmem:[#allocation2 + $0x78] sm:$0xff] }
 0x1d3   : > { %v2739_v61 = vmax.f32 %v7944_v15, %v7752_v29  ;;  %v10003_v47 = vmax.f32 %v7726_v41, %v7728_v58 }
 0x1d4   : > { %v1837_v19 = vmax.f32 %v1704_v38, %v1805_v30  ;;  %v2654_v1 = vmax.f32 %v10001_v62, %v2560_v23  ;;  %v2655_v14 = vmax.f32 %v10002_v11, %v7951_v20  ;;  %v2592_v38 = vmax.f32 %v7580_v59, %v2560_v23 }
 0x1d5   : > { %v7976_v28 = vld [vmem:[#allocation2 + $0x20] sm:$0xff]  ;;  %v2593_v30 = vmax.f32 %v7670_v24, %v7951_v20  ;;  %v7987_v52 = vld [vmem:[#allocation2 + $0x28] sm:$0xff] }
 0x1d6   : > { %5763 = vmatmul.mubr.msk.f32.gmra.mxu1 %vm937_vm1, %v1837_v19  ;;  %2519 = vst.msk [vmem:[#allocation2 + $0x118] sm:$0xff] %vm937_vm1, %v1837_v19  ;;  %v7993_v11 = vld [vmem:[#allocation2 + $0x30] sm:$0xff]  ;;  %v7995_v59 = vld [vmem:[#allocation2 + $0x38] sm:$0xff]  ;;  %v6184_v24 = vld [vmem:[#allocation2 + $0x60] sm:$0xff]  ;;  %v2719_v19 = vmax.f32 %v2655_v14, %v6185_v9  ;;  %v3838_v62 = vmax.f32 %v3774_v10, %v7987_v52  ;;  %v3775_v7 = vmax.f32 %v7728_v58, %v7976_v28 }
 0x1d7   : > { %5817 = vmatprep.mubr.msk.f32.mxu1 %vm937_vm1, %v3288_v0  ;;  %v3837_v0 = vmax.f32 %v10003_v47, %v7976_v28  ;;  %v2718_v23 = vmax.f32 %v2654_v1, %v6184_v24  ;;  %v8000_v35 = vld [vmem:[#allocation2 + $0x40] sm:$0xff]  ;;  %v3776_v41 = vmax.f32 %v7904_v53, %v7987_v52  ;;  %v10004_v47 = vrot.slane %v7372_v44, 6  ;;  %v8015_v14 = vld [vmem:[#allocation2 + $0x48] sm:$0xff]  ;;  %v8017_v10 = vld [vmem:[#allocation2 + $0x70] sm:$0xff] }
 0x1d8   : > { %v8022_v58 = vld [vmem:[#allocation2 + $0x78] sm:$0xff]  ;;  %v8029_v18 = vmax.f32 %v2592_v38, %v2624_v3 }
 0x1d9   : > { %v8012_v9 = vsel %vm1338_vm3, %v10005_v33, %v10004_v47  ;;  %v3901_v1 = vmax.f32 %v3837_v0, %v7993_v11  ;;  %v8020_v24 = vmax.f32 %v2718_v23, %v8017_v10  ;;  %v8025_v53 = vmax.f32 %v2719_v19, %v8022_v58 }
 0x1da   : > { %5818 = vmatmul.mubr.msk.f32.vlgmr.msra.gmra.mxu1 %vm937_vm1, %v7896_v54  ;;  %v3902_v33 = vmax.f32 %v3838_v62, %v7995_v59  ;;  %v8033_v0 = vmax.f32 %v3775_v7, %v7993_v11  ;;  %v8036_v47 = vmax.f32 %v3776_v41, %v7995_v59  ;;  %v8041_v23 = vmax.f32 %v2593_v30, %v7956_v26 }
 0x1db   : > { %5820 = vmatprep.mubr.msk.f32.mxu1 %vm937_vm1, %v7898_v12  ;;  %v8044_v19 = vmax.f32 %v3901_v1, %v8000_v35  ;;  %v9955_v54 = vrot.slane %v8020_v24, 6  ;;  %v9954_v3 = vrot.slane %v8025_v53, 6 }
 0x1dc   : > { %v8050_v7 = vmax.f32 %v3902_v33, %v8015_v14 }
 0x1dd   : > { %v2647_v62 = vld [vmem:[#allocation2 + $0x118] sm:$0xff]  ;;  %v3997_v16 = vrot.slane %v8044_v19, 6  ;;  %v9956_v1 = vrot.slane %v8044_v19, 7  ;;  %v4253_v8 = vrot.slane %v8044_v19, 1  ;;  %v4381_v4 = vrot.slane %v8044_v19, 2 }
 0x1de   : > { %5821 = vmatmul.mubr.msk.f32.gmra.mxu1 %vm937_vm1, %v7900_v13  ;;  %v4013_v33 = vrot.slane %v8050_v7, 6  ;;  %v9957_v38 = vrot.slane %v8050_v7, 7  ;;  %v4269_v41 = vrot.slane %v8050_v7, 1  ;;  %v4397_v12 = vrot.slane %v8050_v7, 2 }
 0x1df   : > { %5823 = vmatprep.mubr.msk.f32.mxu1 %vm937_vm1, %v7902_v2  ;;  %v2679_v30 = vmax.f32 %v2615_v17, %v2647_v62  ;;  %v2741_v27 = vmax.f32 %v7947_v42, %v2647_v62  ;;  %v8074_v13 = vmax.f32 %v2739_v61, %v2647_v62  ;;  %v8082_v45 = vsel %vm1338_vm3, %v9955_v54, %v9954_v3 }
 0x1e0   : > { %v4045_v2 = vsel %vm1338_vm3, %v4013_v33, %v3997_v16  ;;  %v4173_v29 = vsel %vm1471_vm4, %v9957_v38, %v9956_v1  ;;  %v4285_v17 = vsel %vm1604_vm7, %v4253_v8, %v4269_v41  ;;  %v8096_v15 = vsel %vm1604_vm7, %v4269_v41, %v4253_v8 }
 0x1e1   : > { %v4061_v42 = vsel %vm952_vm5, %v4045_v2, -inf  ;;  %v4189_v61 = vsel %vm960_vm6, %v4173_v29, -inf  ;;  %v4413_v62 = vsel %vm1737_vm8, %v4381_v4, %v4397_v12  ;;  %v8106_v3 = vsel %vm1737_vm8, %v4397_v12, %v4381_v4 }
 0x1e2   : > { %5824 = vmatmul.mubr.msk.f32.gmra.mxu1 %vm937_vm1, %v7906_v55  ;;  %v4093_v54 = vmax.f32 %v8044_v19, %v4061_v42  ;;  %v2743_v8 = vmax.f32 %v2679_v30, %v7577_v63  ;;  %v8113_v41 = vmax.f32 %v2741_v27, %v7577_v63  ;;  %v2837_v2 = vrot.slane %v8074_v13, 6 }
 0x1e3   : > { %v2965_v29 = vrot.slane %v8074_v13, 7  ;;  %v3093_v1 = vrot.slane %v8074_v13, 1  ;;  %v8121_v4 = vsel %vm1338_vm3, %v3997_v16, %v4013_v33  ;;  %v10006_v63 = vrot.slane %v7807_v36, 6 }
 0x1e4   : > { %v4221_v55 = vmax.f32 %v4093_v54, %v4189_v61  ;;  %v8124_v12 = vmax.f32 %v2743_v8, %v7602_v50  ;;  %v2838_v30 = vrot.slane %v8113_v41, 6  ;;  %v2966_v16 = vrot.slane %v8113_v41, 7 }
 0x1e5   : > { %v2853_v27 = vsel %vm1338_vm3, %v10006_v63, %v2837_v2  ;;  %v10007_v42 = vmov %v10006_v63  ;;  %v10008_v54 = vrot.slane %v7807_v36, 7  ;;  %v10009_v8 = vrot.slane %v7822_v51, 6 }
 0x1e6   : > { %v2869_v38 = vsel %vm1338_vm3, %v2837_v2, %v10007_v42  ;;  %v2931_v49 = vmax.f32 %v8074_v13, %v2853_v27  ;;  %v4349_v33 = vmax.f32 %v4221_v55, %v4285_v17  ;;  %v2839_v61 = vrot.slane %v8124_v12, 6 }
 0x1e7   : > { %v2981_v50 = vsel %vm1471_vm4, %v10008_v54, %v2965_v29  ;;  %v2854_v63 = vsel %vm1338_vm3, %v10009_v8, %v2838_v30  ;;  %v10010_v48 = vmov %v10009_v8  ;;  %v2898_v27 = vsel %vm952_vm5, %v2869_v38, -inf }
 0x1e8   : > { %v2870_v2 = vsel %vm1338_vm3, %v2838_v30, %v10010_v48  ;;  %v2933_v17 = vmax.f32 %v8113_v41, %v2854_v63  ;;  %v2967_v55 = vrot.slane %v8124_v12, 7  ;;  %v4477_v54 = vmax.f32 %v4349_v33, %v4413_v62 }
 0x1e9   : > { %v2900_v42 = vsel %vm952_vm5, %v2870_v2, -inf  ;;  %v2855_v8 = vsel %vm1338_vm3, %v10011_v37, %v2839_v61  ;;  %v2871_v48 = vsel %vm1338_vm3, %v2839_v61, %v10012_v25  ;;  %v2930_v38 = vmax.f32 %v7807_v36, %v2898_v27 }
 0x1ea   : > { %v2902_v30 = vsel %vm952_vm5, %v2871_v48, -inf  ;;  %v2932_v63 = vmax.f32 %v7822_v51, %v2900_v42  ;;  %v2935_v2 = vmax.f32 %v8124_v12, %v2855_v8  ;;  %v10013_v62 = vrot.slane %v7822_v51, 7  ;;  %5867 = vmatprep.mubr.msk.f32.mxu0 %vm937_vm1, %v4477_v54 }
 0x1eb   : > { %v2934_v37 = vmax.f32 %v7829_v39, %v2902_v30  ;;  %v10014_v25 = vrot.slane %v7829_v39, 7  ;;  %v10015_v27 = vrot.slane %v7807_v36, 7  ;;  %v3059_v6 = vmax.f32 %v2931_v49, %v2981_v50 }
 0x1ec   : > { %v2982_v33 = vsel %vm1471_vm4, %v10013_v62, %v2966_v16  ;;  %v10016_v8 = vmov %v10013_v62  ;;  %v3095_v40 = vrot.slane %v8124_v12, 1  ;;  %v3222_v50 = vrot.slane %v8113_v41, 2 }
 0x1ed   : > { %v2983_v61 = vsel %vm1471_vm4, %v10014_v25, %v2967_v55  ;;  %v2997_v42 = vsel %vm1471_vm4, %v2965_v29, %v10015_v27  ;;  %v2998_v48 = vsel %vm1471_vm4, %v2966_v16, %v10016_v8  ;;  %v10017_v62 = vmov %v10014_v25 }
 0x1ee   : > { %v2999_v54 = vsel %vm1471_vm4, %v2967_v55, %v10017_v62  ;;  %v3026_v30 = vsel %vm960_vm6, %v2997_v42, -inf  ;;  %v3028_v25 = vsel %vm960_vm6, %v2998_v48, -inf  ;;  %v3061_v5 = vmax.f32 %v2933_v17, %v2982_v33 }
 0x1ef   : > { %v3030_v29 = vsel %vm960_vm6, %v2999_v54, -inf  ;;  %v3058_v27 = vmax.f32 %v2930_v38, %v3026_v30  ;;  %v3060_v43 = vmax.f32 %v2932_v63, %v3028_v25  ;;  %v3063_v16 = vmax.f32 %v2935_v2, %v2983_v61 }
 0x1f0   : > { %v3062_v46 = vmax.f32 %v2934_v37, %v3030_v29  ;;  %v3094_v8 = vrot.slane %v8113_v41, 1  ;;  %v10018_v55 = vrot.slane %v7807_v36, 1  ;;  %v3223_v17 = vrot.slane %v8124_v12, 2 }
 0x1f1   : > { %v10020_v38 = vrot.slane %v7822_v51, 1  ;;  %v10021_v2 = vrot.slane %v7829_v39, 1 }
 0x1f2   : > { %v3109_v42 = vsel %vm1604_vm7, %v10018_v55, %v3093_v1  ;;  %v10019_v48 = vmov %v10018_v55 }
 0x1f3   : > { %v3125_v49 = vsel %vm1604_vm7, %v3093_v1, %v10019_v48  ;;  %v3110_v63 = vsel %vm1604_vm7, %v10020_v38, %v3094_v8  ;;  %v3111_v33 = vsel %vm1604_vm7, %v10021_v2, %v3095_v40  ;;  %v10022_v37 = vmov %v10020_v38 }
 0x1f4   : > { %v3126_v61 = vsel %vm1604_vm7, %v3094_v8, %v10022_v37  ;;  %v10023_v1 = vmov %v10021_v2  ;;  %v3155_v12 = vsel %vm971_vm9, %v3125_v49, -inf  ;;  %v3186_v30 = vmax.f32 %v3058_v27, %v3109_v42 }
 0x1f5   : > { %v3127_v41 = vsel %vm1604_vm7, %v3095_v40, %v10023_v1  ;;  %v3157_v62 = vsel %vm971_vm9, %v3126_v61, -inf  ;;  %v3187_v25 = vmax.f32 %v3059_v6, %v3155_v12  ;;  %v3188_v29 = vmax.f32 %v3060_v43, %v3110_v63 }
 0x1f6   : > { %v3159_v54 = vsel %vm971_vm9, %v3127_v41, -inf  ;;  %v3189_v55 = vmax.f32 %v3061_v5, %v3157_v62  ;;  %v3190_v48 = vmax.f32 %v3062_v46, %v3111_v33  ;;  %v10024_v38 = vrot.slane %v8074_v13, 2 }
 0x1f7   : > { %v3191_v8 = vmax.f32 %v3063_v16, %v3159_v54  ;;  %v10025_v2 = vrot.slane %v7807_v36, 2  ;;  %v10026_v49 = vrot.slane %v7822_v51, 2  ;;  %v10027_v61 = vrot.slane %v7829_v39, 2 }
 0x1f8   : > { %v10029_v43 = vmov %v10024_v38  ;;  %v4094_v12 = vmax.f32 %v8050_v7, %v8121_v4  ;;  %v10032_v62 = vrot.slane %v8050_v7, 7  ;;  %v10033_v54 = vrot.slane %v8044_v19, 7 }
 0x1f9   : > { %v3237_v40 = vsel %vm1737_vm8, %v10025_v2, %v10024_v38  ;;  %v3238_v37 = vsel %vm1737_vm8, %v10026_v49, %v3222_v50  ;;  %v3239_v6 = vsel %vm1737_vm8, %v10027_v61, %v3223_v17  ;;  %v10028_v5 = vmov %v10025_v2 }
 0x1fa   : > { %v3253_v46 = vsel %vm1737_vm8, %v10029_v43, %v10028_v5  ;;  %v10030_v27 = vmov %v10026_v49  ;;  %v10031_v42 = vmov %v10027_v61  ;;  %v8259_v33 = vmax.f32 %v3186_v30, %v3237_v40 }
 0x1fb   : > { %v3254_v16 = vsel %vm1737_vm8, %v3222_v50, %v10030_v27  ;;  %v3255_v63 = vsel %vm1737_vm8, %v3223_v17, %v10031_v42  ;;  %v3283_v36 = vsel %vm979_vm10, %v3253_v46, -inf  ;;  %v8267_v51 = vmax.f32 %v3188_v29, %v3238_v37 }
 0x1fc   : > { %v3285_v13 = vsel %vm979_vm10, %v3254_v16, -inf  ;;  %v3287_v1 = vsel %vm979_vm10, %v3255_v63, -inf  ;;  %v8269_v41 = vmax.f32 %v3187_v25, %v3283_v36  ;;  %v8273_v39 = vmax.f32 %v3190_v48, %v3239_v6  ;;  %3703 = vst.msk [vmem:[#allocation2 + $0xf0] sm:$0xff] %vm937_vm1, %v8259_v33 }
 0x1fd   : > { %v8271_v50 = vmax.f32 %v3189_v55, %v3285_v13  ;;  %v8275_v17 = vmax.f32 %v3191_v8, %v3287_v1  ;;  %3705 = vst.msk [vmem:[#allocation2 + $0x100] sm:$0xff] %vm937_vm1, %v8267_v51  ;;  %v4157_v30 = vsel %vm1471_vm4, %v10033_v54, %v10032_v62  ;;  %v2720_v25 = vmax.f32 %v8029_v18, %v8017_v10  ;;  %v6188_v1 = vld [vmem:[#allocation2 + $0x80] sm:$0xff] }
 0x1fe   : > { %v2721_v29 = vmax.f32 %v8041_v23, %v8022_v58  ;;  %3704 = vst.msk [vmem:[#allocation2 + $0xf8] sm:$0xff] %vm937_vm1, %v8269_v41  ;;  %3707 = vst.msk [vmem:[#allocation2 + $0x110] sm:$0xff] %vm937_vm1, %v8273_v39  ;;  %v4318_v19 = vsel %vm971_vm9, %v8096_v15, -inf  ;;  %v10034_v18 = vrot.slane %v8020_v24, 6  ;;  %v10035_v10 = vrot.slane %v8025_v53, 6 }
 0x1ff   : > { %3708 = vst.msk [vmem:[#allocation2 + $0x118] sm:$0xff] %vm937_vm1, %v8275_v17  ;;  %3706 = vst.msk [vmem:[#allocation2 + $0x108] sm:$0xff] %vm937_vm1, %v8271_v50  ;;  %v2911_v23 = vmax.f32 %v8025_v53, %v8082_v45  ;;  %v10036_v7 = vrot.slane %v8020_v24, 7  ;;  %v10037_v4 = vrot.slane %v8025_v53, 7  ;;  %v4222_v48 = vmax.f32 %v4094_v12, %v4157_v30 }
 0x200   : > { %v2859_v58 = vsel %vm1338_vm3, %v10035_v10, %v10034_v18  ;;  %v4446_v15 = vsel %vm979_vm10, %v8106_v3, -inf  ;;  %v10040_v37 = vrot.slane %v8020_v24, 1  ;;  %v10041_v61 = vrot.slane %v8025_v53, 1 }
 0x201   : > { %v2987_v55 = vsel %vm1471_vm4, %v10037_v4, %v10036_v7  ;;  %v2878_v8 = vsel %vm952_vm5, %v2859_v58, -inf  ;;  %v10038_v38 = vmov %v10037_v4  ;;  %v10039_v2 = vmov %v10036_v7 }
 0x202   : > { %v2971_v45 = vsel %vm1471_vm4, %v10039_v2, %v10038_v38  ;;  %v2910_v40 = vmax.f32 %v8020_v24, %v2878_v8  ;;  %v3115_v3 = vsel %vm1604_vm7, %v10041_v61, %v10040_v37  ;;  %v3195_v6 = vrot.slane %v8020_v24, 2 }
 0x203   : > { %v3039_v49 = vmax.f32 %v2911_v23, %v2971_v45  ;;  %v4350_v5 = vmax.f32 %v4222_v48, %v4318_v19  ;;  %v3006_v43 = vsel %vm960_vm6, %v2987_v55, -inf  ;;  %v3135_v46 = vsel %vm971_vm9, %v3115_v3, -inf  ;;  %v6189_v19 = vld [vmem:[#allocation2 + $0x88] sm:$0xff] }
 0x204   : > { %v3211_v27 = vrot.slane %v8025_v53, 2  ;;  %v3038_v16 = vmax.f32 %v2910_v40, %v3006_v43  ;;  %v10042_v42 = vmov %v10041_v61  ;;  %v10043_v63 = vmov %v10040_v37 }
 0x205   : > { %v3099_v36 = vsel %vm1604_vm7, %v10043_v63, %v10042_v42  ;;  %v3167_v13 = vmax.f32 %v3039_v49, %v3135_v46  ;;  %v2784_v12 = vmax.f32 %v2720_v25, %v6188_v1  ;;  %v4478_v62 = vmax.f32 %v4350_v5, %v4446_v15 }
 0x206   : > { %v3227_v54 = vsel %vm1737_vm8, %v3195_v6, %v3211_v27  ;;  %v3243_v30 = vsel %vm1737_vm8, %v3211_v27, %v3195_v6  ;;  %v2785_v18 = vmax.f32 %v2721_v29, %v6189_v19  ;;  %v3166_v10 = vmax.f32 %v3038_v16, %v3099_v36 }
 0x207   : > { %v3263_v53 = vsel %vm979_vm10, %v3243_v30, -inf  ;;  %v2812_v24 = vrot.slane %v2784_v12, 6  ;;  %v2940_v58 = vrot.slane %v2784_v12, 7  ;;  %5868 = vmatmul.mubr.msk.f32.vlgmr.msra.gmra.mxu0 %vm937_vm1, %v4478_v62  ;;  %v3068_v4 = vrot.slane %v2784_v12, 1 }
 0x208   : > { %v3295_v23 = vmax.f32 %v3167_v13, %v3263_v53  ;;  %v2828_v7 = vrot.slane %v2785_v18, 6  ;;  %v2956_v25 = vrot.slane %v2785_v18, 7  ;;  %v3294_v55 = vmax.f32 %v3166_v10, %v3227_v54 }
 0x209   : > { %v3084_v48 = vrot.slane %v2785_v18, 1  ;;  %v3196_v15 = vrot.slane %v2784_v12, 2  ;;  %v3212_v8 = vrot.slane %v2785_v18, 2  ;;  %v3903_v29 = vmax.f32 %v8033_v0, %v8000_v35 }
 0x20a   : > { %3684 = vst.msk [vmem:[#allocation2 + $0x58] sm:$0xff] %vm937_vm1, %v3295_v23  ;;  %v2844_v38 = vsel %vm1338_vm3, %v2812_v24, %v2828_v7  ;;  %v2860_v2 = vsel %vm1338_vm3, %v2828_v7, %v2812_v24  ;;  %v2988_v45 = vsel %vm1471_vm4, %v2956_v25, %v2940_v58  ;;  %3683 = vst.msk [vmem:[#allocation2 + $0x50] sm:$0xff] %vm937_vm1, %v3294_v55  ;;  %5826 = vmatprep.mubr.msk.f32.mxu1 %vm937_vm1, %v3294_v55 }
 0x20b   : > { %v3904_v40 = vmax.f32 %v8036_v47, %v8015_v14  ;;  %v2880_v49 = vsel %vm952_vm5, %v2860_v2, -inf  ;;  %v2913_v37 = vmax.f32 %v2785_v18, %v2844_v38  ;;  %v2972_v0 = vsel %vm1471_vm4, %v2940_v58, %v2956_v25  ;;  %5827 = vmatmul.mubr.msk.f32.gmra.mxu1 %vm937_vm1, %v3295_v23  ;;  %v6190_v25 = vld [vmem:[#allocation2 + $0x98] sm:$0xff] }
 0x20c   : > { %v2912_v61 = vmax.f32 %v2784_v12, %v2880_v49  ;;  %v3008_v3 = vsel %vm960_vm6, %v2988_v45, -inf  ;;  %v3116_v6 = vsel %vm1604_vm7, %v3084_v48, %v3068_v4  ;;  %v3244_v5 = vsel %vm1737_vm8, %v3212_v8, %v3196_v15 }
 0x20d   : > { %v3041_v47 = vmax.f32 %v2913_v37, %v2972_v0  ;;  %v3100_v43 = vsel %vm1604_vm7, %v3068_v4, %v3084_v48  ;;  %v3137_v46 = vsel %vm971_vm9, %v3116_v6, -inf  ;;  %v3228_v27 = vsel %vm1737_vm8, %v3196_v15, %v3212_v8 }
 0x20e   : > { %v3040_v16 = vmax.f32 %v2912_v61, %v3008_v3  ;;  %v3265_v42 = vsel %vm979_vm10, %v3244_v5, -inf  ;;  %v3777_v63 = vmax.f32 %v7976_v28, %v7993_v11  ;;  %v10044_v36 = vmax.f32 %v7951_v20, %v7956_v26 }
 0x20f   : > { %v3169_v1 = vmax.f32 %v3041_v47, %v3137_v46  ;;  %v3778_v12 = vmax.f32 %v7987_v52, %v7995_v59  ;;  %v3779_v62 = vmax.f32 %v7993_v11, %v8000_v35  ;;  %v2917_v54 = vmax.f32 %v7372_v44, %v8012_v9 }
 0x210   : > { %v2659_v13 = vmax.f32 %v10044_v36, %v7984_v57  ;;  %v3168_v30 = vmax.f32 %v3040_v16, %v3100_v43  ;;  %v3841_v18 = vmax.f32 %v3777_v63, %v8000_v35  ;;  %v3780_v28 = vmax.f32 %v7995_v59, %v8015_v14 }
 0x211   : > { %v8402_v53 = vld [vmem:[#allocation2 + $0x58] sm:$0xff]  ;;  %v3297_v20 = vmax.f32 %v3169_v1, %v3265_v42  ;;  %v3842_v26 = vmax.f32 %v3778_v12, %v8015_v14  ;;  %v10045_v52 = vrot.slane %v7372_v44, 7  ;;  %v10046_v24 = vrot.slane %v7368_v32, 7  ;;  %v8419_v59 = vld [vmem:[#allocation2 + $0x50] sm:$0xff] }
 0x212   : > { %v2723_v10 = vmax.f32 %v2659_v13, %v6189_v19  ;;  %v3968_v23 = vmax.f32 %v3904_v40, %v8402_v53  ;;  %v3296_v7 = vmax.f32 %v3168_v30, %v3228_v27  ;;  %v3967_v48 = vmax.f32 %v3903_v29, %v8419_v59 }
 0x213   : > { %v2974_v11 = vsel %vm1471_vm4, %v10046_v24, %v10045_v52  ;;  %v10047_v9 = vmov %v10046_v24  ;;  %v10048_v58 = vmov %v10045_v52  ;;  %3686 = vst.msk [vmem:[#allocation2 + $0x68] sm:$0xff] %vm937_vm1, %v3297_v20  ;;  %v3905_v15 = vmax.f32 %v3841_v18, %v8419_v59 }
 0x214   : > { %v8417_v19 = vsel %vm1471_vm4, %v10048_v58, %v10047_v9  ;;  %v8422_v4 = vmax.f32 %v2723_v10, %v6190_v25  ;;  %v8424_v55 = vmax.f32 %v2917_v54, %v2974_v11  ;;  %v3906_v8 = vmax.f32 %v3842_v26, %v8402_v53  ;;  %3685 = vst.msk [vmem:[#allocation2 + $0x60] sm:$0xff] %vm937_vm1, %v3296_v7 }
 0x215   : > { %v10049_v38 = vrot.slane %v7372_v44, 1  ;;  %v10050_v2 = vrot.slane %v7368_v32, 1  ;;  %v4014_v40 = vrot.slane %v3968_v23, 6  ;;  %v4142_v49 = vrot.slane %v3968_v23, 7  ;;  %5829 = vmatprep.mubr.msk.f32.mxu1 %vm937_vm1, %v3296_v7 }
 0x216   : > { %v4270_v37 = vrot.slane %v3968_v23, 1  ;;  %v4398_v0 = vrot.slane %v3968_v23, 2  ;;  %v3998_v29 = vrot.slane %v3967_v48, 6  ;;  %v4126_v61 = vrot.slane %v3967_v48, 7  ;;  %5830 = vmatmul.mubr.msk.f32.gmra.mxu1 %vm937_vm1, %v3297_v20 }
 0x217   : > { %v8436_v45 = vsel %vm1604_vm7, %v10050_v2, %v10049_v38  ;;  %v4254_v3 = vrot.slane %v3967_v48, 1  ;;  %v4382_v6 = vrot.slane %v3967_v48, 2  ;;  %v2829_v5 = vrot.slane %v8422_v4, 6 }
 0x218   : > { %v2957_v47 = vrot.slane %v8422_v4, 7  ;;  %v8444_v43 = vmax.f32 %v3779_v62, %v8419_v59  ;;  %v8447_v46 = vmax.f32 %v3780_v28, %v8402_v53  ;;  %v4046_v27 = vsel %vm1338_vm3, %v4014_v40, %v3998_v29 }
 0x219   : > { %v4174_v16 = vsel %vm1471_vm4, %v4142_v49, %v4126_v61  ;;  %v3085_v42 = vrot.slane %v8422_v4, 1  ;;  %v3213_v63 = vrot.slane %v8422_v4, 2  ;;  %v4063_v36 = vsel %vm952_vm5, %v4046_v27, -inf }
 0x21a   : > { %v4286_v13 = vsel %vm1604_vm7, %v4254_v3, %v4270_v37  ;;  %v4414_v1 = vsel %vm1737_vm8, %v4382_v6, %v4398_v0  ;;  %v4030_v12 = vsel %vm1338_vm3, %v3998_v29, %v4014_v40  ;;  %v4095_v62 = vmax.f32 %v3967_v48, %v4063_v36  ;;  %v8473_v26 = vld [vmem:[#allocation2 + $0x68] sm:$0xff] }
 0x21b   : > { %v4096_v54 = vmax.f32 %v3968_v23, %v4030_v12  ;;  %v4302_v30 = vsel %vm1604_vm7, %v4270_v37, %v4254_v3  ;;  %v4430_v18 = vsel %vm1737_vm8, %v4398_v0, %v4382_v6  ;;  %v4191_v10 = vsel %vm960_vm6, %v4174_v16, -inf  ;;  %v8479_v58 = vld [vmem:[#allocation2 + $0x60] sm:$0xff] }
 0x21c   : > { %v4158_v28 = vsel %vm1471_vm4, %v4126_v61, %v4142_v49  ;;  %v4320_v20 = vsel %vm971_vm9, %v4302_v30, -inf  ;;  %v10051_v52 = vrot.slane %v7272_v21, 6  ;;  %v4223_v11 = vmax.f32 %v4095_v62, %v4191_v10 }
 0x21d   : > { %v4224_v9 = vmax.f32 %v4096_v54, %v4158_v28  ;;  %v3970_v23 = vmax.f32 %v3906_v8, %v8473_v26  ;;  %v4448_v25 = vsel %vm979_vm10, %v4430_v18, -inf  ;;  %v3969_v48 = vmax.f32 %v3905_v15, %v8479_v58 }
 0x21e   : > { %v2861_v24 = vsel %vm1338_vm3, %v2829_v5, %v10051_v52  ;;  %v10052_v38 = vmov %v10051_v52  ;;  %v4351_v49 = vmax.f32 %v4223_v11, %v4286_v13  ;;  %v10053_v18 = vrot.slane %v7272_v21, 7 }
 0x21f   : > { %v2882_v7 = vsel %vm952_vm5, %v2861_v24, -inf  ;;  %v2845_v2 = vsel %vm1338_vm3, %v10052_v38, %v2829_v5  ;;  %v4352_v37 = vmax.f32 %v4224_v9, %v4320_v20  ;;  %v4015_v0 = vrot.slane %v3970_v23, 6 }
 0x220   : > { %v2914_v40 = vmax.f32 %v7272_v21, %v2882_v7  ;;  %v4143_v29 = vrot.slane %v3970_v23, 7  ;;  %v3999_v8 = vrot.slane %v3969_v48, 6  ;;  %v4127_v61 = vrot.slane %v3969_v48, 7 }
 0x221   : > { %v4255_v3 = vrot.slane %v3969_v48, 1  ;;  %v4271_v6 = vrot.slane %v3970_v23, 1  ;;  %v4479_v27 = vmax.f32 %v4351_v49, %v4414_v1  ;;  %v4383_v16 = vrot.slane %v3969_v48, 2 }
 0x222   : > { %v4399_v36 = vrot.slane %v3970_v23, 2  ;;  %v2915_v15 = vmax.f32 %v8422_v4, %v2845_v2  ;;  %v4480_v12 = vmax.f32 %v4352_v37, %v4448_v25  ;;  %v4047_v62 = vsel %vm1338_vm3, %v4015_v0, %v3999_v8 }
 0x223   : > { %v4175_v5 = vsel %vm1471_vm4, %v4143_v29, %v4127_v61  ;;  %v4031_v13 = vsel %vm1338_vm3, %v3999_v8, %v4015_v0  ;;  %5870 = vmatprep.mubr.msk.f32.mxu0 %vm937_vm1, %v4479_v27  ;;  %v4065_v54 = vsel %vm952_vm5, %v4047_v62, -inf  ;;  %v4287_v1 = vsel %vm1604_vm7, %v4255_v3, %v4271_v6 }
 0x224   : > { %v4098_v30 = vmax.f32 %v3970_v23, %v4031_v13  ;;  %v2973_v10 = vsel %vm1471_vm4, %v10053_v18, %v2957_v47  ;;  %5871 = vmatmul.mubr.msk.f32.gmra.mxu0 %vm937_vm1, %v4480_v12  ;;  %v4097_v28 = vmax.f32 %v3969_v48, %v4065_v54  ;;  %v4159_v20 = vsel %vm1471_vm4, %v4127_v61, %v4143_v29 }
 0x225   : > { %v4303_v52 = vsel %vm1604_vm7, %v4271_v6, %v4255_v3  ;;  %v4431_v24 = vsel %vm1737_vm8, %v4399_v36, %v4383_v16  ;;  %v4193_v11 = vsel %vm960_vm6, %v4175_v5, -inf  ;;  %v4415_v9 = vsel %vm1737_vm8, %v4383_v16, %v4399_v36 }
 0x226   : > { %v4226_v23 = vmax.f32 %v4098_v30, %v4159_v20  ;;  %v10054_v7 = vmov %v10053_v18  ;;  %v4225_v48 = vmax.f32 %v4097_v28, %v4193_v11  ;;  %v4322_v38 = vsel %vm971_vm9, %v4303_v52, -inf  ;;  %v2539_v18 = vld [vmem:[#allocation2 + $0x98] sm:$0xff] }
 0x227   : > { %v2989_v25 = vsel %vm1471_vm4, %v2957_v47, %v10054_v7  ;;  %v3043_v49 = vmax.f32 %v2915_v15, %v2973_v10  ;;  %v4450_v0 = vsel %vm979_vm10, %v4431_v24, -inf  ;;  %v10055_v8 = vrot.slane %v7272_v21, 1 }
 0x228   : > { %v3010_v2 = vsel %vm960_vm6, %v2989_v25, -inf  ;;  %v4354_v37 = vmax.f32 %v4226_v23, %v4322_v38  ;;  %v4353_v61 = vmax.f32 %v4225_v48, %v4287_v1  ;;  %v3012_v54 = vsel %vm960_vm6, %v8417_v19, -inf  ;;  %v2541_v25 = vld [vmem:[#allocation2 + $0xa8] sm:$0xff] }
 0x229   : > { %v3042_v29 = vmax.f32 %v2914_v40, %v3010_v2  ;;  %v3117_v47 = vsel %vm1604_vm7, %v3085_v42, %v10055_v8  ;;  %v10056_v3 = vmov %v10055_v8  ;;  %v10057_v40 = vrot.slane %v7272_v21, 2  ;;  %v10065_v38 = vld [vmem:[#allocation12_spill] sm:$0xff] }
 0x22a   : > { %v3101_v6 = vsel %vm1604_vm7, %v10056_v3, %v3085_v42  ;;  %v3139_v27 = vsel %vm971_vm9, %v3117_v47, -inf  ;;  %v4482_v36 = vmax.f32 %v4354_v37, %v4450_v0  ;;  %v4481_v5 = vmax.f32 %v4353_v61, %v4415_v9  ;;  %v2543_v37 = vld [vmem:[#allocation2 + $0xb8] sm:$0xff] }
 0x22b   : > { %v3245_v16 = vsel %vm1737_vm8, %v3213_v63, %v10057_v40  ;;  %v3170_v15 = vmax.f32 %v3042_v29, %v3101_v6  ;;  %v3171_v12 = vmax.f32 %v3043_v49, %v3139_v27  ;;  %v10058_v62 = vmov %v10057_v40  ;;  %v2542_v49 = vld [vmem:[#allocation2 + $0xb0] sm:$0xff]  ;;  %v6191_v27 = vld [vmem:[#allocation2 + $0xa8] sm:$0xff] }
 0x22c   : > { %v3229_v42 = vsel %vm1737_vm8, %v10058_v62, %v3213_v63  ;;  %v3267_v13 = vsel %vm979_vm10, %v3245_v16, -inf  ;;  %v10059_v1 = vrot.slane %v7368_v32, 1  ;;  %v10060_v30 = vrot.slane %v7372_v44, 1  ;;  %v10061_v63 = vld [vmem:[#allocation4_spill] sm:$0xff]  ;;  %5873 = vmatprep.mubr.msk.f32.mxu0 %vm937_vm1, %v4481_v5 }
 0x22d   : > { %v3298_v21 = vmax.f32 %v3170_v15, %v3229_v42  ;;  %v3299_v10 = vmax.f32 %v3171_v12, %v3267_v13  ;;  %v10062_v28 = vmax.f32 %v7368_v32, %v10061_v63  ;;  %v3907_v19 = vmax.f32 %v8444_v43, %v8479_v58  ;;  %5874 = vmatmul.mubr.msk.f32.gmra.mxu0 %vm937_vm1, %v4482_v36  ;;  %v2575_v15 = vld [vmem:[#allocation2 + $0xc8] sm:$0xff]  ;;  %v8613_v12 = vld [vmem:[#allocation2 + $0xb8] sm:$0xff] }
 0x22e   : > { %v3118_v4 = vsel %vm1604_vm7, %v10060_v30, %v10059_v1  ;;  %v10063_v11 = vrot.slane %v7368_v32, 2  ;;  %v10064_v9 = vrot.slane %v7372_v44, 2  ;;  %v3781_v7 = vmax.f32 %v8000_v35, %v8419_v59  ;;  %v2540_v35 = vld [vmem:[#allocation2 + $0xa0] sm:$0xff]  ;;  %v10069_v13 = vld [vmem:[#allocation10_spill] sm:$0xff]  ;;  %v10071_v1 = vld [vmem:[#allocation9_spill] sm:$0xff] }
 0x22f   : > { %v3044_v20 = vmax.f32 %v10062_v28, %v3012_v54  ;;  %v3141_v52 = vsel %vm971_vm9, %v3118_v4, -inf  ;;  %3687 = vst.msk [vmem:[#allocation2 + $0x70] sm:$0xff] %vm937_vm1, %v3298_v21  ;;  %3688 = vst.msk [vmem:[#allocation2 + $0x78] sm:$0xff] %vm937_vm1, %v3299_v10  ;;  %v2601_v2 = vmax.f32 %v10065_v38, %v2539_v18  ;;  %5832 = vmatprep.mubr.msk.f32.mxu1 %vm937_vm1, %v3298_v21  ;;  %v10070_v54 = vrot.slane %v10069_v13, 6  ;;  %v2638_v28 = vld [vmem:[#allocation2 + $0xd0] sm:$0xff] }
 0x230   : > { %v3173_v24 = vmax.f32 %v8424_v55, %v3141_v52  ;;  %v3246_v23 = vsel %vm1737_vm8, %v10064_v9, %v10063_v11  ;;  %v3908_v55 = vmax.f32 %v8447_v46, %v8473_v26  ;;  %v10066_v0 = vmov %v10064_v9  ;;  %5833 = vmatmul.mubr.msk.f32.gmra.mxu1 %vm937_vm1, %v3299_v10  ;;  %v2639_v9 = vld [vmem:[#allocation2 + $0xd8] sm:$0xff] }
 0x231   : > { %v3172_v43 = vmax.f32 %v3044_v20, %v8436_v45  ;;  %v3269_v48 = vsel %vm979_vm10, %v3246_v23, -inf  ;;  %v10067_v29 = vmov %v10063_v11  ;;  %v3782_v45 = vmax.f32 %v8015_v14, %v8402_v53  ;;  %v8636_v20 = vld [vmem:[#allocation2 + $0xc8] sm:$0xff] }
 0x232   : > { %v3230_v8 = vsel %vm1737_vm8, %v10067_v29, %v10066_v0  ;;  %v3301_v46 = vmax.f32 %v3173_v24, %v3269_v48  ;;  %v10068_v47 = vmax.f32 %v7984_v57, %v10065_v38  ;;  %v8606_v6 = vmax.f32 %v3781_v7, %v8479_v58  ;;  %v2574_v57 = vld [vmem:[#allocation2 + $0xc0] sm:$0xff] }
 0x233   : > { %v3300_v3 = vmax.f32 %v3172_v43, %v3230_v8  ;;  %v3783_v32 = vmax.f32 %v8419_v59, %v8479_v58  ;;  %v2603_v44 = vmax.f32 %v2539_v18, %v2541_v25  ;;  %v8611_v16 = vmax.f32 %v2601_v2, %v2541_v25  ;;  %v10073_v8 = vld [vmem:[#allocation3_spill] sm:$0xff] }
 0x234   : > { %v2663_v61 = vmax.f32 %v10068_v47, %v2539_v18  ;;  %3690 = vst.msk [vmem:[#allocation2 + $0x88] sm:$0xff] %vm937_vm1, %v3301_v46  ;;  %v2604_v14 = vmax.f32 %v2540_v35, %v2542_v49  ;;  %v2605_v36 = vmax.f32 %v2541_v25, %v2543_v37  ;;  %v2606_v42 = vmax.f32 %v2542_v49, %v2574_v57 }
 0x235   : > { %3689 = vst.msk [vmem:[#allocation2 + $0x80] sm:$0xff] %vm937_vm1, %v3300_v3  ;;  %5835 = vmatprep.mubr.msk.f32.mxu1 %vm937_vm1, %v3300_v3  ;;  %v8617_v62 = vmax.f32 %v2603_v44, %v2543_v37  ;;  %v2607_v5 = vmax.f32 %v2543_v37, %v2575_v15  ;;  %v10072_v30 = vrot.slane %v10071_v1, 6  ;;  %v3846_v18 = vmax.f32 %v3782_v45, %v8473_v26 }
 0x236   : > { %v2727_v40 = vmax.f32 %v2663_v61, %v6191_v27  ;;  %5836 = vmatmul.mubr.msk.f32.gmra.mxu1 %vm937_vm1, %v3301_v46  ;;  %v8640_v24 = vmax.f32 %v2604_v14, %v2574_v57  ;;  %v8642_v11 = vmax.f32 %v2605_v36, %v2575_v15  ;;  %v8644_v23 = vmax.f32 %v2606_v42, %v2638_v28  ;;  %v8646_v7 = vld [vmem:[#allocation2 + $0x70] sm:$0xff]  ;;  %v8648_v25 = vld [vmem:[#allocation2 + $0x78] sm:$0xff] }
 0x237   : > { %v8625_v4 = vsel %vm1338_vm3, %v10072_v30, %v10070_v54  ;;  %v8653_v2 = vmax.f32 %v2607_v5, %v2639_v9  ;;  %v3971_v35 = vmax.f32 %v3907_v19, %v8646_v7  ;;  %v3972_v49 = vmax.f32 %v3908_v55, %v8648_v25 }
 0x238   : > { %v8629_v21 = vmax.f32 %v2727_v40, %v8613_v12  ;;  %v3909_v37 = vmax.f32 %v8606_v6, %v8646_v7  ;;  %v3910_v29 = vmax.f32 %v3846_v18, %v8648_v25  ;;  %v10074_v46 = vrot.slane %v10073_v8, 6 }
 0x239   : > { %v10076_v55 = vrot.slane %v10073_v8, 7  ;;  %v4000_v3 = vrot.slane %v3971_v35, 6  ;;  %v4016_v6 = vrot.slane %v3972_v49, 6  ;;  %v4128_v44 = vrot.slane %v3971_v35, 7 }
 0x23a   : > { %v2831_v43 = vrot.slane %v8629_v21, 6  ;;  %v2959_v48 = vrot.slane %v8629_v21, 7  ;;  %v3087_v38 = vrot.slane %v8629_v21, 1  ;;  %v3215_v0 = vrot.slane %v8629_v21, 2 }
 0x23b   : > { %v10075_v47 = vmov %v10074_v46  ;;  %v4144_v27 = vrot.slane %v3972_v49, 7  ;;  %v4256_v40 = vrot.slane %v3971_v35, 1  ;;  %v4272_v14 = vrot.slane %v3972_v49, 1  ;;  %v8687_v18 = vld [vmem:[#allocation2 + $0x88] sm:$0xff] }
 0x23c   : > { %v8665_v45 = vsel %vm1338_vm3, %v10074_v46, %v2831_v43  ;;  %v2863_v19 = vsel %vm1338_vm3, %v2831_v43, %v10075_v47  ;;  %v8675_v61 = vsel %vm1471_vm4, %v10076_v55, %v2959_v48  ;;  %v4384_v36 = vrot.slane %v3971_v35, 2  ;;  %v8685_v30 = vld [vmem:[#allocation2 + $0x80] sm:$0xff] }
 0x23d   : > { %v4400_v57 = vrot.slane %v3972_v49, 2  ;;  %v4048_v15 = vsel %vm1338_vm3, %v4016_v6, %v4000_v3  ;;  %v4176_v42 = vsel %vm1471_vm4, %v4144_v27, %v4128_v44  ;;  %v4032_v5 = vsel %vm1338_vm3, %v4000_v3, %v4016_v6 }
 0x23e   : > { %v4160_v54 = vsel %vm1471_vm4, %v4128_v44, %v4144_v27  ;;  %v4067_v28 = vsel %vm952_vm5, %v4048_v15, -inf  ;;  %v4288_v9 = vsel %vm1604_vm7, %v4256_v40, %v4272_v14  ;;  %v10077_v46 = vmov %v10076_v55 }
 0x23f   : > { %v4416_v43 = vsel %vm1737_vm8, %v4384_v36, %v4400_v57  ;;  %v2991_v47 = vsel %vm1471_vm4, %v2959_v48, %v10077_v46  ;;  %v4099_v55 = vmax.f32 %v3971_v35, %v4067_v28  ;;  %v4100_v3 = vmax.f32 %v3972_v49, %v4032_v5 }
 0x240   : > { %v4304_v6 = vsel %vm1604_vm7, %v4272_v14, %v4256_v40  ;;  %v4432_v44 = vsel %vm1737_vm8, %v4400_v57, %v4384_v36  ;;  %v4195_v27 = vsel %vm960_vm6, %v4176_v42, -inf  ;;  %v3973_v52 = vmax.f32 %v3909_v37, %v8685_v30 }
 0x241   : > { %v4324_v15 = vsel %vm971_vm9, %v4304_v6, -inf  ;;  %v3974_v63 = vmax.f32 %v3910_v29, %v8687_v18  ;;  %v4227_v10 = vmax.f32 %v4099_v55, %v4195_v27  ;;  %v4228_v48 = vmax.f32 %v4100_v3, %v4160_v54 }
 0x242   : > { %v4452_v35 = vsel %vm979_vm10, %v4432_v44, -inf  ;;  %v2886_v49 = vsel %vm952_vm5, %v2863_v19, -inf  ;;  %v4001_v40 = vrot.slane %v3973_v52, 6  ;;  %v4129_v36 = vrot.slane %v3973_v52, 7 }
 0x243   : > { %v4017_v14 = vrot.slane %v3974_v63, 6  ;;  %v4145_v57 = vrot.slane %v3974_v63, 7  ;;  %v4355_v42 = vmax.f32 %v4227_v10, %v4288_v9  ;;  %v4356_v5 = vmax.f32 %v4228_v48, %v4324_v15 }
 0x244   : > { %v4257_v28 = vrot.slane %v3973_v52, 1  ;;  %v4273_v46 = vrot.slane %v3974_v63, 1  ;;  %v4385_v54 = vrot.slane %v3973_v52, 2  ;;  %v4401_v55 = vrot.slane %v3974_v63, 2 }
 0x245   : > { %v4049_v37 = vsel %vm1338_vm3, %v4017_v14, %v4001_v40  ;;  %v4177_v29 = vsel %vm1471_vm4, %v4145_v57, %v4129_v36  ;;  %v4483_v3 = vmax.f32 %v4355_v42, %v4416_v43  ;;  %v4484_v6 = vmax.f32 %v4356_v5, %v4452_v35 }
 0x246   : > { %v4069_v19 = vsel %vm952_vm5, %v4049_v37, -inf  ;;  %v2919_v44 = vmax.f32 %v8629_v21, %v8665_v45  ;;  %v4197_v9 = vsel %vm960_vm6, %v4177_v29, -inf  ;;  %v4289_v27 = vsel %vm1604_vm7, %v4257_v28, %v4273_v46 }
 0x247   : > { %v4101_v10 = vmax.f32 %v3973_v52, %v4069_v19  ;;  %v4033_v15 = vsel %vm1338_vm3, %v4001_v40, %v4017_v14  ;;  %5876 = vmatprep.mubr.msk.f32.mxu0 %vm937_vm1, %v4483_v3  ;;  %v4417_v43 = vsel %vm1737_vm8, %v4385_v54, %v4401_v55  ;;  %v4305_v35 = vsel %vm1604_vm7, %v4273_v46, %v4257_v28 }
 0x248   : > { %v4102_v48 = vmax.f32 %v3974_v63, %v4033_v15  ;;  %v4433_v52 = vsel %vm1737_vm8, %v4401_v55, %v4385_v54  ;;  %5877 = vmatmul.mubr.msk.f32.gmra.mxu0 %vm937_vm1, %v4484_v6  ;;  %v4161_v42 = vsel %vm1471_vm4, %v4129_v36, %v4145_v57  ;;  %v4326_v40 = vsel %vm971_vm9, %v4305_v35, -inf }
 0x249   : > { %v4229_v45 = vmax.f32 %v4101_v10, %v4197_v9  ;;  %v2918_v14 = vmax.f32 %v10073_v8, %v2886_v49  ;;  %v4454_v63 = vsel %vm979_vm10, %v4433_v52, -inf  ;;  %v3014_v28 = vsel %vm960_vm6, %v2991_v47, -inf }
 0x24a   : > { %v4230_v5 = vmax.f32 %v4102_v48, %v4161_v42  ;;  %v3047_v46 = vmax.f32 %v2919_v44, %v8675_v61  ;;  %v10078_v36 = vrot.slane %v10073_v8, 1  ;;  %v10080_v47 = vrot.slane %v10073_v8, 2 }
 0x24b   : > { %v4357_v37 = vmax.f32 %v4229_v45, %v4289_v27  ;;  %v3046_v29 = vmax.f32 %v2918_v14, %v3014_v28  ;;  %v3847_v6 = vmax.f32 %v3783_v32, %v8646_v7  ;;  %v10082_v48 = vmax.f32 %v8402_v53, %v8473_v26 }
 0x24c   : > { %v3103_v57 = vsel %vm1604_vm7, %v10078_v36, %v3087_v38  ;;  %v10079_v49 = vmov %v10078_v36  ;;  %v4358_v55 = vmax.f32 %v4230_v5, %v4326_v40  ;;  %v3247_v3 = vsel %vm1737_vm8, %v3215_v0, %v10080_v47  ;;  %v10085_v5 = vld [vmem:[#allocation6_spill] sm:$0xff] }
 0x24d   : > { %v3119_v54 = vsel %vm1604_vm7, %v3087_v38, %v10079_v49  ;;  %v4485_v19 = vmax.f32 %v4357_v37, %v4417_v43  ;;  %v3174_v44 = vmax.f32 %v3046_v29, %v3103_v57  ;;  %v10081_v38 = vmov %v10080_v47 }
 0x24e   : > { %v3143_v61 = vsel %vm971_vm9, %v3119_v54, -inf  ;;  %v3231_v9 = vsel %vm1737_vm8, %v10081_v38, %v3215_v0  ;;  %v4486_v27 = vmax.f32 %v4358_v55, %v4454_v63  ;;  %v3271_v15 = vsel %vm979_vm10, %v3247_v3, -inf }
 0x24f   : > { %v3175_v10 = vmax.f32 %v3047_v46, %v3143_v61  ;;  %v3848_v59 = vmax.f32 %v10082_v48, %v8648_v25  ;;  %v10083_v32 = vmax.f32 %v8611_v16, %v8613_v12  ;;  %5879 = vmatprep.mubr.msk.f32.mxu0 %vm937_vm1, %v4485_v19  ;;  %v3302_v21 = vmax.f32 %v3174_v44, %v3231_v9 }
 0x250   : > { %v3785_v0 = vmax.f32 %v8479_v58, %v8646_v7  ;;  %v3786_v35 = vmax.f32 %v8473_v26, %v8648_v25  ;;  %5880 = vmatmul.mubr.msk.f32.gmra.mxu0 %vm937_vm1, %v4486_v27  ;;  %v3911_v53 = vmax.f32 %v3847_v6, %v8685_v30  ;;  %v8798_v58 = vld [vmem:[#allocation2 + $0xd8] sm:$0xff]  ;;  %v10084_v26 = vmax.f32 %v8617_v62, %v8636_v20 }
 0x251   : > { %v2793_v43 = vmax.f32 %v10083_v32, %v8636_v20  ;;  %v3303_v8 = vmax.f32 %v3175_v10, %v3271_v15  ;;  %3691 = vst.msk [vmem:[#allocation2 + $0x90] sm:$0xff] %vm937_vm1, %v3302_v21  ;;  %v3912_v16 = vmax.f32 %v3848_v59, %v8687_v18  ;;  %5838 = vmatprep.mubr.msk.f32.mxu1 %vm937_vm1, %v3302_v21  ;;  %v10086_v63 = vrot.slane %v10085_v5, 6 }
 0x252   : > { %v8796_v40 = vmax.f32 %v3785_v0, %v8685_v30  ;;  %v8804_v14 = vmax.f32 %v10084_v26, %v8798_v58  ;;  %v10088_v29 = vrot.slane %v10085_v5, 7  ;;  %v8820_v62 = vmax.f32 %v3786_v35, %v8687_v18  ;;  %v10094_v0 = vld [vmem:[#allocation5_spill] sm:$0xff] }
 0x253   : > { %v2832_v52 = vrot.slane %v2793_v43, 6  ;;  %v2960_v45 = vrot.slane %v2793_v43, 7  ;;  %v3088_v42 = vrot.slane %v2793_v43, 1  ;;  %3692 = vst.msk [vmem:[#allocation2 + $0x98] sm:$0xff] %vm937_vm1, %v3303_v8  ;;  %v3216_v12 = vrot.slane %v2793_v43, 2  ;;  %5839 = vmatmul.mubr.msk.f32.gmra.mxu1 %vm937_vm1, %v3303_v8 }
 0x254   : > { %v10087_v46 = vmov %v10086_v63  ;;  %v10089_v49 = vmov %v10088_v29  ;;  %v10090_v47 = vrot.slane %v10085_v5, 1  ;;  %v10092_v44 = vrot.slane %v10085_v5, 2 }
 0x255   : > { %v2848_v28 = vsel %vm1338_vm3, %v10086_v63, %v2832_v52  ;;  %v2864_v37 = vsel %vm1338_vm3, %v2832_v52, %v10087_v46  ;;  %v2992_v36 = vsel %vm1471_vm4, %v2960_v45, %v10088_v29  ;;  %v2976_v54 = vsel %vm1471_vm4, %v10089_v49, %v2960_v45  ;;  %v8873_v29 = vpop.f32.mrf.mxu1 }
 0x256   : > { %v2888_v20 = vsel %vm952_vm5, %v2864_v37, -inf  ;;  %v2921_v57 = vmax.f32 %v2793_v43, %v2848_v28  ;;  %v3016_v55 = vsel %vm960_vm6, %v2992_v36, -inf  ;;  %v3104_v3 = vsel %vm1604_vm7, %v10090_v47, %v3088_v42 }
 0x257   : > { %v2920_v61 = vmax.f32 %v10085_v5, %v2888_v20  ;;  %v10091_v6 = vmov %v10090_v47  ;;  %v3248_v10 = vsel %vm1737_vm8, %v3216_v12, %v10092_v44  ;;  %v10093_v27 = vmov %v10092_v44 }
 0x258   : > { %v3120_v19 = vsel %vm1604_vm7, %v3088_v42, %v10091_v6  ;;  %v3049_v38 = vmax.f32 %v2921_v57, %v2976_v54  ;;  %v3232_v15 = vsel %vm1737_vm8, %v10093_v27, %v3216_v12  ;;  %v2833_v48 = vrot.slane %v8804_v14, 6  ;;  %v8864_v26 = vld [vmem:[#allocation2 + $0x90] sm:$0xff] }
 0x259   : > { %v3145_v9 = vsel %vm971_vm9, %v3120_v19, -inf  ;;  %v3048_v59 = vmax.f32 %v2920_v61, %v3016_v55  ;;  %v3273_v32 = vsel %vm979_vm10, %v3248_v10, -inf  ;;  %v2961_v43 = vrot.slane %v8804_v14, 7  ;;  %v8881_v55 = vpop.f32.mrf.mxu0 }
 0x25a   : > { %v3089_v21 = vrot.slane %v8804_v14, 1  ;;  %v3177_v8 = vmax.f32 %v3049_v38, %v3145_v9  ;;  %v10095_v35 = vrot.slane %v10094_v0, 6  ;;  %v3217_v12 = vrot.slane %v8804_v14, 2  ;;  %v8866_v5 = vld [vmem:[#allocation2 + $0x98] sm:$0xff] }
 0x25b   : > { %v3176_v63 = vmax.f32 %v3048_v59, %v3104_v3  ;;  %v3787_v37 = vmax.f32 %v8646_v7, %v8685_v30  ;;  %v3975_v36 = vmax.f32 %v3911_v53, %v8864_v26  ;;  %v3976_v20 = vmax.f32 %v3912_v16, %v8866_v5  ;;  %v8888_v53 = vpop.f32.mrf.mxu1 }
 0x25c   : > { %v2849_v52 = vsel %vm1338_vm3, %v10095_v35, %v2833_v48  ;;  %v10096_v45 = vmov %v10095_v35  ;;  %v3305_v57 = vmax.f32 %v3177_v8, %v3273_v32  ;;  %v10097_v49 = vrot.slane %v10094_v0, 7  ;;  %v8906_v8 = vpop.f32.mrf.mxu0 }
 0x25d   : > { %v2865_v42 = vsel %vm1338_vm3, %v2833_v48, %v10096_v45  ;;  %v2923_v46 = vmax.f32 %v8804_v14, %v2849_v52  ;;  %v3304_v61 = vmax.f32 %v3176_v63, %v3232_v15  ;;  %v3913_v14 = vmax.f32 %v8796_v40, %v8864_v26  ;;  %v8893_v40 = vpop.f32.mrf.mxu1 }
 0x25e   : > { %v2890_v28 = vsel %vm952_vm5, %v2865_v42, -inf  ;;  %v2977_v54 = vsel %vm1471_vm4, %v10097_v49, %v2961_v43  ;;  %v3914_v47 = vmax.f32 %v8820_v62, %v8866_v5  ;;  %v4002_v16 = vrot.slane %v3975_v36, 6  ;;  %3694 = vst.msk [vmem:[#allocation2 + $0xa8] sm:$0xff] %vm937_vm1, %v3305_v57 }
 0x25f   : > { %v2922_v3 = vmax.f32 %v10094_v0, %v2890_v28  ;;  %v4018_v6 = vrot.slane %v3976_v20, 6  ;;  %v4130_v19 = vrot.slane %v3975_v36, 7  ;;  %v4146_v44 = vrot.slane %v3976_v20, 7  ;;  %3693 = vst.msk [vmem:[#allocation2 + $0xa0] sm:$0xff] %vm937_vm1, %v3304_v61  ;;  %5841 = vmatprep.mubr.msk.f32.mxu1 %vm937_vm1, %v3304_v61 }
 0x260   : > { %v4258_v10 = vrot.slane %v3975_v36, 1  ;;  %v4274_v38 = vrot.slane %v3976_v20, 1  ;;  %v4386_v9 = vrot.slane %v3975_v36, 2  ;;  %v4402_v27 = vrot.slane %v3976_v20, 2  ;;  %5842 = vmatmul.mubr.msk.f32.gmra.mxu1 %vm937_vm1, %v3305_v57 }
 0x261   : > { %v4050_v62 = vsel %vm1338_vm3, %v4018_v6, %v4002_v16  ;;  %v4178_v15 = vsel %vm1471_vm4, %v4146_v44, %v4130_v19  ;;  %v4034_v48 = vsel %vm1338_vm3, %v4002_v16, %v4018_v6  ;;  %v10098_v59 = vmov %v10097_v49  ;;  %v8920_v49 = vpop.f32.mrf.mxu1 }
 0x262   : > { %v2993_v32 = vsel %vm1471_vm4, %v2961_v43, %v10098_v59  ;;  %v4071_v35 = vsel %vm952_vm5, %v4050_v62, -inf  ;;  %v4199_v52 = vsel %vm960_vm6, %v4178_v15, -inf  ;;  %v4290_v45 = vsel %vm1604_vm7, %v4258_v10, %v4274_v38 }
 0x263   : > { %v4162_v42 = vsel %vm1471_vm4, %v4130_v19, %v4146_v44  ;;  %v4103_v63 = vmax.f32 %v3975_v36, %v4071_v35  ;;  %v4104_v28 = vmax.f32 %v3976_v20, %v4034_v48  ;;  %v4306_v43 = vsel %vm1604_vm7, %v4274_v38, %v4258_v10  ;;  %v8930_v38 = vpop.f32.mrf.mxu0 }
 0x264   : > { %v4434_v57 = vsel %vm1737_vm8, %v4402_v27, %v4386_v9  ;;  %v4418_v61 = vsel %vm1737_vm8, %v4386_v9, %v4402_v27  ;;  %v4328_v16 = vsel %vm971_vm9, %v4306_v43, -inf  ;;  %v3018_v6 = vsel %vm960_vm6, %v2993_v32, -inf }
 0x265   : > { %v3051_v19 = vmax.f32 %v2923_v46, %v2977_v54  ;;  %v4231_v36 = vmax.f32 %v4103_v63, %v4199_v52  ;;  %v4232_v20 = vmax.f32 %v4104_v28, %v4162_v42  ;;  %v4456_v44 = vsel %vm979_vm10, %v4434_v57, -inf  ;;  %v8932_v62 = vld [vmem:[#allocation2 + $0xa8] sm:$0xff]  ;;  %v8957_v63 = vpop.f32.mrf.mxu1 }
 0x266   : > { %v3050_v10 = vmax.f32 %v2922_v3, %v3018_v6  ;;  %v10099_v15 = vrot.slane %v10094_v0, 1  ;;  %v10101_v54 = vrot.slane %v10094_v0, 2  ;;  %v8950_v52 = vld [vmem:[#allocation2 + $0xa0] sm:$0xff]  ;;  %v8953_v42 = vmax.f32 %v3914_v47, %v8932_v62  ;;  %v8964_v47 = vpop.f32.mrf.mxu0 }
 0x267   : > { %v4359_v32 = vmax.f32 %v4231_v36, %v4290_v45  ;;  %v4360_v35 = vmax.f32 %v4232_v20, %v4328_v16  ;;  %v3977_v28 = vmax.f32 %v3913_v14, %v8950_v52  ;;  %v3790_v7 = vmax.f32 %v8687_v18, %v8866_v5 }
 0x268   : > { %v3105_v9 = vsel %vm1604_vm7, %v10099_v15, %v3089_v21  ;;  %v10100_v27 = vmov %v10099_v15  ;;  %v3233_v48 = vsel %vm1737_vm8, %v10101_v54, %v3217_v12  ;;  %v10102_v3 = vmov %v10101_v54 }
 0x269   : > { %v3121_v46 = vsel %vm1604_vm7, %v3089_v21, %v10100_v27  ;;  %v3249_v59 = vsel %vm1737_vm8, %v3217_v12, %v10102_v3  ;;  %v3178_v43 = vmax.f32 %v3050_v10, %v3105_v9  ;;  %v4487_v12 = vmax.f32 %v4359_v32, %v4418_v61  ;;  %v8969_v61 = vpop.f32.mrf.mxu1 }
 0x26a   : > { %v3147_v21 = vsel %vm971_vm9, %v3121_v46, -inf  ;;  %v3275_v0 = vsel %vm979_vm10, %v3249_v59, -inf  ;;  %v4488_v45 = vmax.f32 %v4360_v35, %v4456_v44  ;;  %v4019_v16 = vrot.slane %v8953_v42, 6 }
 0x26b   : > { %v3179_v57 = vmax.f32 %v3051_v19, %v3147_v21  ;;  %v4147_v6 = vrot.slane %v8953_v42, 7  ;;  %v4003_v36 = vrot.slane %v3977_v28, 6  ;;  %v4131_v20 = vrot.slane %v3977_v28, 7  ;;  %5882 = vmatprep.mubr.msk.f32.mxu0 %vm937_vm1, %v4487_v12  ;;  %v8990_v21 = vpop.f32.mrf.mxu0 }
 0x26c   : > { %v4259_v15 = vrot.slane %v3977_v28, 1  ;;  %v4275_v27 = vrot.slane %v8953_v42, 1  ;;  %v4387_v14 = vrot.slane %v3977_v28, 2  ;;  %v4403_v19 = vrot.slane %v8953_v42, 2  ;;  %5883 = vmatmul.mubr.msk.f32.gmra.mxu0 %vm937_vm1, %v4488_v45 }
 0x26d   : > { %v3306_v10 = vmax.f32 %v3178_v43, %v3233_v48  ;;  %v3307_v9 = vmax.f32 %v3179_v57, %v3275_v0  ;;  %v4051_v44 = vsel %vm1338_vm3, %v4019_v16, %v4003_v36  ;;  %v4179_v46 = vsel %vm1471_vm4, %v4147_v6, %v4131_v20 }
 0x26e   : > { %v4035_v54 = vsel %vm1338_vm3, %v4003_v36, %v4019_v16  ;;  %v3788_v3 = vmax.f32 %v8648_v25, %v8687_v18  ;;  %v4073_v48 = vsel %vm952_vm5, %v4051_v44, -inf  ;;  %v4201_v59 = vsel %vm960_vm6, %v4179_v46, -inf  ;;  %v9007_v16 = vpop.f32.mrf.mxu1 }
 0x26f   : > { %v4291_v32 = vsel %vm1604_vm7, %v4259_v15, %v4275_v27  ;;  %v4106_v35 = vmax.f32 %v8953_v42, %v4035_v54  ;;  %3695 = vst.msk [vmem:[#allocation2 + $0xb0] sm:$0xff] %vm937_vm1, %v3306_v10  ;;  %3696 = vst.msk [vmem:[#allocation2 + $0xb8] sm:$0xff] %vm937_vm1, %v3307_v9  ;;  %5844 = vmatprep.mubr.msk.f32.mxu1 %vm937_vm1, %v3306_v10  ;;  %v4105_v25 = vmax.f32 %v3977_v28, %v4073_v48 }
 0x270   : > { %v4163_v43 = vsel %vm1471_vm4, %v4131_v20, %v4147_v6  ;;  %v4307_v57 = vsel %vm1604_vm7, %v4275_v27, %v4259_v15  ;;  %v4435_v0 = vsel %vm1737_vm8, %v4403_v19, %v4387_v14  ;;  %5845 = vmatmul.mubr.msk.f32.gmra.mxu1 %vm937_vm1, %v3307_v9  ;;  %v3851_v28 = vmax.f32 %v3787_v37, %v8864_v26  ;;  %v6194_v20 = vld [vmem:[#allocation2 + $0xd0] sm:$0xff]  ;;  %v9018_v37 = vpop.f32.mrf.mxu0 }
 0x271   : > { %v4234_v42 = vmax.f32 %v4106_v35, %v4163_v43  ;;  %v4330_v12 = vsel %vm971_vm9, %v4307_v57, -inf  ;;  %v4458_v45 = vsel %vm979_vm10, %v4435_v0, -inf  ;;  %10103 = vst [vmem:[#allocation4_spill] sm:$0xff] %v9007_v16  ;;  %v4233_v6 = vmax.f32 %v4105_v25, %v4201_v59  ;;  %10104 = vst [vmem:[#allocation12_spill] sm:$0xff] %v9018_v37 }
 0x272   : > { %v3852_v36 = vmax.f32 %v3788_v3, %v8866_v5  ;;  %v2732_v15 = vmax.f32 %v8640_v24, %v6194_v20  ;;  %v2733_v27 = vmax.f32 %v8642_v11, %v8798_v58  ;;  %v3915_v9 = vmax.f32 %v3851_v28, %v8950_v52  ;;  %v9021_v3 = vld [vmem:[#allocation2 + $0xe0] sm:$0xff]  ;;  %v9026_v11 = vld [vmem:[#allocation2 + $0xe8] sm:$0xff] }
 0x273   : > { %v4362_v10 = vmax.f32 %v4234_v42, %v4330_v12  ;;  %v3789_v44 = vmax.f32 %v8685_v30, %v8864_v26  ;;  %v4361_v46 = vmax.f32 %v4233_v6, %v4291_v32  ;;  %v4419_v30 = vsel %vm1737_vm8, %v4387_v14, %v4403_v19  ;;  %v9041_v32 = vpop.f32.mrf.mxu1 }
 0x274   : > { %v3916_v54 = vmax.f32 %v3852_v36, %v8932_v62  ;;  %v9024_v24 = vmax.f32 %v2732_v15, %v9021_v3  ;;  %v9029_v58 = vmax.f32 %v2733_v27, %v9026_v11  ;;  %v9039_v59 = vsel %vm952_vm5, %v8625_v4, -inf  ;;  %10105 = vst [vmem:[#allocation10_spill] sm:$0xff] %v9041_v32 }
 0x275   : > { %v4490_v48 = vmax.f32 %v4362_v10, %v4458_v45  ;;  %v9034_v18 = vmax.f32 %v3789_v44, %v8950_v52  ;;  %v4489_v35 = vmax.f32 %v4361_v46, %v4419_v30  ;;  %v9050_v19 = vmax.f32 %v3790_v7, %v8932_v62  ;;  %v9057_v45 = vpop.f32.mrf.mxu0 }
 0x276   : > { %v9043_v25 = vld [vmem:[#allocation2 + $0xb0] sm:$0xff]  ;;  %v9045_v43 = vld [vmem:[#allocation2 + $0xb8] sm:$0xff]  ;;  %v2818_v57 = vrot.slane %v9024_v24, 6  ;;  %v2834_v14 = vrot.slane %v9029_v58, 6  ;;  %v2946_v4 = vrot.slane %v9024_v24, 7  ;;  %v2734_v12 = vmax.f32 %v8644_v23, %v9021_v3  ;;  %10106 = vst [vmem:[#allocation9_spill] sm:$0xff] %v9057_v45 }
 0x277   : > { %v3979_v0 = vmax.f32 %v3915_v9, %v9043_v25  ;;  %v3980_v42 = vmax.f32 %v3916_v54, %v9045_v43  ;;  %5885 = vmatprep.mubr.msk.f32.mxu0 %vm937_vm1, %v4489_v35  ;;  %v2962_v36 = vrot.slane %v9029_v58, 7  ;;  %v3074_v20 = vrot.slane %v9024_v24, 1  ;;  %v9067_v9 = vpop.f32.mrf.mxu1 }
 0x278   : > { %v2850_v28 = vsel %vm1338_vm3, %v2818_v57, %v2834_v14  ;;  %v2866_v6 = vsel %vm1338_vm3, %v2834_v14, %v2818_v57  ;;  %5886 = vmatmul.mubr.msk.f32.gmra.mxu0 %vm937_vm1, %v4490_v48  ;;  %10107 = vst [vmem:[#allocation3_spill] sm:$0xff] %v9067_v9  ;;  %v3090_v48 = vrot.slane %v9029_v58, 1  ;;  %v9076_v57 = vpop.f32.mrf.mxu0  ;;  %v3202_v45 = vrot.slane %v9024_v24, 2 }
 0x279   : > { %v4004_v15 = vrot.slane %v3979_v0, 6  ;;  %v4020_v27 = vrot.slane %v3980_v42, 6  ;;  %v4132_v10 = vrot.slane %v3979_v0, 7  ;;  %v4148_v23 = vrot.slane %v3980_v42, 7  ;;  %10108 = vst [vmem:[#allocation6_spill] sm:$0xff] %v9076_v57  ;;  %v9089_v57 = vpop.f32.mrf.mxu1 }
 0x27a   : > { %v4260_v44 = vrot.slane %v3979_v0, 1  ;;  %v4276_v7 = vrot.slane %v3980_v42, 1  ;;  %v4388_v46 = vrot.slane %v3979_v0, 2  ;;  %v4404_v54 = vrot.slane %v3980_v42, 2 }
 0x27b   : > { %v4052_v3 = vsel %vm1338_vm3, %v4020_v27, %v4004_v15  ;;  %v4180_v30 = vsel %vm1471_vm4, %v4148_v23, %v4132_v10  ;;  %v4036_v35 = vsel %vm1338_vm3, %v4004_v15, %v4020_v27  ;;  %v4164_v32 = vsel %vm1471_vm4, %v4132_v10, %v4148_v23 }
 0x27c   : > { %v4075_v14 = vsel %vm952_vm5, %v4052_v3, -inf  ;;  %v4203_v9 = vsel %vm960_vm6, %v4180_v30, -inf  ;;  %v4292_v37 = vsel %vm1604_vm7, %v4260_v44, %v4276_v7  ;;  %v4108_v15 = vmax.f32 %v3980_v42, %v4036_v35 }
 0x27d   : > { %v4107_v16 = vmax.f32 %v3979_v0, %v4075_v14  ;;  %v4308_v27 = vsel %vm1604_vm7, %v4276_v7, %v4260_v44  ;;  %v4420_v3 = vsel %vm1737_vm8, %v4388_v46, %v4404_v54  ;;  %v4436_v30 = vsel %vm1737_vm8, %v4404_v54, %v4388_v46  ;;  %v9101_v7 = vpop.f32.mrf.mxu0 }
 0x27e   : > { %v2892_v10 = vsel %vm952_vm5, %v2866_v6, -inf  ;;  %v2925_v0 = vmax.f32 %v9029_v58, %v2850_v28  ;;  %v4236_v14 = vmax.f32 %v4108_v15, %v4164_v32  ;;  %v2978_v44 = vsel %vm1471_vm4, %v2946_v4, %v2962_v36 }
 0x27f   : > { %v4235_v23 = vmax.f32 %v4107_v16, %v4203_v9  ;;  %v2924_v42 = vmax.f32 %v9024_v24, %v2892_v10  ;;  %v4332_v35 = vsel %vm971_vm9, %v4308_v27, -inf  ;;  %v2994_v46 = vsel %vm1471_vm4, %v2962_v36, %v2946_v4  ;;  %v9113_v9 = vpop.f32.mrf.mxu1 }
 0x280   : > { %v3053_v54 = vmax.f32 %v2925_v0, %v2978_v44  ;;  %v3122_v6 = vsel %vm1604_vm7, %v3090_v48, %v3074_v20  ;;  %v4364_v16 = vmax.f32 %v4236_v14, %v4332_v35  ;;  %v3020_v24 = vsel %vm960_vm6, %v2994_v46, -inf  ;;  %v9122_v14 = vpop.f32.mrf.mxu0 }
 0x281   : > { %v4363_v28 = vmax.f32 %v4235_v23, %v4292_v37  ;;  %v3149_v32 = vsel %vm971_vm9, %v3122_v6, -inf  ;;  %v4460_v15 = vsel %vm979_vm10, %v4436_v30, -inf  ;;  %v3052_v27 = vmax.f32 %v2924_v42, %v3020_v24  ;;  %v10109_v42 = vld [vmem:[#allocation7_spill] sm:$0xff] }
 0x282   : > { %v3181_v10 = vmax.f32 %v3053_v54, %v3149_v32  ;;  %v3218_v4 = vrot.slane %v9029_v58, 2  ;;  %v4492_v0 = vmax.f32 %v4364_v16, %v4460_v15  ;;  %v3106_v37 = vsel %vm1604_vm7, %v3074_v20, %v3090_v48  ;;  %v10110_v20 = vld [vmem:[#allocation8_spill] sm:$0xff]  ;;  %v9140_v15 = vpop.f32.mrf.mxu0 }
 0x283   : > { %v4491_v36 = vmax.f32 %v4363_v28, %v4420_v3  ;;  %v2735_v23 = vmax.f32 %v8653_v2, %v9026_v11  ;;  %v3180_v44 = vmax.f32 %v3052_v27, %v3106_v37  ;;  %v2798_v46 = vmax.f32 %v2734_v12, %v10109_v42  ;;  %v9137_v3 = vpop.f32.mrf.mxu1 }
 0x284   : > { %v3234_v35 = vsel %vm1737_vm8, %v3202_v45, %v3218_v4  ;;  %v3250_v30 = vsel %vm1737_vm8, %v3218_v4, %v3202_v45  ;;  %v3791_v2 = vmax.f32 %v8864_v26, %v8950_v52  ;;  %v3792_v11 = vmax.f32 %v8866_v5, %v8932_v62 }
 0x285   : > { %5888 = vmatprep.mubr.msk.f32.mxu0 %vm937_vm1, %v4491_v36  ;;  %v3277_v58 = vsel %vm979_vm10, %v3250_v30, -inf  ;;  %v2799_v48 = vmax.f32 %v2735_v23, %v10110_v20  ;;  %v3308_v45 = vmax.f32 %v3180_v44, %v3234_v35  ;;  %v2819_v12 = vrot.slane %v2798_v46, 6 }
 0x286   : > { %5889 = vmatmul.mubr.msk.f32.gmra.mxu0 %vm937_vm1, %v4492_v0  ;;  %v3309_v54 = vmax.f32 %v3181_v10, %v3277_v58  ;;  %v2947_v6 = vrot.slane %v2798_v46, 7  ;;  %v3075_v24 = vrot.slane %v2798_v46, 1  ;;  %v3917_v26 = vmax.f32 %v9034_v18, %v9043_v25  ;;  %v9159_v18 = vpop.f32.mrf.mxu1 }
 0x287   : > { %v2835_v28 = vrot.slane %v2799_v48, 6  ;;  %v2963_v16 = vrot.slane %v2799_v48, 7  ;;  %v3091_v32 = vrot.slane %v2799_v48, 1  ;;  %3697 = vst.msk [vmem:[#allocation2 + $0xc0] sm:$0xff] %vm937_vm1, %v3308_v45  ;;  %v3918_v5 = vmax.f32 %v9050_v19, %v9045_v43  ;;  %5847 = vmatprep.mubr.msk.f32.mxu1 %vm937_vm1, %v3308_v45 }
 0x288   : > { %3698 = vst.msk [vmem:[#allocation2 + $0xc8] sm:$0xff] %vm937_vm1, %v3309_v54  ;;  %v3203_v27 = vrot.slane %v2798_v46, 2  ;;  %v3219_v10 = vrot.slane %v2799_v48, 2  ;;  %v9156_v37 = vmax.f32 %v3791_v2, %v9043_v25  ;;  %5848 = vmatmul.mubr.msk.f32.gmra.mxu1 %vm937_vm1, %v3309_v54  ;;  %v9166_v35 = vmax.f32 %v3792_v11, %v9045_v43  ;;  %v9174_v2 = vpop.f32.mrf.mxu0 }
 0x289   : > { %v2851_v4 = vsel %vm1338_vm3, %v2819_v12, %v2835_v28  ;;  %v2867_v36 = vsel %vm1338_vm3, %v2835_v28, %v2819_v12  ;;  %v2995_v0 = vsel %vm1471_vm4, %v2963_v16, %v2947_v6  ;;  %v2979_v44 = vsel %vm1471_vm4, %v2947_v6, %v2963_v16 }
 0x28a   : > { %v2894_v19 = vsel %vm952_vm5, %v2867_v36, -inf  ;;  %v2927_v23 = vmax.f32 %v2799_v48, %v2851_v4  ;;  %v3022_v42 = vsel %vm960_vm6, %v2995_v0, -inf  ;;  %v3107_v58 = vsel %vm1604_vm7, %v3075_v24, %v3091_v32  ;;  %v9202_v0 = vpop.f32.mrf.mxu1 }
 0x28b   : > { %v2926_v30 = vmax.f32 %v2798_v46, %v2894_v19  ;;  %v3123_v20 = vsel %vm1604_vm7, %v3091_v32, %v3075_v24  ;;  %v3251_v11 = vsel %vm1737_vm8, %v3219_v10, %v3203_v27  ;;  %v2928_v46 = vmax.f32 %v10069_v13, %v9039_v59  ;;  %10117 = vst [vmem:[#allocation5_spill] sm:$0xff] %v9202_v0 }
 0x28c   : > { %v3055_v45 = vmax.f32 %v2927_v23, %v2979_v44  ;;  %v3151_v48 = vsel %vm971_vm9, %v3123_v20, -inf  ;;  %v10111_v12 = vrot.slane %v10071_v1, 7  ;;  %v10112_v6 = vrot.slane %v10069_v13, 7  ;;  %v10118_v44 = vld [vmem:[#allocation11_spill] sm:$0xff] }
 0x28d   : > { %v3054_v54 = vmax.f32 %v2926_v30, %v3022_v42  ;;  %v10115_v4 = vrot.slane %v10071_v1, 1  ;;  %v10116_v36 = vrot.slane %v10069_v13, 1  ;;  %v10119_v30 = vmax.f32 %v10071_v1, %v10118_v44 }
 0x28e   : > { %v2980_v28 = vsel %vm1471_vm4, %v10112_v6, %v10111_v12  ;;  %v10113_v16 = vmov %v10112_v6  ;;  %v10114_v24 = vmov %v10111_v12  ;;  %v3183_v19 = vmax.f32 %v3055_v45, %v3151_v48 }
 0x28f   : > { %v2996_v32 = vsel %vm1471_vm4, %v10114_v24, %v10113_v16  ;;  %v9200_v59 = vsel %vm1604_vm7, %v10116_v36, %v10115_v4  ;;  %v9209_v42 = vmax.f32 %v10119_v30, %v2980_v28  ;;  %v10120_v20 = vmov %v10116_v36  ;;  %v9217_v16 = vld [vmem:[#allocation2 + $0xc0] sm:$0xff]  ;;  %v9219_v24 = vld [vmem:[#allocation2 + $0xc8] sm:$0xff] }
 0x290   : > { %v3024_v23 = vsel %vm960_vm6, %v2996_v32, -inf  ;;  %v10121_v12 = vmov %v10115_v4  ;;  %v3182_v45 = vmax.f32 %v3054_v54, %v3107_v58  ;;  %v3235_v48 = vsel %vm1737_vm8, %v3203_v27, %v3219_v10  ;;  %v9225_v4 = vpop.f32.mrf.mxu0  ;;  %v9234_v10 = vpop.f32.mrf.mxu1 }
 0x291   : > { %v3124_v6 = vsel %vm1604_vm7, %v10121_v12, %v10120_v20  ;;  %v3279_v32 = vsel %vm979_vm10, %v3251_v11, -inf  ;;  %v3056_v28 = vmax.f32 %v2928_v46, %v3024_v23  ;;  %v3981_v36 = vmax.f32 %v3917_v26, %v9217_v16  ;;  %10122 = vst [vmem:[#allocation7_spill] sm:$0xff] %v9234_v10 }
 0x292   : > { %v3982_v44 = vmax.f32 %v3918_v5, %v9219_v24  ;;  %v3311_v30 = vmax.f32 %v3183_v19, %v3279_v32  ;;  %v3153_v20 = vsel %vm971_vm9, %v3124_v6, -inf  ;;  %v3310_v12 = vmax.f32 %v3182_v45, %v3235_v48  ;;  %v9258_v10 = vpop.f32.mrf.mxu1 }
 0x293   : > { %v3184_v58 = vmax.f32 %v3056_v28, %v9200_v59  ;;  %v3185_v54 = vmax.f32 %v9209_v42, %v3153_v20  ;;  %v3204_v27 = vrot.slane %v10069_v13, 2  ;;  %v4005_v11 = vrot.slane %v3981_v36, 6  ;;  %v9239_v59 = vpop.f32.mrf.mxu0  ;;  %10124 = vst [vmem:[#allocation11_spill] sm:$0xff] %v9258_v10 }
 0x294   : > { %v4021_v46 = vrot.slane %v3982_v44, 6  ;;  %v4133_v23 = vrot.slane %v3981_v36, 7  ;;  %v4149_v0 = vrot.slane %v3982_v44, 7  ;;  %3700 = vst.msk [vmem:[#allocation2 + $0xd8] sm:$0xff] %vm937_vm1, %v3311_v30  ;;  %v4261_v26 = vrot.slane %v3981_v36, 1  ;;  %3699 = vst.msk [vmem:[#allocation2 + $0xd0] sm:$0xff] %vm937_vm1, %v3310_v12  ;;  %5850 = vmatprep.mubr.msk.f32.mxu1 %vm937_vm1, %v3310_v12 }
 0x295   : > { %v4277_v5 = vrot.slane %v3982_v44, 1  ;;  %v4389_v19 = vrot.slane %v3981_v36, 2  ;;  %v4405_v32 = vrot.slane %v3982_v44, 2  ;;  %10123 = vst [vmem:[#allocation8_spill] sm:$0xff] %v9239_v59  ;;  %5851 = vmatmul.mubr.msk.f32.gmra.mxu1 %vm937_vm1, %v3311_v30  ;;  %v3920_v12 = vmax.f32 %v9166_v35, %v9219_v24  ;;  %v9271_v10 = vpop.f32.mrf.mxu0 }
 0x296   : > { %v4053_v13 = vsel %vm1338_vm3, %v4021_v46, %v4005_v11  ;;  %v4181_v42 = vsel %vm1471_vm4, %v4149_v0, %v4133_v23  ;;  %v4037_v6 = vsel %vm1338_vm3, %v4005_v11, %v4021_v46  ;;  %v4165_v45 = vsel %vm1471_vm4, %v4133_v23, %v4149_v0  ;;  %10125 = vst [vmem:[#allocation13_spill] sm:$0xff] %v9271_v10 }
 0x297   : > { %v4077_v48 = vsel %vm952_vm5, %v4053_v13, -inf  ;;  %v4293_v28 = vsel %vm1604_vm7, %v4261_v26, %v4277_v5  ;;  %v4421_v20 = vsel %vm1737_vm8, %v4389_v19, %v4405_v32  ;;  %v4110_v46 = vmax.f32 %v3982_v44, %v4037_v6 }
 0x298   : > { %v4109_v11 = vmax.f32 %v3981_v36, %v4077_v48  ;;  %v4309_v0 = vsel %vm1604_vm7, %v4277_v5, %v4261_v26  ;;  %v4437_v30 = vsel %vm1737_vm8, %v4405_v32, %v4389_v19  ;;  %v4205_v23 = vsel %vm960_vm6, %v4181_v42, -inf  ;;  %v9288_v42 = vpop.f32.mrf.mxu1 }
 0x299   : > { %v3919_v13 = vmax.f32 %v9156_v37, %v9217_v16  ;;  %v3220_v59 = vrot.slane %v10071_v1, 2  ;;  %v3793_v35 = vmax.f32 %v8950_v52, %v9043_v25  ;;  %v4238_v44 = vmax.f32 %v4110_v46, %v4165_v45  ;;  %10126 = vst [vmem:[#allocation14_spill] sm:$0xff] %v9288_v42 }
 0x29a   : > { %v4237_v36 = vmax.f32 %v4109_v11, %v4205_v23  ;;  %v4334_v26 = vsel %vm971_vm9, %v4309_v0, -inf  ;;  %v3794_v5 = vmax.f32 %v8932_v62, %v9045_v43  ;;  %v4462_v19 = vsel %vm979_vm10, %v4437_v30, -inf }
 0x29b   : > { %v9279_v32 = vld [vmem:[#allocation2 + $0xd8] sm:$0xff]  ;;  %v3236_v1 = vsel %vm1737_vm8, %v3204_v27, %v3220_v59  ;;  %v3252_v52 = vsel %vm1737_vm8, %v3220_v59, %v3204_v27  ;;  %v9286_v37 = vmax.f32 %v3793_v35, %v9217_v16  ;;  %v4366_v45 = vmax.f32 %v4238_v44, %v4334_v26  ;;  %v9290_v48 = vld [vmem:[#allocation2 + $0xd0] sm:$0xff]  ;;  %v9297_v59 = vpop.f32.mrf.mxu0 }
 0x29c   : > { %v4365_v6 = vmax.f32 %v4237_v36, %v4293_v28  ;;  %v3984_v62 = vmax.f32 %v3920_v12, %v9279_v32  ;;  %v3281_v11 = vsel %vm979_vm10, %v3252_v52, -inf  ;;  %v3983_v46 = vmax.f32 %v3919_v13, %v9290_v48 }
 0x29d   : > { %v3312_v0 = vmax.f32 %v3184_v58, %v3236_v1  ;;  %v3313_v30 = vmax.f32 %v3185_v54, %v3281_v11  ;;  %v3858_v27 = vmax.f32 %v3794_v5, %v9219_v24  ;;  %v4494_v35 = vmax.f32 %v4366_v45, %v4462_v19  ;;  %v9302_v58 = vpop.f32.mrf.mxu1  ;;  %v9317_v52 = vpop.f32.mrf.mxu0 }
 0x29e   : > { %v4493_v23 = vmax.f32 %v4365_v6, %v4421_v20  ;;  %v4022_v42 = vrot.slane %v3984_v62, 6  ;;  %v4150_v28 = vrot.slane %v3984_v62, 7  ;;  %v4006_v36 = vrot.slane %v3983_v46, 6 }
 0x29f   : > { %v4134_v44 = vrot.slane %v3983_v46, 7  ;;  %v4262_v26 = vrot.slane %v3983_v46, 1  ;;  %v4278_v10 = vrot.slane %v3984_v62, 1  ;;  %3701 = vst.msk [vmem:[#allocation2 + $0xe0] sm:$0xff] %vm937_vm1, %v3312_v0  ;;  %3702 = vst.msk [vmem:[#allocation2 + $0xe8] sm:$0xff] %vm937_vm1, %v3313_v30  ;;  %5853 = vmatprep.mubr.msk.f32.mxu1 %vm937_vm1, %v3312_v0  ;;  %v4390_v54 = vrot.slane %v3983_v46, 2 }
 0x2a0   : > { %5891 = vmatprep.mubr.msk.f32.mxu0 %vm937_vm1, %v4493_v23  ;;  %v4406_v12 = vrot.slane %v3984_v62, 2  ;;  %v3795_v20 = vmax.f32 %v9043_v25, %v9217_v16  ;;  %5854 = vmatmul.mubr.msk.f32.gmra.mxu1 %vm937_vm1, %v3313_v30  ;;  %v4054_v13 = vsel %vm1338_vm3, %v4022_v42, %v4006_v36  ;;  %v4038_v19 = vsel %vm1338_vm3, %v4006_v36, %v4022_v42  ;;  %v9332_v23 = vpop.f32.mrf.mxu1  ;;  %v9346_v36 = vpop.f32.mrf.mxu0 }
 0x2a1   : > { %5892 = vmatmul.mubr.msk.f32.gmra.mxu0 %vm937_vm1, %v4494_v35  ;;  %v4182_v5 = vsel %vm1471_vm4, %v4150_v28, %v4134_v44  ;;  %v3796_v1 = vmax.f32 %v9045_v43, %v9219_v24  ;;  %v4079_v25 = vsel %vm952_vm5, %v4054_v13, -inf  ;;  %v4112_v6 = vmax.f32 %v3984_v62, %v4038_v19  ;;  %5856 = vmatprep.mubr.msk.f32.mxu1 %vm937_vm1, %v8259_v33 }
 0x2a2   : > { %v3921_v45 = vmax.f32 %v9286_v37, %v9290_v48  ;;  %v3922_v11 = vmax.f32 %v3858_v27, %v9279_v32  ;;  %v4111_v0 = vmax.f32 %v3983_v46, %v4079_v25  ;;  %v4166_v42 = vsel %vm1471_vm4, %v4134_v44, %v4150_v28  ;;  %10127 = vst [vmem:[#allocation15_spill] sm:$0xff] %v9332_v23 }
 0x2a3   : > { %v4310_v43 = vsel %vm1604_vm7, %v4278_v10, %v4262_v26  ;;  %v4438_v30 = vsel %vm1737_vm8, %v4406_v12, %v4390_v54  ;;  %v4207_v37 = vsel %vm960_vm6, %v4182_v5, -inf  ;;  %v4240_v62 = vmax.f32 %v4112_v6, %v4166_v42  ;;  %v9361_v6 = vpop.f32.mrf.mxu1 }
 0x2a4   : > { %v3859_v27 = vmax.f32 %v3795_v20, %v9290_v48  ;;  %5857 = vmatmul.mubr.msk.f32.gmra.mxu1 %vm937_vm1, %v8269_v41  ;;  %v4239_v33 = vmax.f32 %v4111_v0, %v4207_v37  ;;  %v4336_v46 = vsel %vm971_vm9, %v4310_v43, -inf  ;;  %v3860_v35 = vmax.f32 %v3796_v1, %v9279_v32  ;;  %10128 = vst [vmem:[#allocation16_spill] sm:$0xff] %v9361_v6  ;;  %v9373_v43 = vpop.f32.mrf.mxu0 }
 0x2a5   : > { %v3797_v28 = vmax.f32 %v9217_v16, %v9290_v48  ;;  %5859 = vmatprep.mubr.msk.f32.mxu1 %vm937_vm1, %v8267_v51  ;;  %v4294_v44 = vsel %vm1604_vm7, %v4262_v26, %v4278_v10  ;;  %v4422_v41 = vsel %vm1737_vm8, %v4390_v54, %v4406_v12  ;;  %v4368_v20 = vmax.f32 %v4240_v62, %v4336_v46 }
 0x2a6   : > { %v4464_v13 = vsel %vm979_vm10, %v4438_v30, -inf  ;;  %v9354_v5 = vld [vmem:[#allocation2 + $0xe0] sm:$0xff]  ;;  %v9356_v19 = vld [vmem:[#allocation2 + $0xe8] sm:$0xff]  ;;  %v4367_v16 = vmax.f32 %v4239_v33, %v4294_v44  ;;  %v3798_v54 = vmax.f32 %v9219_v24, %v9279_v32  ;;  %10129 = vst [vmem:[#allocation17_spill] sm:$0xff] %v9373_v43  ;;  %v9375_v24 = vld [vmem:[#allocation2 + $0xf0] sm:$0xff]  ;;  %v2335_v22 = vadd.f32 %v8881_v55, %v8873_v29 }
 0x2a7   : > { %v3985_v1 = vmax.f32 %v3921_v45, %v9354_v5  ;;  %v3986_v51 = vmax.f32 %v3922_v11, %v9356_v19  ;;  %v3923_v25 = vmax.f32 %v3859_v27, %v9354_v5  ;;  %v4496_v10 = vmax.f32 %v4368_v20, %v4464_v13 }
 0x2a8   : > { %v3924_v26 = vmax.f32 %v3860_v35, %v9356_v19  ;;  %v9367_v12 = vmax.f32 %v3797_v28, %v9354_v5  ;;  %5860 = vmatmul.mubr.msk.f32.gmra.mxu1 %vm937_vm1, %v8271_v50  ;;  %v4495_v0 = vmax.f32 %v4367_v16, %v4422_v41  ;;  %v3862_v20 = vmax.f32 %v3798_v54, %v9356_v19 }
 0x2a9   : > { %v4007_v45 = vrot.slane %v3985_v1, 6  ;;  %v4023_v42 = vrot.slane %v3986_v51, 6  ;;  %v4135_v11 = vrot.slane %v3985_v1, 7  ;;  %5862 = vmatprep.mubr.msk.f32.mxu1 %vm937_vm1, %v8273_v39  ;;  %v4151_v30 = vrot.slane %v3986_v51, 7  ;;  %v9383_v39 = vpop.f32.mrf.mxu1 }
 0x2aa   : > { %v4263_v37 = vrot.slane %v3985_v1, 1  ;;  %v4279_v62 = vrot.slane %v3986_v51, 1  ;;  %v4391_v27 = vrot.slane %v3985_v1, 2  ;;  %5894 = vmatprep.mubr.msk.f32.mxu0 %vm937_vm1, %v4495_v0  ;;  %v4407_v33 = vrot.slane %v3986_v51, 2  ;;  %10130 = vst [vmem:[#allocation18_spill] sm:$0xff] %v9383_v39  ;;  %v9399_v0 = vld [vmem:[#allocation2 + $0xf8] sm:$0xff] }
 0x2ab   : > { %v4055_v50 = vsel %vm1338_vm3, %v4023_v42, %v4007_v45  ;;  %v4039_v46 = vsel %vm1338_vm3, %v4007_v45, %v4023_v42  ;;  %v3987_v35 = vmax.f32 %v3923_v25, %v9375_v24  ;;  %5895 = vmatmul.mubr.msk.f32.gmra.mxu0 %vm937_vm1, %v4496_v10  ;;  %v4183_v44 = vsel %vm1471_vm4, %v4151_v30, %v4135_v11  ;;  %v9401_v45 = vpop.f32.mrf.mxu0 }
 0x2ac   : > { %v4081_v28 = vsel %vm952_vm5, %v4055_v50, -inf  ;;  %v4114_v41 = vmax.f32 %v3986_v51, %v4039_v46  ;;  %5863 = vmatmul.mubr.msk.f32.gmra.mxu1 %vm937_vm1, %v8275_v17  ;;  %v4209_v16 = vsel %vm960_vm6, %v4183_v44, -inf  ;;  %v4295_v25 = vsel %vm1604_vm7, %v4263_v37, %v4279_v62  ;;  %10131 = vst [vmem:[#allocation19_spill] sm:$0xff] %v9401_v45  ;;  %v9412_v46 = vpop.f32.mrf.mxu1 }
 0x2ad   : > { %v4113_v13 = vmax.f32 %v3985_v1, %v4081_v28  ;;  %v4167_v10 = vsel %vm1471_vm4, %v4135_v11, %v4151_v30  ;;  %v4423_v51 = vsel %vm1737_vm8, %v4391_v27, %v4407_v33  ;;  %v4311_v17 = vsel %vm1604_vm7, %v4279_v62, %v4263_v37  ;;  %10132 = vst [vmem:[#allocation20_spill] sm:$0xff] %v9412_v46  ;;  %v9414_v62 = vpop.f32.mrf.mxu0 }
 0x2ae   : > { %v4242_v54 = vmax.f32 %v4114_v41, %v4167_v10  ;;  %v3988_v1 = vmax.f32 %v3924_v26, %v9399_v0  ;;  %v4338_v50 = vsel %vm971_vm9, %v4311_v17, -inf  ;;  %v4439_v11 = vsel %vm1737_vm8, %v4407_v33, %v4391_v27  ;;  %10133 = vst [vmem:[#allocation21_spill] sm:$0xff] %v9414_v62 }
 0x2af   : > { %v4241_v42 = vmax.f32 %v4113_v13, %v4209_v16  ;;  %v4008_v30 = vrot.slane %v3987_v35, 6  ;;  %v4136_v39 = vrot.slane %v3987_v35, 7  ;;  %v4264_v10 = vrot.slane %v3987_v35, 1 }
 0x2b0   : > { %v4370_v28 = vmax.f32 %v4242_v54, %v4338_v50  ;;  %v4024_v44 = vrot.slane %v3988_v1, 6  ;;  %v4152_v45 = vrot.slane %v3988_v1, 7  ;;  %v4280_v6 = vrot.slane %v3988_v1, 1 }
 0x2b1   : > { %v4369_v41 = vmax.f32 %v4241_v42, %v4295_v25  ;;  %v4392_v37 = vrot.slane %v3987_v35, 2  ;;  %v4466_v26 = vsel %vm979_vm10, %v4439_v11, -inf  ;;  %v4408_v33 = vrot.slane %v3988_v1, 2  ;;  %v9426_v42 = vpop.f32.mrf.mxu1 }
 0x2b2   : > { %v4056_v13 = vsel %vm1338_vm3, %v4024_v44, %v4008_v30  ;;  %v4184_v27 = vsel %vm1471_vm4, %v4152_v45, %v4136_v39  ;;  %v4498_v54 = vmax.f32 %v4370_v28, %v4466_v26  ;;  %10134 = vst [vmem:[#allocation22_spill] sm:$0xff] %v9426_v42  ;;  %v4296_v11 = vsel %vm1604_vm7, %v4264_v10, %v4280_v6  ;;  %v9441_v26 = vpop.f32.mrf.mxu0 }
 0x2b3   : > { %v4497_v16 = vmax.f32 %v4369_v41, %v4423_v51  ;;  %v4083_v25 = vsel %vm952_vm5, %v4056_v13, -inf  ;;  %v4211_v17 = vsel %vm960_vm6, %v4184_v27, -inf  ;;  %v4424_v46 = vsel %vm1737_vm8, %v4392_v37, %v4408_v33  ;;  %10135 = vst [vmem:[#allocation23_spill] sm:$0xff] %v9441_v26 }
 0x2b4   : > { %v4115_v50 = vmax.f32 %v3987_v35, %v4083_v25  ;;  %v4040_v62 = vsel %vm1338_vm3, %v4008_v30, %v4024_v44  ;;  %v4312_v28 = vsel %vm1604_vm7, %v4280_v6, %v4264_v10  ;;  %v4440_v41 = vsel %vm1737_vm8, %v4408_v33, %v4392_v37  ;;  %v3957_v6 = vld [vmem:[#allocation2 + $0x100] sm:$0xff]  ;;  %v9453_v33 = vpop.f32.mrf.mxu1 }
 0x2b5   : > { %5897 = vmatprep.mubr.msk.f32.mxu0 %vm937_vm1, %v4497_v16  ;;  %v4116_v51 = vmax.f32 %v3988_v1, %v4040_v62  ;;  %v3925_v35 = vmax.f32 %v9367_v12, %v9375_v24  ;;  %v4168_v30 = vsel %vm1471_vm4, %v4136_v39, %v4152_v45  ;;  %v4340_v1 = vsel %vm971_vm9, %v4312_v28, -inf  ;;  %v3958_v62 = vld [vmem:[#allocation2 + $0x108] sm:$0xff]  ;;  %10136 = vst [vmem:[#allocation24_spill] sm:$0xff] %v9453_v33 }
 0x2b6   : > { %5898 = vmatmul.mubr.msk.f32.gmra.mxu0 %vm937_vm1, %v4498_v54  ;;  %v4243_v13 = vmax.f32 %v4115_v50, %v4211_v17  ;;  %v3926_v44 = vmax.f32 %v3862_v20, %v9399_v0  ;;  %v4468_v37 = vsel %vm979_vm10, %v4440_v41, -inf  ;;  %v3799_v27 = vmax.f32 %v9290_v48, %v9354_v5 }
 0x2b7   : > { %v4244_v10 = vmax.f32 %v4116_v51, %v4168_v30  ;;  %v3989_v12 = vmax.f32 %v3925_v35, %v3957_v6  ;;  %v3800_v39 = vmax.f32 %v9279_v32, %v9356_v19  ;;  %v3801_v20 = vmax.f32 %v9354_v5, %v9375_v24  ;;  %v9459_v51 = vpop.f32.mrf.mxu0  ;;  %v9463_v32 = vpop.f32.mrf.mxu1 }
 0x2b8   : > { %v4371_v16 = vmax.f32 %v4243_v13, %v4296_v11  ;;  %v3990_v54 = vmax.f32 %v3926_v44, %v3958_v62  ;;  %10137 = vst [vmem:[#allocation25_spill] sm:$0xff] %v9459_v51  ;;  %v3802_v13 = vmax.f32 %v9356_v19, %v9399_v0  ;;  %10138 = vst [vmem:[#allocation26_spill] sm:$0xff] %v9463_v32 }
 0x2b9   : > { %v4372_v45 = vmax.f32 %v4244_v10, %v4340_v1  ;;  %v4009_v25 = vrot.slane %v3989_v12, 6  ;;  %v4137_v17 = vrot.slane %v3989_v12, 7  ;;  %v4265_v50 = vrot.slane %v3989_v12, 1 }
 0x2ba   : > { %v4499_v28 = vmax.f32 %v4371_v16, %v4424_v46  ;;  %v4025_v41 = vrot.slane %v3990_v54, 6  ;;  %v4153_v35 = vrot.slane %v3990_v54, 7  ;;  %v4281_v48 = vrot.slane %v3990_v54, 1 }
 0x2bb   : > { %v4500_v30 = vmax.f32 %v4372_v45, %v4468_v37  ;;  %v4393_v33 = vrot.slane %v3989_v12, 2  ;;  %v4409_v11 = vrot.slane %v3990_v54, 2  ;;  %v3863_v44 = vmax.f32 %v3799_v27, %v9375_v24  ;;  %v9478_v45 = vpop.f32.mrf.mxu0 }
 0x2bc   : > { %5900 = vmatprep.mubr.msk.f32.mxu0 %vm937_vm1, %v4499_v28  ;;  %v4057_v5 = vsel %vm1338_vm3, %v4025_v41, %v4009_v25  ;;  %v4185_v1 = vsel %vm1471_vm4, %v4153_v35, %v4137_v17  ;;  %v4041_v46 = vsel %vm1338_vm3, %v4009_v25, %v4025_v41  ;;  %v3803_v37 = vmax.f32 %v9375_v24, %v3957_v6  ;;  %v3959_v41 = vld [vmem:[#allocation2 + $0x110] sm:$0xff] }
 0x2bd   : > { %5901 = vmatmul.mubr.msk.f32.gmra.mxu0 %vm937_vm1, %v4500_v30  ;;  %v4085_v19 = vsel %vm952_vm5, %v4057_v5, -inf  ;;  %v4118_v10 = vmax.f32 %v3990_v54, %v4041_v46  ;;  %v3804_v16 = vmax.f32 %v9399_v0, %v3958_v62  ;;  %10139 = vst [vmem:[#allocation27_spill] sm:$0xff] %v9478_v45  ;;  %v4213_v32 = vsel %vm960_vm6, %v4185_v1, -inf  ;;  %v9491_v46 = vpop.f32.mrf.mxu1  ;;  %v9495_v42 = vpop.f32.mrf.mxu0 }
 0x2be   : > { %v4117_v28 = vmax.f32 %v3989_v12, %v4085_v19  ;;  %v4169_v25 = vsel %vm1471_vm4, %v4137_v17, %v4153_v35  ;;  %v4313_v27 = vsel %vm1604_vm7, %v4281_v48, %v4265_v50  ;;  %v4441_v24 = vsel %vm1737_vm8, %v4409_v11, %v4393_v33  ;;  %v3960_v12 = vld [vmem:[#allocation2 + $0x118] sm:$0xff] }
 0x2bf   : > { %v4246_v30 = vmax.f32 %v4118_v10, %v4169_v25  ;;  %v4342_v54 = vsel %vm971_vm9, %v4313_v27, -inf  ;;  %v3864_v5 = vmax.f32 %v3800_v39, %v9399_v0  ;;  %v3927_v19 = vmax.f32 %v3863_v44, %v3957_v6 }
 0x2c0   : > { %v4245_v1 = vmax.f32 %v4117_v28, %v4213_v32  ;;  %v3865_v45 = vmax.f32 %v3801_v20, %v3957_v6  ;;  %v3866_v17 = vmax.f32 %v3802_v13, %v3958_v62  ;;  %v4297_v35 = vsel %vm1604_vm7, %v4265_v50, %v4281_v48  ;;  %v3961_v13 = vld [vmem:[#allocation2 + $0x120] sm:$0xff]  ;;  %v9503_v50 = vld [vmem:[#allocation2 + $0x128] sm:$0xff] }
 0x2c1   : > { %v4374_v51 = vmax.f32 %v4246_v30, %v4342_v54  ;;  %v3928_v10 = vmax.f32 %v3864_v5, %v3958_v62  ;;  %v3867_v25 = vmax.f32 %v3803_v37, %v3959_v41  ;;  %v3991_v26 = vmax.f32 %v3927_v19, %v3959_v41  ;;  %v9505_v62 = vpop.f32.mrf.mxu1  ;;  %v9507_v30 = vpop.f32.mrf.mxu0 }
 0x2c2   : > { %v4373_v27 = vmax.f32 %v4245_v1, %v4297_v35  ;;  %v3929_v43 = vmax.f32 %v3865_v45, %v3959_v41  ;;  %v9497_v23 = vmax.f32 %v3804_v16, %v3960_v12  ;;  %v4425_v0 = vsel %vm1737_vm8, %v4393_v33, %v4409_v11 }
 0x2c3   : > { %v4470_v6 = vsel %vm979_vm10, %v4441_v24, -inf  ;;  %v3992_v39 = vmax.f32 %v3928_v10, %v3960_v12  ;;  %v3930_v20 = vmax.f32 %v3866_v17, %v3960_v12  ;;  %v4010_v44 = vrot.slane %v3991_v26, 6  ;;  %v9522_v1 = vpop.f32.mrf.mxu1 }
 0x2c4   : > { %v4501_v48 = vmax.f32 %v4373_v27, %v4425_v0  ;;  %v4502_v32 = vmax.f32 %v4374_v51, %v4470_v6  ;;  %v4138_v37 = vrot.slane %v3991_v26, 7  ;;  %v4266_v28 = vrot.slane %v3991_v26, 1  ;;  %v9532_v0 = vpop.f32.mrf.mxu0 }
 0x2c5   : > { %v4026_v45 = vrot.slane %v3992_v39, 6  ;;  %v4154_v16 = vrot.slane %v3992_v39, 7  ;;  %v4282_v41 = vrot.slane %v3992_v39, 1  ;;  %v9510_v33 = vmax.f32 %v3929_v43, %v3961_v13 }
 0x2c6   : > { %5903 = vmatprep.mubr.msk.f32.mxu0 %vm937_vm1, %v4501_v48  ;;  %v3931_v11 = vmax.f32 %v3867_v25, %v3961_v13  ;;  %v3932_v54 = vmax.f32 %v9497_v23, %v9503_v50  ;;  %v3994_v12 = vmax.f32 %v3930_v20, %v9503_v50  ;;  %v4394_v19 = vrot.slane %v3991_v26, 2 }
 0x2c7   : > { %5904 = vmatmul.mubr.msk.f32.gmra.mxu0 %vm937_vm1, %v4502_v32  ;;  %v4058_v51 = vsel %vm1338_vm3, %v4026_v45, %v4010_v44  ;;  %v4186_v24 = vsel %vm1471_vm4, %v4154_v16, %v4138_v37  ;;  %v4042_v5 = vsel %vm1338_vm3, %v4010_v44, %v4026_v45  ;;  %v4410_v23 = vrot.slane %v3992_v39, 2 }
 0x2c8   : > { %v4087_v43 = vsel %vm952_vm5, %v4058_v51, -inf  ;;  %v4120_v17 = vmax.f32 %v3992_v39, %v4042_v5  ;;  %v4298_v10 = vsel %vm1604_vm7, %v4266_v28, %v4282_v41  ;;  %v4170_v25 = vsel %vm1471_vm4, %v4138_v37, %v4154_v16  ;;  %v3963_v39 = vld [vmem:[#allocation2 + $0x130] sm:$0xff]  ;;  %v9540_v37 = vpop.f32.mrf.mxu1 }
 0x2c9   : > { %v4119_v35 = vmax.f32 %v3991_v26, %v4087_v43  ;;  %v4314_v27 = vsel %vm1604_vm7, %v4282_v41, %v4266_v28  ;;  %v4215_v6 = vsel %vm960_vm6, %v4186_v24, -inf  ;;  %v4011_v26 = vrot.slane %v9510_v33, 6  ;;  %10140 = vst [vmem:[#allocation28_spill] sm:$0xff] %v9540_v37 }
 0x2ca   : > { %v4248_v20 = vmax.f32 %v4120_v17, %v4170_v25  ;;  %v4344_v13 = vsel %vm971_vm9, %v4314_v27, -inf  ;;  %v4027_v48 = vrot.slane %v3994_v12, 6  ;;  %v4139_v32 = vrot.slane %v9510_v33, 7  ;;  %v9551_v17 = vpop.f32.mrf.mxu0 }
 0x2cb   : > { %v4247_v50 = vmax.f32 %v4119_v35, %v4215_v6  ;;  %v4155_v44 = vrot.slane %v3994_v12, 7  ;;  %v4442_v16 = vsel %vm1737_vm8, %v4410_v23, %v4394_v19  ;;  %v4267_v28 = vrot.slane %v9510_v33, 1 }
 0x2cc   : > { %v4376_v45 = vmax.f32 %v4248_v20, %v4344_v13  ;;  %v4283_v41 = vrot.slane %v3994_v12, 1  ;;  %v4059_v24 = vsel %vm1338_vm3, %v4027_v48, %v4011_v26  ;;  %v9549_v43 = vmax.f32 %v3931_v11, %v3963_v39  ;;  %v9563_v39 = vpop.f32.mrf.mxu1 }
 0x2cd   : > { %v4375_v51 = vmax.f32 %v4247_v50, %v4298_v10  ;;  %v4187_v5 = vsel %vm1471_vm4, %v4155_v44, %v4139_v32  ;;  %v4426_v35 = vsel %vm1737_vm8, %v4394_v19, %v4410_v23  ;;  %v4089_v25 = vsel %vm952_vm5, %v4059_v24, -inf  ;;  %v3964_v10 = vld [vmem:[#allocation2 + $0x138] sm:$0xff] }
 0x2ce   : > { %v4395_v27 = vrot.slane %v9510_v33, 2  ;;  %v4411_v6 = vrot.slane %v3994_v12, 2  ;;  %v4472_v13 = vsel %vm979_vm10, %v4442_v16, -inf  ;;  %v4121_v50 = vmax.f32 %v9510_v33, %v4089_v25 }
 0x2cf   : > { %v4503_v20 = vmax.f32 %v4375_v51, %v4426_v35  ;;  %v4043_v11 = vsel %vm1338_vm3, %v4011_v26, %v4027_v48  ;;  %v4504_v37 = vmax.f32 %v4376_v45, %v4472_v13  ;;  %v4217_v19 = vsel %vm960_vm6, %v4187_v5, -inf  ;;  %v9574_v48 = vpop.f32.mrf.mxu0 }
 0x2d0   : > { %v4122_v23 = vmax.f32 %v3994_v12, %v4043_v11  ;;  %v4315_v24 = vsel %vm1604_vm7, %v4283_v41, %v4267_v28  ;;  %v4249_v51 = vmax.f32 %v4121_v50, %v4217_v19  ;;  %v4299_v16 = vsel %vm1604_vm7, %v4267_v28, %v4283_v41 }
 0x2d1   : > { %5906 = vmatprep.mubr.msk.f32.mxu0 %vm937_vm1, %v4503_v20  ;;  %v4171_v33 = vsel %vm1471_vm4, %v4139_v32, %v4155_v44  ;;  %v3996_v26 = vmax.f32 %v3932_v54, %v3964_v10  ;;  %v4443_v12 = vsel %vm1737_vm8, %v4411_v6, %v4395_v27  ;;  %v4012_v5 = vrot.slane %v9549_v43, 6  ;;  %v9583_v32 = vpop.f32.mrf.mxu1 }
 0x2d2   : > { %5907 = vmatmul.mubr.msk.f32.gmra.mxu0 %vm937_vm1, %v4504_v37  ;;  %v4250_v45 = vmax.f32 %v4122_v23, %v4171_v33  ;;  %v4140_v35 = vrot.slane %v9549_v43, 7  ;;  %v4377_v25 = vmax.f32 %v4249_v51, %v4299_v16  ;;  %v4346_v28 = vsel %vm971_vm9, %v4315_v24, -inf  ;;  %v9594_v23 = vpop.f32.mrf.mxu0 }
 0x2d3   : > { %v4028_v41 = vrot.slane %v3996_v26, 6  ;;  %v4156_v20 = vrot.slane %v3996_v26, 7  ;;  %v4427_v54 = vsel %vm1737_vm8, %v4395_v27, %v4411_v6  ;;  %v4268_v37 = vrot.slane %v9549_v43, 1 }
 0x2d4   : > { %v4378_v44 = vmax.f32 %v4250_v45, %v4346_v28  ;;  %v4284_v10 = vrot.slane %v3996_v26, 1  ;;  %v4505_v13 = vmax.f32 %v4377_v25, %v4427_v54  ;;  %v4474_v50 = vsel %vm979_vm10, %v4443_v12, -inf  ;;  %v2155_v45 = vpop.f32.mrf.mxu1 }
 0x2d5   : > { %v4060_v11 = vsel %vm1338_vm3, %v4028_v41, %v4012_v5  ;;  %v4188_v19 = vsel %vm1471_vm4, %v4156_v20, %v4140_v35  ;;  %v4396_v6 = vrot.slane %v9549_v43, 2  ;;  %v4412_v51 = vrot.slane %v3996_v26, 2 }
 0x2d6   : > { %v4506_v24 = vmax.f32 %v4378_v44, %v4474_v50  ;;  %v4091_v27 = vsel %vm952_vm5, %v4060_v11, -inf  ;;  %5909 = vmatprep.mubr.msk.f32.mxu0 %vm937_vm1, %v4505_v13  ;;  %v4044_v33 = vsel %vm1338_vm3, %v4012_v5, %v4028_v41  ;;  %v4219_v12 = vsel %vm960_vm6, %v4188_v19, -inf  ;;  %v9610_v44 = vpop.f32.mrf.mxu0 }
 0x2d7   : > { %v4123_v16 = vmax.f32 %v9549_v43, %v4091_v27  ;;  %v4124_v25 = vmax.f32 %v3996_v26, %v4044_v33  ;;  %v4316_v34 = vsel %vm1604_vm7, %v4284_v10, %v4268_v37  ;;  %v4172_v54 = vsel %vm1471_vm4, %v4140_v35, %v4156_v20  ;;  %v5819_v26 = vpop.f32.mrf.mxu1 }
 0x2d8   : > { %5910 = vmatmul.mubr.msk.f32.gmra.mxu0 %vm937_vm1, %v4506_v24  ;;  %v4300_v43 = vsel %vm1604_vm7, %v4268_v37, %v4284_v10  ;;  %v4444_v41 = vsel %vm1737_vm8, %v4412_v51, %v4396_v6  ;;  %v4348_v31 = vsel %vm971_vm9, %v4316_v34, -inf  ;;  %v4428_v50 = vsel %vm1737_vm8, %v4396_v6, %v4412_v51  ;;  %v2479_v20 = vpop.f32.mrf.mxu0 }
 0x2d9   : > { %v4251_v28 = vmax.f32 %v4123_v16, %v4219_v12  ;;  %v4252_v5 = vmax.f32 %v4124_v25, %v4172_v54  ;;  %v4476_v35 = vsel %vm979_vm10, %v4444_v41, -inf  ;;  %v3486_v10 = vpop.f32.mrf.mxu1  ;;  %v2330_v60 = vadd.f32 %v8906_v8, %v8888_v53  ;;  %v9633_v16 = vld [vmem:[%s9934_s5] ss:$0 sm:$0xff] }
 0x2da   : > { %v5869_v37 = vpop.f32.mrf.mxu0  ;;  %v9628_v27 = vadd.f32 %v2479_v20, %v2155_v45  ;;  %v3646_v6 = vadd.f32 %v5819_v26, %v2335_v22  ;;  %v9638_v25 = vld [vmem:[%s9935_s6] ss:$0 sm:$0xff]  ;;  %v2345_v54 = vadd.f32 %v8930_v38, %v8893_v40  ;;  %v2355_v20 = vadd.f32 %v8990_v21, %v8957_v63 }
 0x2db   : > { %v4379_v13 = vmax.f32 %v4251_v28, %v4300_v43  ;;  %v4380_v11 = vmax.f32 %v4252_v5, %v4348_v31  ;;  %v3645_v51 = vadd.f32 %v3486_v10, %v2330_v60  ;;  %v5822_v45 = vpop.f32.mrf.mxu1  ;;  %v2340_v5 = vadd.f32 %v8964_v47, %v8920_v49  ;;  %v10141_v49 = vld [vmem:[#allocation12_spill] sm:$0xff] }
 0x2dc   : > { %v4675_v56 = vpop.f32.mrf.mxu0  ;;  %v4835_v33 = vadd.f32 %v5869_v37, %v3646_v6  ;;  %v3648_v41 = vadd.f32 %v5822_v45, %v2345_v54  ;;  %v2350_v47 = vadd.f32 %v10141_v49, %v8969_v61 }
 0x2dd   : > { %v4507_v19 = vmax.f32 %v4379_v13, %v4428_v50  ;;  %v4508_v24 = vmax.f32 %v4380_v11, %v4476_v35  ;;  %v4834_v12 = vadd.f32 %v4675_v56, %v3645_v51  ;;  %v3496_v43 = vpop.f32.mrf.mxu1 }
 0x2de   : > { %v4874_v29 = vmul.f32 %v9633_v16, %v4835_v33  ;;  %v3647_v13 = vadd.f32 %v3496_v43, %v2340_v5 }
 0x2df   : > { %5912 = vmatprep.mubr.msk.f32.mxu0 %vm937_vm1, %v4507_v19  ;;  %v4873_v55 = vmul.f32 %v9633_v16, %v4834_v12  ;;  %v5825_v50 = vpop.f32.mrf.mxu1 }
 0x2e0   : > { %5913 = vmatmul.mubr.msk.f32.gmra.mxu0 %vm937_vm1, %v4508_v24  ;;  %v4913_v53 = vadd.f32 %v9638_v25, %v4874_v29  ;;  %v3650_v37 = vadd.f32 %v5825_v50, %v2355_v20  ;;  %v10143_v20 = vld [vmem:[#allocation9_spill] sm:$0xff] }
 0x2e1   : > { %v4912_v8 = vadd.f32 %v9638_v25, %v4873_v55  ;;  %v3506_v24 = vpop.f32.mrf.mxu1 }
 0x2e2   : > { %v5465_v34 = vmul.f32 -1.442695, %v4913_v53  ;;  %v3649_v6 = vadd.f32 %v3506_v24, %v2350_v47  ;;  %v10144_v47 = vld [vmem:[#allocation10_spill] sm:$0xff] }
 0x2e3   : > { %v5464_v28 = vmul.f32 -1.442695, %v4912_v8 }
 0x2e4   : > { %6054 = vpow2.f32 %v5465_v34  ;;  %v5872_v31 = vpop.f32.mrf.mxu0 }
 0x2e5   : > { %6056 = vpow2.f32 %v5464_v28  ;;  %v4837_v26 = vadd.f32 %v5872_v31, %v3648_v41 }
 0x2e6   : > { %v4685_v11 = vpop.f32.mrf.mxu0 }
 0x2e7   : > { %v4876_v19 = vmul.f32 %v9633_v16, %v4837_v26  ;;  %v4836_v35 = vadd.f32 %v4685_v11, %v3647_v13  ;;  %v5828_v13 = vpop.f32.mrf.mxu1 }
 0x2e9   : > { %v9652_v40 = vadd.f32 %v9638_v25, %v4876_v19  ;;  %v4875_v38 = vmul.f32 %v9633_v16, %v4836_v35  ;;  %v10142_v35 = vld [vmem:[#allocation4_spill] sm:$0xff]  ;;  %v3516_v49 = vpop.f32.mrf.mxu1 }
 0x2eb   : > { %v5467_v10 = vmul.f32 -1.442695, %v9652_v40  ;;  %v9659_v22 = vadd.f32 %v9638_v25, %v4875_v38  ;;  %v2365_v38 = vadd.f32 %v10143_v20, %v10142_v35 }
 0x2ed   : > { %6058 = vpow2.f32 %v5467_v10  ;;  %v5875_v63 = vpop.f32.mrf.mxu0  ;;  %v5466_v21 = vmul.f32 -1.442695, %v9659_v22 }
 0x2ee   : > { %v4839_v12 = vadd.f32 %v5875_v63, %v3650_v37  ;;  %v10145_v37 = vld [vmem:[#allocation6_spill] sm:$0xff] }
 0x2ef   : > { %v4695_v29 = vpop.f32.mrf.mxu0  ;;  %v2360_v10 = vadd.f32 %v10145_v37, %v10144_v47 }
 0x2f0   : > { %v4878_v61 = vmul.f32 %v9633_v16, %v4839_v12  ;;  %v4838_v55 = vadd.f32 %v4695_v29, %v3649_v6 }
 0x2f1   : > { %v6055_v60 = vpop.eup %6054 }
 0x2f2   : > { %v6057_v51 = vpop.eup %6056  ;;  %v5041_v56 = vadd.f32 1.0, %v6055_v60  ;;  %v9664_v45 = vadd.f32 %v9638_v25, %v4878_v61  ;;  %v4877_v34 = vmul.f32 %v9633_v16, %v4838_v55  ;;  %v3652_v60 = vadd.f32 %v5828_v13, %v2365_v38 }
 0x2f3   : > { %v5040_v33 = vadd.f32 1.0, %v6057_v51  ;;  %v3651_v51 = vadd.f32 %v3516_v49, %v2360_v10 }
 0x2f4   : > { %6060 = vrcp.f32 %v5041_v56  ;;  %v5469_v28 = vmul.f32 -1.442695, %v9664_v45  ;;  %v9669_v54 = vadd.f32 %v9638_v25, %v4877_v34 }
 0x2f5   : > { %6062 = vrcp.f32 %v5040_v33  ;;  %v10146_v33 = vld [vmem:[#allocation3_spill] sm:$0xff] }
 0x2f6   : > { %6064 = vpow2.f32 %v5466_v21  ;;  %v5468_v43 = vmul.f32 -1.442695, %v9669_v54  ;;  %v2375_v12 = vadd.f32 %v9101_v7, %v10146_v33 }
 0x2f7   : > { %6066 = vpow2.f32 %v5469_v28 }
 0x2f8   : > { %6068 = vpow2.f32 %v5468_v43  ;;  %v2370_v43 = vadd.f32 %v9122_v14, %v9089_v57 }
 0x2fa   : > { %v6059_v5 = vpop.eup %6058 }
 0x2fb   : > { %v5043_v41 = vadd.f32 1.0, %v6059_v5 }
 0x2fd   : > { %6070 = vrcp.f32 %v5043_v41 }
 0x301   : > { %v6061_v31 = vpop.eup %6060 }
 0x302   : > { %v6063_v26 = vpop.eup %6062  ;;  %v5137_v50 = vmul.f32 %v6061_v31, %v4913_v53  ;;  %v5831_v53 = vpop.f32.mrf.mxu1 }
 0x303   : > { %v6065_v11 = vpop.eup %6064  ;;  %v5136_v19 = vmul.f32 %v6063_v26, %v4912_v8  ;;  %v3654_v5 = vadd.f32 %v5831_v53, %v2375_v12 }
 0x304   : > { %5169 = vst.msk [vmem:[%s9677_s30 + $0x8] sm:$0xff] %vm312_vm0, %v5137_v50  ;;  %v5042_v24 = vadd.f32 1.0, %v6065_v11  ;;  %v6067_v6 = vpop.eup %6066  ;;  %v3526_v28 = vpop.f32.mrf.mxu1 }
 0x305   : > { %5168 = vst.msk [vmem:[%s9677_s30] sm:$0xff] %vm312_vm0, %v5136_v19  ;;  %v5045_v56 = vadd.f32 1.0, %v6067_v6  ;;  %v6069_v8 = vpop.eup %6068  ;;  %v3653_v7 = vadd.f32 %v3526_v28, %v2370_v43 }
 0x306   : > { %6072 = vrcp.f32 %v5042_v24  ;;  %v5044_v29 = vadd.f32 1.0, %v6069_v8  ;;  %v5834_v8 = vpop.f32.mrf.mxu1 }
 0x307   : > { %6074 = vrcp.f32 %v5045_v56 }
 0x308   : > { %v5878_v63 = vpop.f32.mrf.mxu0  ;;  %6076 = vrcp.f32 %v5044_v29  ;;  %v3536_v12 = vpop.f32.mrf.mxu1  ;;  %v2380_v29 = vadd.f32 %v9174_v2, %v9137_v3  ;;  %v2395_v2 = vadd.f32 %v9225_v4, %v9159_v18 }
 0x309   : > { %v4841_v21 = vadd.f32 %v5878_v63, %v3652_v60 }
 0x30a   : > { %v4705_v61 = vpop.f32.mrf.mxu0  ;;  %v6071_v31 = vpop.eup %6070 }
 0x30b   : > { %v4880_v55 = vmul.f32 %v9633_v16, %v4841_v21  ;;  %v4840_v34 = vadd.f32 %v4705_v61, %v3651_v51  ;;  %v5139_v26 = vmul.f32 %v6071_v31, %v9652_v40 }
 0x30d   : > { %v9693_v41 = vadd.f32 %v9638_v25, %v4880_v55  ;;  %v4879_v13 = vmul.f32 %v9633_v16, %v4840_v34  ;;  %5171 = vst.msk [vmem:[%s9677_s30 + $0x18] sm:$0xff] %vm312_vm0, %v5139_v26  ;;  %v3655_v34 = vadd.f32 %v3536_v12, %v2380_v29  ;;  %v10149_v29 = vld [vmem:[#allocation7_spill] sm:$0xff] }
 0x30f   : > { %v5471_v50 = vmul.f32 -1.442695, %v9693_v41  ;;  %v9699_v19 = vadd.f32 %v9638_v25, %v4879_v13 }
 0x310   : > { %v5881_v11 = vpop.f32.mrf.mxu0 }
 0x311   : > { %v4843_v35 = vadd.f32 %v5881_v11, %v3654_v5  ;;  %6078 = vpow2.f32 %v5471_v50  ;;  %v5470_v57 = vmul.f32 -1.442695, %v9699_v19 }
 0x312   : > { %v4715_v14 = vpop.f32.mrf.mxu0 }
 0x313   : > { %v6073_v20 = vpop.eup %6072  ;;  %v4882_v38 = vmul.f32 %v9633_v16, %v4843_v35  ;;  %v4842_v24 = vadd.f32 %v4715_v14, %v3653_v7  ;;  %6080 = vpow2.f32 %v5470_v57  ;;  %v10147_v14 = vld [vmem:[#allocation5_spill] sm:$0xff] }
 0x314   : > { %v5138_v40 = vmul.f32 %v6073_v20, %v9659_v22  ;;  %v6075_v60 = vpop.eup %6074  ;;  %v10148_v20 = vld [vmem:[#allocation8_spill] sm:$0xff] }
 0x315   : > { %v4921_v49 = vadd.f32 %v9638_v25, %v4882_v38  ;;  %v4881_v47 = vmul.f32 %v9633_v16, %v4842_v24  ;;  %v5141_v6 = vmul.f32 %v6075_v60, %v9664_v45  ;;  %v6077_v53 = vpop.eup %6076  ;;  %v2385_v45 = vadd.f32 %v9140_v15, %v9113_v9  ;;  %v5837_v15 = vpop.f32.mrf.mxu1 }
 0x316   : > { %5170 = vst.msk [vmem:[%s9677_s30 + $0x10] sm:$0xff] %vm312_vm0, %v5138_v40  ;;  %v5140_v22 = vmul.f32 %v6077_v53, %v9669_v54  ;;  %v2390_v38 = vadd.f32 %v10148_v20, %v10147_v14  ;;  %v3658_v40 = vadd.f32 %v5837_v15, %v2395_v2 }
 0x317   : > { %v5473_v37 = vmul.f32 -1.442695, %v4921_v49  ;;  %v9711_v10 = vadd.f32 %v9638_v25, %v4881_v47  ;;  %5173 = vst.msk [vmem:[%s9677_s30 + $0x28] sm:$0xff] %vm312_vm0, %v5141_v6  ;;  %v3656_v61 = vadd.f32 %v5834_v8, %v2385_v45  ;;  %v3546_v57 = vpop.f32.mrf.mxu1 }
 0x318   : > { %5172 = vst.msk [vmem:[%s9677_s30 + $0x20] sm:$0xff] %vm312_vm0, %v5140_v22  ;;  %v3657_v4 = vadd.f32 %v3546_v57, %v2390_v38 }
 0x319   : > { %6082 = vpow2.f32 %v5473_v37  ;;  %v5472_v51 = vmul.f32 -1.442695, %v9711_v10 }
 0x31b   : > { %6084 = vpow2.f32 %v5472_v51 }
 0x31e   : > { %v6079_v56 = vpop.eup %6078 }
 0x31f   : > { %v5047_v63 = vadd.f32 1.0, %v6079_v56 }
 0x320   : > { %v6081_v21 = vpop.eup %6080 }
 0x321   : > { %6086 = vrcp.f32 %v5047_v63  ;;  %v5046_v33 = vadd.f32 1.0, %v6081_v21 }
 0x323   : > { %6088 = vrcp.f32 %v5046_v33  ;;  %v5840_v33 = vpop.f32.mrf.mxu1 }
 0x326   : > { %v6083_v55 = vpop.eup %6082 }
 0x327   : > { %v5049_v54 = vadd.f32 1.0, %v6083_v55 }
 0x328   : > { %v6085_v28 = vpop.eup %6084 }
 0x329   : > { %6090 = vrcp.f32 %v5049_v54  ;;  %v5048_v5 = vadd.f32 1.0, %v6085_v28  ;;  %v3556_v54 = vpop.f32.mrf.mxu1 }
 0x32b   : > { %6092 = vrcp.f32 %v5048_v5 }
 0x32c   : > { %v5884_v43 = vpop.f32.mrf.mxu0 }
 0x32d   : > { %v4845_v13 = vadd.f32 %v5884_v43, %v3656_v61  ;;  %v10150_v61 = vld [vmem:[#allocation13_spill] sm:$0xff] }
 0x32e   : > { %v4725_v31 = vpop.f32.mrf.mxu0  ;;  %v6087_v50 = vpop.eup %6086  ;;  %v2405_v55 = vadd.f32 %v10150_v61, %v10149_v29 }
 0x32f   : > { %v4884_v7 = vmul.f32 %v9633_v16, %v4845_v13  ;;  %v4844_v9 = vadd.f32 %v4725_v31, %v3655_v34  ;;  %v5143_v24 = vmul.f32 %v6087_v50, %v9693_v41  ;;  %v10151_v34 = vld [vmem:[#allocation11_spill] sm:$0xff] }
 0x330   : > { %v6089_v47 = vpop.eup %6088  ;;  %v2400_v28 = vadd.f32 %v9297_v59, %v10151_v34  ;;  %v3660_v43 = vadd.f32 %v5840_v33, %v2405_v55 }
 0x331   : > { %v9726_v26 = vadd.f32 %v9638_v25, %v4884_v7  ;;  %v4883_v3 = vmul.f32 %v9633_v16, %v4844_v9  ;;  %5175 = vst.msk [vmem:[%s9677_s30 + $0x38] sm:$0xff] %vm312_vm0, %v5143_v24  ;;  %v5142_v18 = vmul.f32 %v6089_v47, %v9699_v19 }
 0x332   : > { %v3659_v31 = vadd.f32 %v3556_v54, %v2400_v28 }
 0x333   : > { %v5475_v11 = vmul.f32 -1.442695, %v9726_v26  ;;  %v9733_v35 = vadd.f32 %v9638_v25, %v4883_v3  ;;  %5174 = vst.msk [vmem:[%s9677_s30 + $0x30] sm:$0xff] %vm312_vm0, %v5142_v18 }
 0x335   : > { %6094 = vpow2.f32 %v5475_v11  ;;  %v5474_v37 = vmul.f32 -1.442695, %v9733_v35 }
 0x336   : > { %v6091_v53 = vpop.eup %6090 }
 0x337   : > { %6096 = vpow2.f32 %v5474_v37  ;;  %v5145_v56 = vmul.f32 %v6091_v53, %v4921_v49 }
 0x338   : > { %v5887_v60 = vpop.f32.mrf.mxu0  ;;  %v6093_v63 = vpop.eup %6092 }
 0x339   : > { %v4847_v6 = vadd.f32 %v5887_v60, %v3658_v40  ;;  %5177 = vst.msk [vmem:[%s9677_s30 + $0x48] sm:$0xff] %vm312_vm0, %v5145_v56  ;;  %v5144_v19 = vmul.f32 %v6093_v63, %v9711_v10  ;;  %v2410_v56 = vadd.f32 %v9346_v36, %v9302_v58 }
 0x33a   : > { %v4735_v51 = vpop.f32.mrf.mxu0 }
 0x33b   : > { %v4886_v41 = vmul.f32 %v9633_v16, %v4847_v6  ;;  %v4846_v22 = vadd.f32 %v4735_v51, %v3657_v4  ;;  %5176 = vst.msk [vmem:[%s9677_s30 + $0x40] sm:$0xff] %vm312_vm0, %v5144_v19  ;;  %v5843_v6 = vpop.f32.mrf.mxu1  ;;  %v10152_v51 = vld [vmem:[#allocation14_spill] sm:$0xff] }
 0x33c   : > { %v2415_v53 = vadd.f32 %v9317_v52, %v10152_v51 }
 0x33d   : > { %v4925_v8 = vadd.f32 %v9638_v25, %v4886_v41  ;;  %v4885_v21 = vmul.f32 %v9633_v16, %v4846_v22  ;;  %v3566_v41 = vpop.f32.mrf.mxu1 }
 0x33e   : > { %v3662_v63 = vadd.f32 %v5843_v6, %v2415_v53  ;;  %v3661_v33 = vadd.f32 %v3566_v41, %v2410_v56  ;;  %v10160_v56 = vld [vmem:[#allocation23_spill] sm:$0xff] }
 0x33f   : > { %v5477_v45 = vmul.f32 -1.442695, %v4925_v8  ;;  %v4924_v12 = vadd.f32 %v9638_v25, %v4885_v21  ;;  %v5846_v36 = vpop.f32.mrf.mxu1 }
 0x341   : > { %6098 = vpow2.f32 %v5477_v45  ;;  %v5476_v49 = vmul.f32 -1.442695, %v4924_v12 }
 0x342   : > { %v6095_v5 = vpop.eup %6094 }
 0x343   : > { %6100 = vpow2.f32 %v5476_v49  ;;  %v5051_v13 = vadd.f32 1.0, %v6095_v5 }
 0x344   : > { %v6097_v10 = vpop.eup %6096 }
 0x345   : > { %6102 = vrcp.f32 %v5051_v13  ;;  %v5050_v9 = vadd.f32 1.0, %v6097_v10  ;;  %v10155_v10 = vld [vmem:[#allocation16_spill] sm:$0xff] }
 0x346   : > { %v5890_v7 = vpop.f32.mrf.mxu0 }
 0x347   : > { %v4849_v15 = vadd.f32 %v5890_v7, %v3660_v43  ;;  %6104 = vrcp.f32 %v5050_v9  ;;  %v10153_v43 = vld [vmem:[#allocation15_spill] sm:$0xff] }
 0x348   : > { %v4745_v3 = vpop.f32.mrf.mxu0  ;;  %v10156_v7 = vld [vmem:[#allocation19_spill] sm:$0xff] }
 0x349   : > { %v4888_v2 = vmul.f32 %v9633_v16, %v4849_v15  ;;  %v4848_v50 = vadd.f32 %v4745_v3, %v3659_v31  ;;  %v2420_v9 = vadd.f32 %v10156_v7, %v10155_v10 }
 0x34b   : > { %v4927_v11 = vadd.f32 %v9638_v25, %v4888_v2  ;;  %v4887_v59 = vmul.f32 %v9633_v16, %v4848_v50 }
 0x34d   : > { %v5479_v57 = vmul.f32 -1.442695, %v4927_v11  ;;  %v9761_v14 = vadd.f32 %v9638_v25, %v4887_v59 }
 0x34e   : > { %v6099_v20 = vpop.eup %6098 }
 0x34f   : > { %6106 = vpow2.f32 %v5479_v57  ;;  %v5478_v38 = vmul.f32 -1.442695, %v9761_v14  ;;  %v5053_v24 = vadd.f32 1.0, %v6099_v20 }
 0x350   : > { %v6101_v40 = vpop.eup %6100 }
 0x351   : > { %6108 = vpow2.f32 %v5478_v38  ;;  %v5052_v47 = vadd.f32 1.0, %v6101_v40 }
 0x352   : > { %6110 = vrcp.f32 %v5053_v24  ;;  %v6103_v37 = vpop.eup %6102 }
 0x353   : > { %6112 = vrcp.f32 %v5052_v47  ;;  %v5147_v18 = vmul.f32 %v6103_v37, %v9726_v26 }
 0x354   : > { %v6105_v4 = vpop.eup %6104 }
 0x355   : > { %5179 = vst.msk [vmem:[%s9677_s30 + $0x58] sm:$0xff] %vm312_vm0, %v5147_v18  ;;  %v5146_v60 = vmul.f32 %v6105_v4, %v9733_v35  ;;  %v10157_v18 = vld [vmem:[#allocation18_spill] sm:$0xff]  ;;  %v10158_v4 = vld [vmem:[#allocation21_spill] sm:$0xff] }
 0x357   : > { %5178 = vst.msk [vmem:[%s9677_s30 + $0x50] sm:$0xff] %vm312_vm0, %v5146_v60  ;;  %v2435_v60 = vadd.f32 %v10158_v4, %v10157_v18 }
 0x35c   : > { %v6107_v22 = vpop.eup %6106 }
 0x35d   : > { %v5055_v21 = vadd.f32 1.0, %v6107_v22  ;;  %v10159_v22 = vld [vmem:[#allocation20_spill] sm:$0xff] }
 0x35e   : > { %v6109_v26 = vpop.eup %6108 }
 0x35f   : > { %v6111_v19 = vpop.eup %6110  ;;  %6114 = vrcp.f32 %v5055_v21  ;;  %v5054_v45 = vadd.f32 1.0, %v6109_v26 }
 0x360   : > { %v5149_v29 = vmul.f32 %v6111_v19, %v4925_v8  ;;  %v6113_v55 = vpop.eup %6112  ;;  %v10154_v8 = vld [vmem:[#allocation17_spill] sm:$0xff] }
 0x361   : > { %v5893_v35 = vpop.f32.mrf.mxu0  ;;  %6116 = vrcp.f32 %v5054_v45  ;;  %v5148_v49 = vmul.f32 %v6113_v55, %v4924_v12  ;;  %v2425_v5 = vadd.f32 %v10154_v8, %v10153_v43  ;;  %v3576_v12 = vpop.f32.mrf.mxu1  ;;  %v10162_v55 = vld [vmem:[#allocation25_spill] sm:$0xff]  ;;  %v10163_v8 = vld [vmem:[#allocation24_spill] sm:$0xff] }
 0x362   : > { %v4851_v61 = vadd.f32 %v5893_v35, %v3662_v63  ;;  %5181 = vst.msk [vmem:[%s9677_s30 + $0x68] sm:$0xff] %vm312_vm0, %v5149_v29  ;;  %v3663_v2 = vadd.f32 %v3576_v12, %v2420_v9 }
 0x363   : > { %v4755_v52 = vpop.f32.mrf.mxu0  ;;  %5180 = vst.msk [vmem:[%s9677_s30 + $0x60] sm:$0xff] %vm312_vm0, %v5148_v49  ;;  %v3664_v15 = vadd.f32 %v5846_v36, %v2425_v5  ;;  %v5849_v57 = vpop.f32.mrf.mxu1  ;;  %v10164_v5 = vld [vmem:[#allocation27_spill] sm:$0xff] }
 0x364   : > { %v4890_v54 = vmul.f32 %v9633_v16, %v4851_v61  ;;  %v4850_v58 = vadd.f32 %v4755_v52, %v3661_v33  ;;  %v3666_v26 = vadd.f32 %v5849_v57, %v2435_v60  ;;  %v10161_v61 = vld [vmem:[#allocation22_spill] sm:$0xff] }
 0x365   : > { %v3586_v41 = vpop.f32.mrf.mxu1  ;;  %v2445_v52 = vadd.f32 %v10162_v55, %v10161_v61 }
 0x366   : > { %v9780_v34 = vadd.f32 %v9638_v25, %v4890_v54  ;;  %v4889_v28 = vmul.f32 %v9633_v16, %v4850_v58 }
 0x367   : > { %v5852_v19 = vpop.f32.mrf.mxu1 }
 0x368   : > { %v5481_v13 = vmul.f32 -1.442695, %v9780_v34  ;;  %v9787_v31 = vadd.f32 %v9638_v25, %v4889_v28  ;;  %v3668_v10 = vadd.f32 %v5852_v19, %v2445_v52 }
 0x369   : > { %v3596_v43 = vpop.f32.mrf.mxu1 }
 0x36a   : > { %6118 = vpow2.f32 %v5481_v13  ;;  %v5480_v3 = vmul.f32 -1.442695, %v9787_v31  ;;  %v2440_v13 = vadd.f32 %v10164_v5, %v10163_v8  ;;  %v2460_v5 = vadd.f32 %v9551_v17, %v9522_v1 }
 0x36b   : > { %v5896_v50 = vpop.f32.mrf.mxu0 }
 0x36c   : > { %6120 = vpow2.f32 %v5480_v3  ;;  %v4853_v59 = vadd.f32 %v5896_v50, %v3664_v15  ;;  %v6115_v20 = vpop.eup %6114  ;;  %v3667_v15 = vadd.f32 %v3596_v43, %v2440_v13 }
 0x36d   : > { %v4765_v38 = vpop.f32.mrf.mxu0  ;;  %v5151_v24 = vmul.f32 %v6115_v20, %v4927_v11  ;;  %v2430_v11 = vadd.f32 %v10160_v56, %v10159_v22  ;;  %v2450_v22 = vadd.f32 %v9507_v30, %v9491_v46 }
 0x36e   : > { %v4892_v40 = vmul.f32 %v9633_v16, %v4853_v59  ;;  %v4852_v47 = vadd.f32 %v4765_v38, %v3663_v2  ;;  %v6117_v37 = vpop.eup %6116  ;;  %v5855_v38 = vpop.f32.mrf.mxu1 }
 0x36f   : > { %5183 = vst.msk [vmem:[%s9677_s30 + $0x78] sm:$0xff] %vm312_vm0, %v5151_v24  ;;  %v5150_v6 = vmul.f32 %v6117_v37, %v9761_v14  ;;  %v3665_v33 = vadd.f32 %v3586_v41, %v2430_v11  ;;  %v10165_v37 = vld [vmem:[#allocation26_spill] sm:$0xff] }
 0x370   : > { %v9799_v51 = vadd.f32 %v9638_v25, %v4892_v40  ;;  %v4891_v53 = vmul.f32 %v9633_v16, %v4852_v47  ;;  %v2455_v18 = vadd.f32 %v9495_v42, %v10165_v37 }
 0x371   : > { %5182 = vst.msk [vmem:[%s9677_s30 + $0x70] sm:$0xff] %vm312_vm0, %v5150_v6 }
 0x372   : > { %v5483_v63 = vmul.f32 -1.442695, %v9799_v51  ;;  %v9808_v21 = vadd.f32 %v9638_v25, %v4891_v53  ;;  %v3606_v53 = vpop.f32.mrf.mxu1 }
 0x374   : > { %6122 = vpow2.f32 %v5483_v63  ;;  %v5482_v14 = vmul.f32 -1.442695, %v9808_v21  ;;  %v3670_v63 = vadd.f32 %v5855_v38, %v2455_v18  ;;  %v5858_v30 = vpop.f32.mrf.mxu1 }
 0x376   : > { %v5899_v35 = vpop.f32.mrf.mxu0  ;;  %6124 = vpow2.f32 %v5482_v14  ;;  %v3669_v14 = vadd.f32 %v3606_v53, %v2450_v22 }
 0x377   : > { %v6119_v45 = vpop.eup %6118  ;;  %v4855_v29 = vadd.f32 %v5899_v35, %v3666_v26 }
 0x378   : > { %v5057_v49 = vadd.f32 1.0, %v6119_v45  ;;  %v4775_v54 = vpop.f32.mrf.mxu0 }
 0x379   : > { %v6121_v58 = vpop.eup %6120  ;;  %v4894_v36 = vmul.f32 %v9633_v16, %v4855_v29  ;;  %v4854_v28 = vadd.f32 %v4775_v54, %v3665_v33 }
 0x37a   : > { %6126 = vrcp.f32 %v5057_v49  ;;  %v5056_v12 = vadd.f32 1.0, %v6121_v58  ;;  %v3616_v58 = vpop.f32.mrf.mxu1 }
 0x37b   : > { %v9817_v7 = vadd.f32 %v9638_v25, %v4894_v36  ;;  %v4893_v9 = vmul.f32 %v9633_v16, %v4854_v28  ;;  %v2465_v36 = vadd.f32 %v9532_v0, %v9505_v62  ;;  %v3671_v62 = vadd.f32 %v3616_v58, %v2460_v5 }
 0x37c   : > { %6128 = vrcp.f32 %v5056_v12 }
 0x37d   : > { %v5485_v3 = vmul.f32 -1.442695, %v9817_v7  ;;  %v5902_v2 = vpop.f32.mrf.mxu0  ;;  %v9822_v50 = vadd.f32 %v9638_v25, %v4893_v9  ;;  %v3672_v12 = vadd.f32 %v5858_v30, %v2465_v36  ;;  %v5861_v9 = vpop.f32.mrf.mxu1 }
 0x37e   : > { %v4857_v59 = vadd.f32 %v5902_v2, %v3668_v10  ;;  %v10166_v2 = vld [vmem:[#allocation28_spill] sm:$0xff] }
 0x37f   : > { %6130 = vpow2.f32 %v5485_v3  ;;  %v5484_v57 = vmul.f32 -1.442695, %v9822_v50  ;;  %v4785_v20 = vpop.f32.mrf.mxu0 }
 0x380   : > { %v4896_v24 = vmul.f32 %v9633_v16, %v4857_v59  ;;  %v4856_v40 = vadd.f32 %v4785_v20, %v3667_v15  ;;  %v2475_v59 = vadd.f32 %v9574_v48, %v10166_v2  ;;  %v2470_v20 = vadd.f32 %v9594_v23, %v9563_v39 }
 0x381   : > { %6132 = vpow2.f32 %v5484_v57  ;;  %v6123_v47 = vpop.eup %6122 }
 0x382   : > { %v9829_v4 = vadd.f32 %v9638_v25, %v4896_v24  ;;  %v4895_v60 = vmul.f32 %v9633_v16, %v4856_v40  ;;  %v5059_v6 = vadd.f32 1.0, %v6123_v47  ;;  %v3626_v40 = vpop.f32.mrf.mxu1  ;;  %v3674_v48 = vadd.f32 %v5861_v9, %v2475_v59 }
 0x383   : > { %v6125_v41 = vpop.eup %6124  ;;  %v3673_v23 = vadd.f32 %v3626_v40, %v2470_v20 }
 0x384   : > { %v5487_v56 = vmul.f32 -1.442695, %v9829_v4  ;;  %v9836_v11 = vadd.f32 %v9638_v25, %v4895_v60  ;;  %6134 = vrcp.f32 %v5059_v6  ;;  %v5058_v42 = vadd.f32 1.0, %v6125_v41  ;;  %v5864_v41 = vpop.f32.mrf.mxu1 }
 0x386   : > { %6136 = vpow2.f32 %v5487_v56  ;;  %v5486_v26 = vmul.f32 -1.442695, %v9836_v11 }
 0x387   : > { %v6127_v33 = vpop.eup %6126  ;;  %6138 = vrcp.f32 %v5058_v42  ;;  %v5905_v19 = vpop.f32.mrf.mxu0 }
 0x388   : > { %v5153_v35 = vmul.f32 %v6127_v33, %v9780_v34  ;;  %6140 = vpow2.f32 %v5486_v26  ;;  %v4859_v46 = vadd.f32 %v5905_v19, %v3670_v63  ;;  %v2485_v63 = vadd.f32 %v9610_v44, %v9583_v32 }
 0x389   : > { %v6129_v45 = vpop.eup %6128  ;;  %v4795_v29 = vpop.f32.mrf.mxu0 }
 0x38a   : > { %5185 = vst.msk [vmem:[%s9677_s30 + $0x88] sm:$0xff] %vm312_vm0, %v5153_v35  ;;  %v5152_v61 = vmul.f32 %v6129_v45, %v9787_v31  ;;  %v4898_v55 = vmul.f32 %v9633_v16, %v4859_v46  ;;  %v4858_v52 = vadd.f32 %v4795_v29, %v3669_v14  ;;  %v3676_v35 = vadd.f32 %v5864_v41, %v2485_v63  ;;  %v3636_v46 = vpop.f32.mrf.mxu1 }
 0x38b   : > { %v3675_v58 = vadd.f32 %v3636_v46, %v9628_v27 }
 0x38c   : > { %v6131_v49 = vpop.eup %6130  ;;  %5184 = vst.msk [vmem:[%s9677_s30 + $0x80] sm:$0xff] %vm312_vm0, %v5152_v61  ;;  %v9847_v54 = vadd.f32 %v9638_v25, %v4898_v55  ;;  %v4897_v34 = vmul.f32 %v9633_v16, %v4858_v52 }
 0x38d   : > { %v5061_v28 = vadd.f32 1.0, %v6131_v49 }
 0x38e   : > { %v6133_v43 = vpop.eup %6132  ;;  %v5489_v8 = vmul.f32 -1.442695, %v9847_v54  ;;  %v9854_v31 = vadd.f32 %v9638_v25, %v4897_v34 }
 0x38f   : > { %6142 = vrcp.f32 %v5061_v28  ;;  %v5060_v13 = vadd.f32 1.0, %v6133_v43 }
 0x390   : > { %6144 = vpow2.f32 %v5489_v8  ;;  %v5488_v10 = vmul.f32 -1.442695, %v9854_v31 }
 0x391   : > { %6146 = vrcp.f32 %v5060_v13  ;;  %v6135_v0 = vpop.eup %6134 }
 0x392   : > { %v5908_v15 = vpop.f32.mrf.mxu0  ;;  %6148 = vpow2.f32 %v5488_v10  ;;  %v5155_v1 = vmul.f32 %v6135_v0, %v9799_v51 }
 0x393   : > { %v6137_v3 = vpop.eup %6136  ;;  %v4861_v17 = vadd.f32 %v5908_v15, %v3672_v12 }
 0x394   : > { %v6139_v57 = vpop.eup %6138  ;;  %v5063_v38 = vadd.f32 1.0, %v6137_v3  ;;  %v4805_v24 = vpop.f32.mrf.mxu0  ;;  %5187 = vst.msk [vmem:[%s9677_s30 + $0x98] sm:$0xff] %vm312_vm0, %v5155_v1 }
 0x395   : > { %v6141_v47 = vpop.eup %6140  ;;  %v5154_v37 = vmul.f32 %v6139_v57, %v9808_v21  ;;  %v4900_v18 = vmul.f32 %v9633_v16, %v4861_v17  ;;  %v4860_v60 = vadd.f32 %v4805_v24, %v3671_v62 }
 0x396   : > { %6150 = vrcp.f32 %v5063_v38  ;;  %v5062_v6 = vadd.f32 1.0, %v6141_v47 }
 0x397   : > { %5186 = vst.msk [vmem:[%s9677_s30 + $0x90] sm:$0xff] %vm312_vm0, %v5154_v37  ;;  %v9871_v51 = vadd.f32 %v9638_v25, %v4900_v18  ;;  %v4899_v39 = vmul.f32 %v9633_v16, %v4860_v60 }
 0x398   : > { %6152 = vrcp.f32 %v5062_v6  ;;  %v5911_v53 = vpop.f32.mrf.mxu0 }
 0x399   : > { %v5491_v22 = vmul.f32 -1.442695, %v9871_v51  ;;  %v9876_v21 = vadd.f32 %v9638_v25, %v4899_v39  ;;  %v4863_v56 = vadd.f32 %v5911_v53, %v3674_v48 }
 0x39a   : > { %v4815_v42 = vpop.f32.mrf.mxu0 }
 0x39b   : > { %6154 = vpow2.f32 %v5491_v22  ;;  %v5490_v26 = vmul.f32 -1.442695, %v9876_v21  ;;  %v4902_v14 = vmul.f32 %v9633_v16, %v4863_v56  ;;  %v4862_v33 = vadd.f32 %v4815_v42, %v3673_v23 }
 0x39c   : > { %v6143_v19 = vpop.eup %6142 }
 0x39d   : > { %v6145_v30 = vpop.eup %6144  ;;  %v5157_v45 = vmul.f32 %v6143_v19, %v9817_v7  ;;  %6156 = vpow2.f32 %v5490_v26  ;;  %v9884_v29 = vadd.f32 %v9638_v25, %v4902_v14  ;;  %v4901_v32 = vmul.f32 %v9633_v16, %v4862_v33 }
 0x39e   : > { %v6147_v44 = vpop.eup %6146  ;;  %v5065_v61 = vadd.f32 1.0, %v6145_v30 }
 0x39f   : > { %v6149_v55 = vpop.eup %6148  ;;  %5189 = vst.msk [vmem:[%s9677_s30 + $0xa8] sm:$0xff] %vm312_vm0, %v5157_v45  ;;  %v5156_v52 = vmul.f32 %v6147_v44, %v9822_v50  ;;  %v5493_v49 = vmul.f32 -1.442695, %v9884_v29  ;;  %v4940_v34 = vadd.f32 %v9638_v25, %v4901_v32 }
 0x3a0   : > { %6158 = vrcp.f32 %v5065_v61  ;;  %v5064_v7 = vadd.f32 1.0, %v6149_v55  ;;  %v5914_v36 = vpop.f32.mrf.mxu0 }
 0x3a1   : > { %5188 = vst.msk [vmem:[%s9677_s30 + $0xa0] sm:$0xff] %vm312_vm0, %v5156_v52  ;;  %6160 = vpow2.f32 %v5493_v49  ;;  %v5492_v28 = vmul.f32 -1.442695, %v4940_v34  ;;  %v4865_v43 = vadd.f32 %v5914_v36, %v3676_v35 }
 0x3a2   : > { %6162 = vrcp.f32 %v5064_v7  ;;  %v4825_v8 = vpop.f32.mrf.mxu0 }
 0x3a3   : > { %v6151_v5 = vpop.eup %6150  ;;  %6164 = vpow2.f32 %v5492_v28  ;;  %v4904_v50 = vmul.f32 %v9633_v16, %v4865_v43  ;;  %v4864_v13 = vadd.f32 %v4825_v8, %v3675_v58 }
 0x3a4   : > { %v5159_v12 = vmul.f32 %v6151_v5, %v9829_v4 }
 0x3a5   : > { %v6153_v27 = vpop.eup %6152  ;;  %v4943_v10 = vadd.f32 %v9638_v25, %v4904_v50  ;;  %v4903_v9 = vmul.f32 %v9633_v16, %v4864_v13 }
 0x3a6   : > { %5191 = vst.msk [vmem:[%s9677_s30 + $0xb8] sm:$0xff] %vm312_vm0, %v5159_v12  ;;  %v5158_v62 = vmul.f32 %v6153_v27, %v9836_v11 }
 0x3a7   : > { %v5495_v0 = vmul.f32 -1.442695, %v4943_v10  ;;  %v4942_v15 = vadd.f32 %v9638_v25, %v4903_v9 }
 0x3a8   : > { %v6155_v3 = vpop.eup %6154  ;;  %5190 = vst.msk [vmem:[%s9677_s30 + $0xb0] sm:$0xff] %vm312_vm0, %v5158_v62 }
 0x3a9   : > { %v5067_v2 = vadd.f32 1.0, %v6155_v3  ;;  %6166 = vpow2.f32 %v5495_v0  ;;  %v5494_v59 = vmul.f32 -1.442695, %v4942_v15 }
 0x3aa   : > { %v6157_v4 = vpop.eup %6156 }
 0x3ab   : > { %6168 = vrcp.f32 %v5067_v2  ;;  %v5066_v1 = vadd.f32 1.0, %v6157_v4 }
 0x3ac   : > { %6170 = vpow2.f32 %v5494_v59 }
 0x3ad   : > { %v6159_v16 = vpop.eup %6158  ;;  %6172 = vrcp.f32 %v5066_v1 }
 0x3ae   : > { %v6161_v17 = vpop.eup %6160  ;;  %v5161_v11 = vmul.f32 %v6159_v16, %v9847_v54 }
 0x3af   : > { %v6163_v57 = vpop.eup %6162  ;;  %v5069_v20 = vadd.f32 1.0, %v6161_v17 }
 0x3b0   : > { %v6165_v25 = vpop.eup %6164  ;;  %5193 = vst.msk [vmem:[%s9677_s30 + $0xc8] sm:$0xff] %vm312_vm0, %v5161_v11  ;;  %v5160_v38 = vmul.f32 %v6163_v57, %v9854_v31 }
 0x3b1   : > { %6174 = vrcp.f32 %v5069_v20  ;;  %v5068_v24 = vadd.f32 1.0, %v6165_v25 }
 0x3b2   : > { %5192 = vst.msk [vmem:[%s9677_s30 + $0xc0] sm:$0xff] %vm312_vm0, %v5160_v38 }
 0x3b3   : > { %6176 = vrcp.f32 %v5068_v24 }
 0x3b6   : > { %v6167_v40 = vpop.eup %6166 }
 0x3b7   : > { %v5071_v47 = vadd.f32 1.0, %v6167_v40 }
 0x3b8   : > { %v6169_v37 = vpop.eup %6168 }
 0x3b9   : > { %v6171_v54 = vpop.eup %6170  ;;  %v5163_v18 = vmul.f32 %v6169_v37, %v9871_v51  ;;  %6178 = vrcp.f32 %v5071_v47 }
 0x3ba   : > { %v6173_v60 = vpop.eup %6172  ;;  %v5070_v48 = vadd.f32 1.0, %v6171_v54 }
 0x3bb   : > { %5195 = vst.msk [vmem:[%s9677_s30 + $0xd8] sm:$0xff] %vm312_vm0, %v5163_v18  ;;  %v5162_v31 = vmul.f32 %v6173_v60, %v9876_v21 }
 0x3bc   : > { %6180 = vrcp.f32 %v5070_v48 }
 0x3bd   : > { %5194 = vst.msk [vmem:[%s9677_s30 + $0xd0] sm:$0xff] %vm312_vm0, %v5162_v31 }
 0x3be   : > { %v6175_v6 = vpop.eup %6174 }
 0x3bf   : > { %v5165_v39 = vmul.f32 %v6175_v6, %v9884_v29 }
 0x3c0   : > { %v6177_v23 = vpop.eup %6176 }
 0x3c1   : > { %5197 = vst.msk [vmem:[%s9677_s30 + $0xe8] sm:$0xff] %vm312_vm0, %v5165_v39  ;;  %v5164_v53 = vmul.f32 %v6177_v23, %v4940_v34 }
 0x3c3   : > { %5196 = vst.msk [vmem:[%s9677_s30 + $0xe0] sm:$0xff] %vm312_vm0, %v5164_v53 }
 0x3c6   : > { %v6179_v51 = vpop.eup %6178 }
 0x3c7   : > { %v5167_v41 = vmul.f32 %v6179_v51, %v4943_v10 }
 0x3c9   : > { %v6181_v22 = vpop.eup %6180  ;;  %5199 = vst.msk [vmem:[%s9677_s30 + $0xf8] sm:$0xff] %vm312_vm0, %v5167_v41 }
 0x3ca   : > { %v5166_v56 = vmul.f32 %v6181_v22, %v4942_v15 }
 0x3cc   : > { %5198 = vst.msk [vmem:[%s9677_s30 + $0xf0] sm:$0xff] %vm312_vm0, %v5166_v56 }
 0x3cd PF: > { %s17_s24 = sadd.s32 1, %s6203_s24  }
 0x3ce   : > { %p14_p4 = scmp.ge.s32.totalorder %s17_s24, 4  }
 0x3d0   :  { %16 = sbr.rel (!%p14_p4) target bundleno = 1 (0x1), region = 83 }

</bundles_post_ra>
